<compile_context>
chip_gen: v7x
topology: tpu7x:2x2x1
jax: 0.10.0
libtpu: 0.0.40
codegen_flags: <defaults>
</compile_context>

<pallas_src>
import functools

import jax
import jax.numpy as jnp
from jax.experimental import pallas as pl
from jax.experimental.pallas import tpu as pltpu

NEG_INF = -1000000.0
LN_EPS = 1e-5                      # PyTorch nn.LayerNorm default
MXU_DTYPE = jnp.bfloat16           # matmul-input dtype (f32 accumulation kept)


# ----------------------------- Pallas kernels ------------------------------ #

def _fused_attn_kernel(x_ref, y_ref, rpb_ref, mask_ref, g1_ref, b1_ref,
                       wq_ref, bq_ref, wk_ref, bk_ref, wv_ref, bv_ref,
                       wo_ref, bo_ref, o_ref, *, num_heads, scale):
    """LN1 + q/kv projection + windowed multi-head cross attention + proj.

    Block shapes:
      x_ref, y_ref, o_ref : (WB, N, C)    (WB windows per grid step, heads folded in C)
      rpb_ref             : (nH, N, N)    (resident relative-position bias)
      mask_ref            : (WB, 1, N)    (additive pad mask, 0 / NEG_INF)
    """
    wb, N, C = x_ref.shape
    hd = C // num_heads

    # --- LayerNorm1 on x (rowwise; commutes with the window permutation) ---
    x = x_ref[...].astype(jnp.float32)
    mu = jnp.mean(x, axis=-1, keepdims=True)
    xc = x - mu
    var = jnp.mean(xc * xc, axis=-1, keepdims=True)
    xn = xc * jax.lax.rsqrt(var + LN_EPS) * g1_ref[...] + b1_ref[...]

    x2 = xn.reshape(wb * N, C)
    y2 = y_ref[...].astype(jnp.float32).reshape(wb * N, C)

    def proj(inp, w_ref, b_ref):
        return (jnp.dot(inp.astype(MXU_DTYPE), w_ref[...].astype(MXU_DTYPE),
                        preferred_element_type=jnp.float32) + b_ref[...])

    # reference uses self.qkv for both x and y; only q(x), k(y), v(y) are needed
    q = proj(x2, wq_ref, bq_ref).reshape(wb, N, C)
    k = proj(y2, wk_ref, bk_ref).reshape(wb, N, C)
    v = proj(y2, wv_ref, bv_ref).reshape(wb, N, C)

    mask = mask_ref[...]                      # (wb, 1, N)  additive
    rpb = rpb_ref[...]                        # (nH, N, N)

    outs = []
    for h in range(num_heads):                # static unroll over heads
        lo = h * hd
        qh = q[:, :, lo:lo + hd] * scale      # (wb, N, hd)
        kh = k[:, :, lo:lo + hd]
        vh = v[:, :, lo:lo + hd]
        s = jnp.einsum('wqd,wkd->wqk', qh.astype(MXU_DTYPE), kh.astype(MXU_DTYPE),
                       preferred_element_type=jnp.float32)       # (wb, N, N)
        s = s + rpb[h][None, :, :] + mask
        s = s - jnp.max(s, axis=-1, keepdims=True)
        p = jnp.exp(s)
        denom = jnp.sum(p, axis=-1, keepdims=True)
        p = p * pl.reciprocal(denom, approx=True)                # EUP, frees VALU
        outs.append(jnp.einsum('wqk,wkd->wqd', p.astype(MXU_DTYPE),
                               vh.astype(MXU_DTYPE),
                               preferred_element_type=jnp.float32))
    ctx = jnp.concatenate(outs, axis=-1).reshape(wb * N, C)      # heads -> lanes

    out = (jnp.dot(ctx.astype(MXU_DTYPE), wo_ref[...].astype(MXU_DTYPE),
                   preferred_element_type=jnp.float32) + bo_ref[...])
    o_ref[...] = out.reshape(wb, N, C).astype(o_ref.dtype)


def _fused_mlp_kernel(sc_ref, ax_ref, g_ref, bta_ref,
                      w1_ref, b1_ref, w2_ref, b2_ref, o_ref):
    """out = x + fc2(GELU(fc1(LN2(x)))) with x = shortcut + attn (both residuals fused)."""
    x = sc_ref[...].astype(jnp.float32) + ax_ref[...].astype(jnp.float32)
    mu = jnp.mean(x, axis=-1, keepdims=True)
    xc = x - mu
    var = jnp.mean(xc * xc, axis=-1, keepdims=True)
    xn = xc * jax.lax.rsqrt(var + LN_EPS) * g_ref[...] + bta_ref[...]

    h = jnp.dot(xn.astype(MXU_DTYPE), w1_ref[...].astype(MXU_DTYPE),
                preferred_element_type=jnp.float32) + b1_ref[...]
    # TODO(synk): tanh-approx GELU in-kernel; exact erf GELU (PyTorch default)
    #             lowering inside Mosaic is not guaranteed, error <= ~3e-4.
    h = 0.5 * h * (1.0 + jnp.tanh(0.7978845608028654 * (h + 0.044715 * h * h * h)))
    y = jnp.dot(h.astype(MXU_DTYPE), w2_ref[...].astype(MXU_DTYPE),
                preferred_element_type=jnp.float32) + b2_ref[...]
    o_ref[...] = (x + y).astype(o_ref.dtype)


# ------------------------------ kernel wrappers ----------------------------- #

def _pick_wb(B_, N):
    """Windows per attention grid step (divisor of B_, M-dim ~128-256 rows)."""
    target = max(1, 256 // max(N, 1))
    for cand in range(min(target, B_), 0, -1):
        if B_ % cand == 0:
            return cand
    return 1


def _pick_row_tile(R, cap=512):
    """Row tile for the MLP kernel (sized well under v7x's 64 MiB VMEM at these dims)."""
    if R <= cap:
        return R
    t = (cap // 8) * 8
    while t >= 8:
        if R % t == 0:
            return t
        t -= 8
    return cap  # edge block: padded rows are computed rowwise and dropped by the store


def fused_window_attention(xw, yw, rpb, mask, params, num_heads, scale):
    """xw, yw: (B_, N, C); rpb: (nH, N, N); mask: (B_, 1, N) additive."""
    B_, N, C = xw.shape
    nH = num_heads
    wb = _pick_wb(B_, N)
    grid = (B_ // wb,)

    wq = params["qkv_w"][:, :C]
    wk = params["qkv_w"][:, C:2 * C]
    wv = params["qkv_w"][:, 2 * C:]
    bq = params["qkv_b"][:C].reshape(1, C)
    bk = params["qkv_b"][C:2 * C].reshape(1, C)
    bv = params["qkv_b"][2 * C:].reshape(1, C)
    wo = params["proj_w"]
    bo = params["proj_b"].reshape(1, C)
    g1 = params["norm1_g"].reshape(1, 1, C)
    b1 = params["norm1_b"].reshape(1, 1, C)

    win_spec = pl.BlockSpec((wb, N, C), lambda i: (i, 0, 0))
    mask_spec = pl.BlockSpec((wb, 1, N), lambda i: (i, 0, 0))

    def full(shp):
        return pl.BlockSpec(shp, lambda i, _s=shp: (0,) * len(_s))

    return pl.pallas_call(
        functools.partial(_fused_attn_kernel, num_heads=nH, scale=scale),
        grid=grid,
        in_specs=[win_spec, win_spec,
                  full((nH, N, N)),            # relative position bias (resident)
                  mask_spec,
                  full((1, 1, C)), full((1, 1, C)),      # LN1 gamma / beta
                  full((C, C)), full((1, C)),            # W_q, b_q
                  full((C, C)), full((1, C)),            # W_k, b_k
                  full((C, C)), full((1, C)),            # W_v, b_v
                  full((C, C)), full((1, C))],           # W_proj, b_proj
        out_specs=win_spec,
        out_shape=jax.ShapeDtypeStruct((B_, N, C), jnp.float32),
        compiler_params=pltpu.CompilerParams(dimension_semantics=("parallel",)),
    )(xw, yw, rpb, mask, g1, b1, wq, bq, wk, bk, wv, bv, wo, bo)


def fused_mlp_block(shortcut2d, attn2d, params):
    R, C = shortcut2d.shape
    hidden = params["fc1_w"].shape[1]
    tr = _pick_row_tile(R)
    grid = (pl.cdiv(R, tr),)

    row_spec = pl.BlockSpec((tr, C), lambda i: (i, 0))

    def full(shp):
        return pl.BlockSpec(shp, lambda i, _s=shp: (0,) * len(_s))

    return pl.pallas_call(
        _fused_mlp_kernel,
        grid=grid,
        in_specs=[row_spec, row_spec,
                  full((1, C)), full((1, C)),                 # LN2 gamma / beta
                  full((C, hidden)), full((1, hidden)),       # fc1
                  full((hidden, C)), full((1, C))],           # fc2
        out_specs=row_spec,
        out_shape=jax.ShapeDtypeStruct((R, C), jnp.float32),
        compiler_params=pltpu.CompilerParams(dimension_semantics=("parallel",)),
    )(shortcut2d, attn2d,
      params["norm2_g"].reshape(1, C), params["norm2_b"].reshape(1, C),
      params["fc1_w"], params["fc1_b"].reshape(1, hidden),
      params["fc2_w"], params["fc2_b"].reshape(1, C))


# --------------------------- parameter construction ------------------------ #

def init_params(key, dim, num_heads, mlp_ratio=4.0):
    pos_dim = (dim // 4) // 4                      # DynamicPosBias(dim//4, ...).pos_dim
    hidden = int(dim * mlp_ratio)
    ks = jax.random.split(key, 12)
    w = lambda k, shape: jax.random.normal(k, shape, jnp.float32) * 0.02
    b = lambda k, n: jax.random.normal(k, (n,), jnp.float32) * 0.02
    kb = jax.random.split(ks[11], 12)
    return {
        "norm1_g": jnp.ones((dim,)), "norm1_b": jnp.zeros((dim,)),
        "norm2_g": jnp.ones((dim,)), "norm2_b": jnp.zeros((dim,)),
        "qkv_w": w(ks[0], (dim, 3 * dim)), "qkv_b": b(kb[0], 3 * dim),
        "proj_w": w(ks[1], (dim, dim)),    "proj_b": b(kb[1], dim),
        "fc1_w": w(ks[2], (dim, hidden)), "fc1_b": b(kb[2], hidden),
        "fc2_w": w(ks[3], (hidden, dim)), "fc2_b": b(kb[3], dim),
        # DynamicPosBias(dim // 4, num_heads, residual=False)
        "pos_proj_w": w(ks[4], (3, pos_dim)), "pos_proj_b": b(kb[4], pos_dim),
        "pos1_ln_g": jnp.ones((pos_dim,)), "pos1_ln_b": jnp.zeros((pos_dim,)),
        "pos1_w": w(ks[5], (pos_dim, pos_dim)), "pos1_b": b(kb[5], pos_dim),
        "pos2_ln_g": jnp.ones((pos_dim,)), "pos2_ln_b": jnp.zeros((pos_dim,)),
        "pos2_w": w(ks[6], (pos_dim, pos_dim)), "pos2_b": b(kb[6], pos_dim),
        "pos3_ln_g": jnp.ones((pos_dim,)), "pos3_ln_b": jnp.zeros((pos_dim,)),
        "pos3_w": w(ks[7], (pos_dim, num_heads)), "pos3_b": b(kb[7], num_heads),
    }


def _ln_jax(x, g, b):
    mu = jnp.mean(x, axis=-1, keepdims=True)
    xc = x - mu
    var = jnp.mean(xc * xc, axis=-1, keepdims=True)
    return xc * jax.lax.rsqrt(var + LN_EPS) * g + b


def dynamic_pos_bias(params, biases):
    """DynamicPosBias, residual=False. Tiny (M, 3) MLP -> plain JAX (constant per shape)."""
    pos = biases @ params["pos_proj_w"] + params["pos_proj_b"]
    h = jax.nn.relu(_ln_jax(pos, params["pos1_ln_g"], params["pos1_ln_b"]))
    pos = h @ params["pos1_w"] + params["pos1_b"]
    h = jax.nn.relu(_ln_jax(pos, params["pos2_ln_g"], params["pos2_ln_b"]))
    pos = h @ params["pos2_w"] + params["pos2_b"]
    h = jax.nn.relu(_ln_jax(pos, params["pos3_ln_g"], params["pos3_ln_b"]))
    pos = h @ params["pos3_w"] + params["pos3_b"]
    return pos  # (M, num_heads)


def relative_position_bias(params, G, num_heads):
    """(num_heads, N, N) bias table, N = G**3 (matches the PyTorch index math)."""
    ph = jnp.arange(1 - G, G)
    biases = jnp.stack(jnp.meshgrid(ph, ph, ph, indexing="ij"))
    biases = biases.reshape(3, -1).T.astype(jnp.float32)            # (M, 3)

    coords = jnp.stack(jnp.meshgrid(jnp.arange(G), jnp.arange(G),
                                    jnp.arange(G), indexing="ij"))
    coords = coords.reshape(3, -1)
    rel = coords[:, :, None] - coords[:, None, :]
    rel = rel.transpose(1, 2, 0) + jnp.array([G - 1, G - 1, G - 1])
    rel = rel * jnp.array([(2 * G - 1) * (2 * G - 1), 2 * G - 1, 1])
    rel_pos_index = rel.sum(-1)                                      # (N, N)

    pos = dynamic_pos_bias(params, biases)                            # (M, nH)
    N = G ** 3
    rpb = pos[rel_pos_index.reshape(-1)].reshape(N, N, num_heads)
    return rpb.transpose(2, 0, 1).astype(jnp.float32)                 # (nH, N, N)


# ------------------------------- block forward ----------------------------- #

def cross_attention_former_block(params, x, y, H, W, D, num_heads,
                                 group_size=4, interval=4, lsda_flag=0,
                                 mlp_ratio=4.0):
    B, L, C = x.shape
    assert L == H * W * D

    if min(H, W, D) <= group_size:
        lsda_flag = 0
        group_size = min(H, W, D)

    shortcut = x

    x5 = x.reshape(B, H, W, D, C)
    y5 = y.reshape(B, H, W, D, C)

    size_div = interval if lsda_flag == 1 else group_size
    pad_b = (size_div - H % size_div) % size_div
    pad_r = (size_div - W % size_div) % size_div
    pad_d = (size_div - D % size_div) % size_div
    x5 = jnp.pad(x5, ((0, 0), (0, pad_b), (0, pad_r), (0, pad_d), (0, 0)))
    y5 = jnp.pad(y5, ((0, 0), (0, pad_b), (0, pad_r), (0, pad_d), (0, 0)))
    Hp, Wp, Dp = H + pad_b, W + pad_r, D + pad_d

    # TODO(synk): LDA (lsda_flag == 1) interval partition not implemented; the forward
    #             forces lsda_flag = 0 whenever min(H, W, D) <= group_size (our case).
    assert lsda_flag == 0
    G = group_size
    nG = (Hp * Wp * Dp) // (G ** 3)
    N = G ** 3
    B_ = B * nG

    def partition(t):
        t = t.reshape(B, Hp // G, G, Wp // G, G, Dp // G, G, C)
        t = t.transpose(0, 1, 3, 5, 2, 4, 6, 7)
        return t.reshape(B_, N, C)

    # LN1 is rowwise -> commutes with the window permutation; it is applied inside
    # the attention kernel (padded rows only produce queries, which are cropped).
    xw = partition(x5)
    yw = partition(y5)

    # padding mask -> additive (0 / NEG_INF) per-window key mask, (B_, 1, N)
    if pad_r > 0 or pad_b > 0 or pad_d > 0:
        m = jnp.zeros((1, Hp, Wp, Dp, 1), jnp.float32)
        if pad_b > 0:
            m = m.at[:, Hp - pad_b:, :, :, :].set(-1.0)
        if pad_r > 0:
            m = m.at[:, :, Wp - pad_r:, :, :].set(-1.0)
        if pad_d > 0:
            # faithfully reproduces the reference, which masks the W axis again here
            m = m.at[:, :, Wp - pad_d:, :, :].set(-1.0)
        m = m.reshape(1, Hp // G, G, Wp // G, G, Dp // G, G, 1)
        m = m.transpose(0, 1, 3, 5, 2, 4, 6, 7).reshape(nG, 1, N)
        add_mask = jnp.where(m < 0, NEG_INF, 0.0).astype(jnp.float32)
        mask = jnp.tile(add_mask, (B, 1, 1))            # (B_, 1, N)
    else:
        mask = jnp.zeros((B_, 1, N), jnp.float32)

    rpb = relative_position_bias(params, G, num_heads)   # (nH, N, N), plain JAX

    head_dim = C // num_heads
    scale = head_dim ** (-0.5)

    # fused: LN1 + q/kv projection + attention (+bias +mask) + output projection
    attn = fused_window_attention(xw, yw, rpb, mask, params, num_heads, scale)

    # reverse window partition + crop the padding
    xout = attn.reshape(B, Hp // G, Wp // G, Dp // G, G, G, G, C)
    xout = xout.transpose(0, 1, 4, 2, 5, 3, 6, 7).reshape(B, Hp, Wp, Dp, C)
    xout = xout[:, :H, :W, :D, :].reshape(B * L, C)

    # fused: x = shortcut + attn ; out = x + fc2(GELU(fc1(LN2(x))))
    out = fused_mlp_block(shortcut.reshape(B * L, C), xout, params)
    return out.reshape(B, L, C)


# --------------------------- pure-JAX reference ----------------------------- #

def reference_forward(params, x, y, H, W, D, num_heads,
                      group_size=4, interval=4, lsda_flag=0, mlp_ratio=4.0):
    """Direct JAX translation of the PyTorch forward (f32, exact erf GELU)."""
    B, L, C = x.shape
    if min(H, W, D) <= group_size:
        lsda_flag = 0
        group_size = min(H, W, D)
    shortcut = x
    xn = _ln_jax(x, params["norm1_g"], params["norm1_b"])
    x5 = xn.reshape(B, H, W, D, C)
    y5 = y.reshape(B, H, W, D, C)
    size_div = interval if lsda_flag == 1 else group_size
    pad_b = (size_div - H % size_div) % size_div
    pad_r = (size_div - W % size_div) % size_div
    pad_d = (size_div - D % size_div) % size_div
    x5 = jnp.pad(x5, ((0, 0), (0, pad_b), (0, pad_r), (0, pad_d), (0, 0)))
    y5 = jnp.pad(y5, ((0, 0), (0, pad_b), (0, pad_r), (0, pad_d), (0, 0)))
    Hp, Wp, Dp = H + pad_b, W + pad_r, D + pad_d
    G = group_size
    N = G ** 3
    nG = (Hp * Wp * Dp) // N
    B_ = B * nG

    def part(t):
        t = t.reshape(B, Hp // G, G, Wp // G, G, Dp // G, G, C)
        return t.transpose(0, 1, 3, 5, 2, 4, 6, 7).reshape(B_, N, C)

    xw, yw = part(x5), part(y5)

    wq = params["qkv_w"][:, :C]; wk = params["qkv_w"][:, C:2 * C]; wv = params["qkv_w"][:, 2 * C:]
    bq = params["qkv_b"][:C]; bk = params["qkv_b"][C:2 * C]; bv = params["qkv_b"][2 * C:]
    nH = num_heads
    hd = C // nH
    scale = hd ** (-0.5)

    q = (xw @ wq + bq).reshape(B_, N, nH, hd).transpose(0, 2, 1, 3) * scale
    k = (yw @ wk + bk).reshape(B_, N, nH, hd).transpose(0, 2, 1, 3)
    v = (yw @ wv + bv).reshape(B_, N, nH, hd).transpose(0, 2, 1, 3)
    attn = jnp.einsum('bhqd,bhkd->bhqk', q, k)
    attn = attn + relative_position_bias(params, G, nH)[None]
    if pad_b > 0 or pad_r > 0 or pad_d > 0:
        m = jnp.zeros((1, Hp, Wp, Dp, 1), jnp.float32)
        if pad_b > 0:
            m = m.at[:, Hp - pad_b:, :, :, :].set(-1.0)
        if pad_r > 0:
            m = m.at[:, :, Wp - pad_r:, :, :].set(-1.0)
        if pad_d > 0:
            m = m.at[:, :, Wp - pad_d:, :, :].set(-1.0)
        m = m.reshape(1, Hp // G, G, Wp // G, G, Dp // G, G, 1)
        m = m.transpose(0, 1, 3, 5, 2, 4, 6, 7).reshape(nG, 1, N)
        addm = jnp.where(m < 0, NEG_INF, 0.0)
        attn = (attn.reshape(B, nG, nH, N, N) + addm[None, :, None, :, :]).reshape(B_, nH, N, N)
    attn = jax.nn.softmax(attn, axis=-1)
    ctx = jnp.einsum('bhqk,bhkd->bhqd', attn, v).transpose(0, 2, 1, 3).reshape(B_, N, C)
    ao = ctx @ params["proj_w"] + params["proj_b"]

    ao = ao.reshape(B, Hp // G, Wp // G, Dp // G, G, G, G, C)
    ao = ao.transpose(0, 1, 4, 2, 5, 3, 6, 7).reshape(B, Hp, Wp, Dp, C)
    ao = ao[:, :H, :W, :D, :].reshape(B, L, C)

    xr = shortcut + ao
    xn2 = _ln_jax(xr, params["norm2_g"], params["norm2_b"])
    h = xn2 @ params["fc1_w"] + params["fc1_b"]
    h = jax.nn.gelu(h, approximate=False)
    mo = h @ params["fc2_w"] + params["fc2_b"]
    return xr + mo


# ---------------------------------- main ----------------------------------- #

if __name__ == "__main__":
    B, H, W, D = 2, 4, 4, 4
    dim, num_heads = 32, 4
    L = H * W * D

    key = jax.random.PRNGKey(0)
    kx, ky, kp = jax.random.split(key, 3)
    x = jax.random.normal(kx, (B, L, dim), jnp.float32)
    y = jax.random.normal(ky, (B, L, dim), jnp.float32)
    params = init_params(kp, dim, num_heads, mlp_ratio=4.0)

    fwd = jax.jit(cross_attention_former_block,
                  static_argnums=(3, 4, 5, 6, 7, 8, 9, 10))
    out = fwd(params, x, y, H, W, D, num_heads, 4, 4, 0, 4.0)
    out = jax.block_until_ready(out)
    assert out.shape == (B, L, dim)
    assert bool(jnp.all(jnp.isfinite(out)))

    # Pure-JAX reference check (loose tolerance: bf16 MXU inputs + tanh-GELU approx).
    ref = reference_forward(params, x, y, H, W, D, num_heads, 4, 4, 0, 4.0)
    ref = jax.block_until_ready(ref)
    max_err = float(jnp.max(jnp.abs(out - ref)))
    assert max_err < 2e-2, f"kernel/reference mismatch: max abs err {max_err}"

    print("KERNEL_OK")
</pallas_src>

<mosaic_0001>
module attributes {stable_mosaic.version = 11 : i64} {
  func.func @_fused_attn_kernel(%arg0: i32, %arg1: memref<2x64x32xf32, #tpu.memory_space<vmem>>, %arg2: memref<2x64x32xf32, #tpu.memory_space<vmem>>, %arg3: memref<4x64x64xf32, #tpu.memory_space<vmem>>, %arg4: memref<2x1x64xf32, #tpu.memory_space<vmem>>, %arg5: memref<1x1x32xf32, #tpu.memory_space<vmem>>, %arg6: memref<1x1x32xf32, #tpu.memory_space<vmem>>, %arg7: memref<32x32xf32, #tpu.memory_space<vmem>>, %arg8: memref<1x32xf32, #tpu.memory_space<vmem>>, %arg9: memref<32x32xf32, #tpu.memory_space<vmem>>, %arg10: memref<1x32xf32, #tpu.memory_space<vmem>>, %arg11: memref<32x32xf32, #tpu.memory_space<vmem>>, %arg12: memref<1x32xf32, #tpu.memory_space<vmem>>, %arg13: memref<32x32xf32, #tpu.memory_space<vmem>>, %arg14: memref<1x32xf32, #tpu.memory_space<vmem>>, %arg15: memref<2x64x32xf32, #tpu.memory_space<vmem>>) attributes {dimension_semantics = [#tpu.dimension_semantics<parallel>], iteration_bounds = array<i64: 1>, scalar_prefetch = 0 : i64, scratch_operands = 0 : i64, tpu.core_type = #tpu.core_type<tc>, window_params = [{transform_indices = @transform_0, window_bounds = array<i64: 2, 64, 32>}, {transform_indices = @transform_1, window_bounds = array<i64: 2, 64, 32>}, {pipeline_mode = #tpu.pipeline_mode<synchronous>, transform_indices = @transform_2, window_bounds = array<i64: 4, 64, 64>}, {transform_indices = @transform_3, window_bounds = array<i64: 2, 1, 64>}, {pipeline_mode = #tpu.pipeline_mode<synchronous>, transform_indices = @transform_4, window_bounds = array<i64: 1, 1, 32>}, {pipeline_mode = #tpu.pipeline_mode<synchronous>, transform_indices = @transform_5, window_bounds = array<i64: 1, 1, 32>}, {pipeline_mode = #tpu.pipeline_mode<synchronous>, transform_indices = @transform_6, window_bounds = array<i64: 32, 32>}, {pipeline_mode = #tpu.pipeline_mode<synchronous>, transform_indices = @transform_7, window_bounds = array<i64: 1, 32>}, {pipeline_mode = #tpu.pipeline_mode<synchronous>, transform_indices = @transform_8, window_bounds = array<i64: 32, 32>}, {pipeline_mode = #tpu.pipeline_mode<synchronous>, transform_indices = @transform_9, window_bounds = array<i64: 1, 32>}, {pipeline_mode = #tpu.pipeline_mode<synchronous>, transform_indices = @transform_10, window_bounds = array<i64: 32, 32>}, {pipeline_mode = #tpu.pipeline_mode<synchronous>, transform_indices = @transform_11, window_bounds = array<i64: 1, 32>}, {pipeline_mode = #tpu.pipeline_mode<synchronous>, transform_indices = @transform_12, window_bounds = array<i64: 32, 32>}, {pipeline_mode = #tpu.pipeline_mode<synchronous>, transform_indices = @transform_13, window_bounds = array<i64: 1, 32>}, {transform_indices = @transform_14, window_bounds = array<i64: 2, 64, 32>}]} {
    %c0 = arith.constant 0 : index
    %c0_0 = arith.constant 0 : index
    %c0_1 = arith.constant 0 : index
    %0 = vector.load %arg1[%c0, %c0_0, %c0_1] : memref<2x64x32xf32, #tpu.memory_space<vmem>>, vector<2x64x32xf32>
    %cst = arith.constant dense<0.000000e+00> : vector<2x64xf32>
    %1 = vector.multi_reduction <add>, %0, %cst [2] : vector<2x64x32xf32> to vector<2x64xf32>
    %2 = vector.shape_cast %1 : vector<2x64xf32> to vector<2x64x1xf32>
    %cst_2 = arith.constant 3.200000e+01 : f32
    %3 = vector.broadcast %cst_2 : f32 to vector<2x64x1xf32>
    %4 = arith.divf %2, %3 : vector<2x64x1xf32>
    %5 = vector.broadcast %4 : vector<2x64x1xf32> to vector<2x64x32xf32>
    %6 = arith.subf %0, %5 : vector<2x64x32xf32>
    %7 = arith.mulf %6, %6 : vector<2x64x32xf32>
    %cst_3 = arith.constant dense<0.000000e+00> : vector<2x64xf32>
    %8 = vector.multi_reduction <add>, %7, %cst_3 [2] : vector<2x64x32xf32> to vector<2x64xf32>
    %9 = vector.shape_cast %8 : vector<2x64xf32> to vector<2x64x1xf32>
    %cst_4 = arith.constant 3.200000e+01 : f32
    %10 = vector.broadcast %cst_4 : f32 to vector<2x64x1xf32>
    %11 = arith.divf %9, %10 : vector<2x64x1xf32>
    %cst_5 = arith.constant 9.99999974E-6 : f32
    %12 = vector.broadcast %cst_5 : f32 to vector<2x64x1xf32>
    %13 = arith.addf %11, %12 : vector<2x64x1xf32>
    %14 = math.rsqrt %13 : vector<2x64x1xf32>
    %15 = vector.broadcast %14 : vector<2x64x1xf32> to vector<2x64x32xf32>
    %16 = arith.mulf %6, %15 : vector<2x64x32xf32>
    %c0_6 = arith.constant 0 : index
    %c0_7 = arith.constant 0 : index
    %c0_8 = arith.constant 0 : index
    %17 = vector.load %arg5[%c0_6, %c0_7, %c0_8] : memref<1x1x32xf32, #tpu.memory_space<vmem>>, vector<1x1x32xf32>
    %18 = vector.broadcast %17 : vector<1x1x32xf32> to vector<2x64x32xf32>
    %19 = arith.mulf %16, %18 : vector<2x64x32xf32>
    %c0_9 = arith.constant 0 : index
    %c0_10 = arith.constant 0 : index
    %c0_11 = arith.constant 0 : index
    %20 = vector.load %arg6[%c0_9, %c0_10, %c0_11] : memref<1x1x32xf32, #tpu.memory_space<vmem>>, vector<1x1x32xf32>
    %21 = vector.broadcast %20 : vector<1x1x32xf32> to vector<2x64x32xf32>
    %22 = arith.addf %19, %21 : vector<2x64x32xf32>
    %23 = vector.shape_cast %22 : vector<2x64x32xf32> to vector<128x32xf32>
    %c0_12 = arith.constant 0 : index
    %c0_13 = arith.constant 0 : index
    %c0_14 = arith.constant 0 : index
    %24 = vector.load %arg2[%c0_12, %c0_13, %c0_14] : memref<2x64x32xf32, #tpu.memory_space<vmem>>, vector<2x64x32xf32>
    %25 = vector.shape_cast %24 : vector<2x64x32xf32> to vector<128x32xf32>
    %26 = arith.truncf %23 : vector<128x32xf32> to vector<128x32xbf16>
    %c0_15 = arith.constant 0 : index
    %c0_16 = arith.constant 0 : index
    %27 = vector.load %arg7[%c0_15, %c0_16] : memref<32x32xf32, #tpu.memory_space<vmem>>, vector<32x32xf32>
    %28 = arith.truncf %27 : vector<32x32xf32> to vector<32x32xbf16>
    %cst_17 = arith.constant dense<0.000000e+00> : vector<128x32xf32>
    %29 = tpu.matmul %26, %28, %cst_17 {dimension_numbers = #tpu.dot_dimension_numbers<[1], [0], [0], [1], [0, 0, 1, 1], [], []>} : vector<128x32xbf16>, vector<32x32xbf16>, vector<128x32xf32> -> vector<128x32xf32>
    %c0_18 = arith.constant 0 : index
    %c0_19 = arith.constant 0 : index
    %30 = vector.load %arg8[%c0_18, %c0_19] : memref<1x32xf32, #tpu.memory_space<vmem>>, vector<1x32xf32>
    %31 = vector.broadcast %30 : vector<1x32xf32> to vector<128x32xf32>
    %32 = arith.addf %29, %31 : vector<128x32xf32>
    %33 = vector.shape_cast %32 : vector<128x32xf32> to vector<2x64x32xf32>
    %34 = arith.truncf %25 : vector<128x32xf32> to vector<128x32xbf16>
    %c0_20 = arith.constant 0 : index
    %c0_21 = arith.constant 0 : index
    %35 = vector.load %arg9[%c0_20, %c0_21] : memref<32x32xf32, #tpu.memory_space<vmem>>, vector<32x32xf32>
    %36 = arith.truncf %35 : vector<32x32xf32> to vector<32x32xbf16>
    %cst_22 = arith.constant dense<0.000000e+00> : vector<128x32xf32>
    %37 = tpu.matmul %34, %36, %cst_22 {dimension_numbers = #tpu.dot_dimension_numbers<[1], [0], [0], [1], [0, 0, 1, 1], [], []>} : vector<128x32xbf16>, vector<32x32xbf16>, vector<128x32xf32> -> vector<128x32xf32>
    %c0_23 = arith.constant 0 : index
    %c0_24 = arith.constant 0 : index
    %38 = vector.load %arg10[%c0_23, %c0_24] : memref<1x32xf32, #tpu.memory_space<vmem>>, vector<1x32xf32>
    %39 = vector.broadcast %38 : vector<1x32xf32> to vector<128x32xf32>
    %40 = arith.addf %37, %39 : vector<128x32xf32>
    %41 = vector.shape_cast %40 : vector<128x32xf32> to vector<2x64x32xf32>
    %42 = arith.truncf %25 : vector<128x32xf32> to vector<128x32xbf16>
    %c0_25 = arith.constant 0 : index
    %c0_26 = arith.constant 0 : index
    %43 = vector.load %arg11[%c0_25, %c0_26] : memref<32x32xf32, #tpu.memory_space<vmem>>, vector<32x32xf32>
    %44 = arith.truncf %43 : vector<32x32xf32> to vector<32x32xbf16>
    %cst_27 = arith.constant dense<0.000000e+00> : vector<128x32xf32>
    %45 = tpu.matmul %42, %44, %cst_27 {dimension_numbers = #tpu.dot_dimension_numbers<[1], [0], [0], [1], [0, 0, 1, 1], [], []>} : vector<128x32xbf16>, vector<32x32xbf16>, vector<128x32xf32> -> vector<128x32xf32>
    %c0_28 = arith.constant 0 : index
    %c0_29 = arith.constant 0 : index
    %46 = vector.load %arg12[%c0_28, %c0_29] : memref<1x32xf32, #tpu.memory_space<vmem>>, vector<1x32xf32>
    %47 = vector.broadcast %46 : vector<1x32xf32> to vector<128x32xf32>
    %48 = arith.addf %45, %47 : vector<128x32xf32>
    %49 = vector.shape_cast %48 : vector<128x32xf32> to vector<2x64x32xf32>
    %c0_30 = arith.constant 0 : index
    %c0_31 = arith.constant 0 : index
    %c0_32 = arith.constant 0 : index
    %50 = vector.load %arg4[%c0_30, %c0_31, %c0_32] : memref<2x1x64xf32, #tpu.memory_space<vmem>>, vector<2x1x64xf32>
    %c0_33 = arith.constant 0 : index
    %c0_34 = arith.constant 0 : index
    %c0_35 = arith.constant 0 : index
    %51 = vector.load %arg3[%c0_33, %c0_34, %c0_35] : memref<4x64x64xf32, #tpu.memory_space<vmem>>, vector<4x64x64xf32>
    %52 = vector.extract_strided_slice %33 {offsets = [0, 0, 0], sizes = [2, 64, 8], strides = [1, 1, 1]} : vector<2x64x32xf32> to vector<2x64x8xf32>
    %cst_36 = arith.constant 0.353553385 : f32
    %53 = vector.broadcast %cst_36 : f32 to vector<2x64x8xf32>
    %54 = arith.mulf %52, %53 : vector<2x64x8xf32>
    %55 = vector.extract_strided_slice %41 {offsets = [0, 0, 0], sizes = [2, 64, 8], strides = [1, 1, 1]} : vector<2x64x32xf32> to vector<2x64x8xf32>
    %56 = vector.extract_strided_slice %49 {offsets = [0, 0, 0], sizes = [2, 64, 8], strides = [1, 1, 1]} : vector<2x64x32xf32> to vector<2x64x8xf32>
    %57 = arith.truncf %54 : vector<2x64x8xf32> to vector<2x64x8xbf16>
    %58 = arith.truncf %55 : vector<2x64x8xf32> to vector<2x64x8xbf16>
    "tpu.trace_start"() <{level = 10 : i32, message = "wqd,wkd->wqk"}> : () -> ()
    %cst_37 = arith.constant dense<0.000000e+00> : vector<2x64x64xf32>
    %59 = tpu.matmul %57, %58, %cst_37 {dimension_numbers = #tpu.dot_dimension_numbers<[2], [2], [1], [1], [0, 0, 0, 1, 1, 1], [0], [0]>} : vector<2x64x8xbf16>, vector<2x64x8xbf16>, vector<2x64x64xf32> -> vector<2x64x64xf32>
    "tpu.trace_stop"() : () -> ()
    %60 = vector.extract_strided_slice %51 {offsets = [0, 0, 0], sizes = [1, 64, 64], strides = [1, 1, 1]} : vector<4x64x64xf32> to vector<1x64x64xf32>
    %61 = vector.shape_cast %60 : vector<1x64x64xf32> to vector<64x64xf32>
    %62 = vector.shape_cast %61 : vector<64x64xf32> to vector<1x64x64xf32>
    %63 = vector.broadcast %62 : vector<1x64x64xf32> to vector<2x64x64xf32>
    %64 = arith.addf %59, %63 : vector<2x64x64xf32>
    %65 = vector.broadcast %50 : vector<2x1x64xf32> to vector<2x64x64xf32>
    %66 = arith.addf %64, %65 : vector<2x64x64xf32>
    %cst_38 = arith.constant dense<0xFF800000> : vector<2x64xf32>
    %67 = vector.multi_reduction <maximumf>, %66, %cst_38 [2] : vector<2x64x64xf32> to vector<2x64xf32>
    %68 = vector.shape_cast %67 : vector<2x64xf32> to vector<2x64x1xf32>
    %69 = vector.broadcast %68 : vector<2x64x1xf32> to vector<2x64x64xf32>
    %70 = arith.subf %66, %69 : vector<2x64x64xf32>
    %71 = math.exp %70 : vector<2x64x64xf32>
    %cst_39 = arith.constant dense<0.000000e+00> : vector<2x64xf32>
    %72 = vector.multi_reduction <add>, %71, %cst_39 [2] : vector<2x64x64xf32> to vector<2x64xf32>
    %73 = vector.shape_cast %72 : vector<2x64xf32> to vector<2x64x1xf32>
    %74 = tpu.reciprocal %73 {approx = true} : vector<2x64x1xf32> -> vector<2x64x1xf32>
    %75 = vector.broadcast %74 : vector<2x64x1xf32> to vector<2x64x64xf32>
    %76 = arith.mulf %71, %75 : vector<2x64x64xf32>
    %77 = arith.truncf %76 : vector<2x64x64xf32> to vector<2x64x64xbf16>
    %78 = arith.truncf %56 : vector<2x64x8xf32> to vector<2x64x8xbf16>
    "tpu.trace_start"() <{level = 10 : i32, message = "wqk,wkd->wqd"}> : () -> ()
    %cst_40 = arith.constant dense<0.000000e+00> : vector<2x64x8xf32>
    %79 = tpu.matmul %77, %78, %cst_40 {dimension_numbers = #tpu.dot_dimension_numbers<[2], [1], [1], [2], [0, 0, 0, 1, 1, 2], [0], [0]>} : vector<2x64x64xbf16>, vector<2x64x8xbf16>, vector<2x64x8xf32> -> vector<2x64x8xf32>
    "tpu.trace_stop"() : () -> ()
    %80 = vector.extract_strided_slice %33 {offsets = [0, 0, 8], sizes = [2, 64, 8], strides = [1, 1, 1]} : vector<2x64x32xf32> to vector<2x64x8xf32>
    %cst_41 = arith.constant 0.353553385 : f32
    %81 = vector.broadcast %cst_41 : f32 to vector<2x64x8xf32>
    %82 = arith.mulf %80, %81 : vector<2x64x8xf32>
    %83 = vector.extract_strided_slice %41 {offsets = [0, 0, 8], sizes = [2, 64, 8], strides = [1, 1, 1]} : vector<2x64x32xf32> to vector<2x64x8xf32>
    %84 = vector.extract_strided_slice %49 {offsets = [0, 0, 8], sizes = [2, 64, 8], strides = [1, 1, 1]} : vector<2x64x32xf32> to vector<2x64x8xf32>
    %85 = arith.truncf %82 : vector<2x64x8xf32> to vector<2x64x8xbf16>
    %86 = arith.truncf %83 : vector<2x64x8xf32> to vector<2x64x8xbf16>
    "tpu.trace_start"() <{level = 10 : i32, message = "wqd,wkd->wqk"}> : () -> ()
    %cst_42 = arith.constant dense<0.000000e+00> : vector<2x64x64xf32>
    %87 = tpu.matmul %85, %86, %cst_42 {dimension_numbers = #tpu.dot_dimension_numbers<[2], [2], [1], [1], [0, 0, 0, 1, 1, 1], [0], [0]>} : vector<2x64x8xbf16>, vector<2x64x8xbf16>, vector<2x64x64xf32> -> vector<2x64x64xf32>
    "tpu.trace_stop"() : () -> ()
    %88 = vector.extract_strided_slice %51 {offsets = [1, 0, 0], sizes = [1, 64, 64], strides = [1, 1, 1]} : vector<4x64x64xf32> to vector<1x64x64xf32>
    %89 = vector.shape_cast %88 : vector<1x64x64xf32> to vector<64x64xf32>
    %90 = vector.shape_cast %89 : vector<64x64xf32> to vector<1x64x64xf32>
    %91 = vector.broadcast %90 : vector<1x64x64xf32> to vector<2x64x64xf32>
    %92 = arith.addf %87, %91 : vector<2x64x64xf32>
    %93 = vector.broadcast %50 : vector<2x1x64xf32> to vector<2x64x64xf32>
    %94 = arith.addf %92, %93 : vector<2x64x64xf32>
    %cst_43 = arith.constant dense<0xFF800000> : vector<2x64xf32>
    %95 = vector.multi_reduction <maximumf>, %94, %cst_43 [2] : vector<2x64x64xf32> to vector<2x64xf32>
    %96 = vector.shape_cast %95 : vector<2x64xf32> to vector<2x64x1xf32>
    %97 = vector.broadcast %96 : vector<2x64x1xf32> to vector<2x64x64xf32>
    %98 = arith.subf %94, %97 : vector<2x64x64xf32>
    %99 = math.exp %98 : vector<2x64x64xf32>
    %cst_44 = arith.constant dense<0.000000e+00> : vector<2x64xf32>
    %100 = vector.multi_reduction <add>, %99, %cst_44 [2] : vector<2x64x64xf32> to vector<2x64xf32>
    %101 = vector.shape_cast %100 : vector<2x64xf32> to vector<2x64x1xf32>
    %102 = tpu.reciprocal %101 {approx = true} : vector<2x64x1xf32> -> vector<2x64x1xf32>
    %103 = vector.broadcast %102 : vector<2x64x1xf32> to vector<2x64x64xf32>
    %104 = arith.mulf %99, %103 : vector<2x64x64xf32>
    %105 = arith.truncf %104 : vector<2x64x64xf32> to vector<2x64x64xbf16>
    %106 = arith.truncf %84 : vector<2x64x8xf32> to vector<2x64x8xbf16>
    "tpu.trace_start"() <{level = 10 : i32, message = "wqk,wkd->wqd"}> : () -> ()
    %cst_45 = arith.constant dense<0.000000e+00> : vector<2x64x8xf32>
    %107 = tpu.matmul %105, %106, %cst_45 {dimension_numbers = #tpu.dot_dimension_numbers<[2], [1], [1], [2], [0, 0, 0, 1, 1, 2], [0], [0]>} : vector<2x64x64xbf16>, vector<2x64x8xbf16>, vector<2x64x8xf32> -> vector<2x64x8xf32>
    "tpu.trace_stop"() : () -> ()
    %108 = vector.extract_strided_slice %33 {offsets = [0, 0, 16], sizes = [2, 64, 8], strides = [1, 1, 1]} : vector<2x64x32xf32> to vector<2x64x8xf32>
    %cst_46 = arith.constant 0.353553385 : f32
    %109 = vector.broadcast %cst_46 : f32 to vector<2x64x8xf32>
    %110 = arith.mulf %108, %109 : vector<2x64x8xf32>
    %111 = vector.extract_strided_slice %41 {offsets = [0, 0, 16], sizes = [2, 64, 8], strides = [1, 1, 1]} : vector<2x64x32xf32> to vector<2x64x8xf32>
    %112 = vector.extract_strided_slice %49 {offsets = [0, 0, 16], sizes = [2, 64, 8], strides = [1, 1, 1]} : vector<2x64x32xf32> to vector<2x64x8xf32>
    %113 = arith.truncf %110 : vector<2x64x8xf32> to vector<2x64x8xbf16>
    %114 = arith.truncf %111 : vector<2x64x8xf32> to vector<2x64x8xbf16>
    "tpu.trace_start"() <{level = 10 : i32, message = "wqd,wkd->wqk"}> : () -> ()
    %cst_47 = arith.constant dense<0.000000e+00> : vector<2x64x64xf32>
    %115 = tpu.matmul %113, %114, %cst_47 {dimension_numbers = #tpu.dot_dimension_numbers<[2], [2], [1], [1], [0, 0, 0, 1, 1, 1], [0], [0]>} : vector<2x64x8xbf16>, vector<2x64x8xbf16>, vector<2x64x64xf32> -> vector<2x64x64xf32>
    "tpu.trace_stop"() : () -> ()
    %116 = vector.extract_strided_slice %51 {offsets = [2, 0, 0], sizes = [1, 64, 64], strides = [1, 1, 1]} : vector<4x64x64xf32> to vector<1x64x64xf32>
    %117 = vector.shape_cast %116 : vector<1x64x64xf32> to vector<64x64xf32>
    %118 = vector.shape_cast %117 : vector<64x64xf32> to vector<1x64x64xf32>
    %119 = vector.broadcast %118 : vector<1x64x64xf32> to vector<2x64x64xf32>
    %120 = arith.addf %115, %119 : vector<2x64x64xf32>
    %121 = vector.broadcast %50 : vector<2x1x64xf32> to vector<2x64x64xf32>
    %122 = arith.addf %120, %121 : vector<2x64x64xf32>
    %cst_48 = arith.constant dense<0xFF800000> : vector<2x64xf32>
    %123 = vector.multi_reduction <maximumf>, %122, %cst_48 [2] : vector<2x64x64xf32> to vector<2x64xf32>
    %124 = vector.shape_cast %123 : vector<2x64xf32> to vector<2x64x1xf32>
    %125 = vector.broadcast %124 : vector<2x64x1xf32> to vector<2x64x64xf32>
    %126 = arith.subf %122, %125 : vector<2x64x64xf32>
    %127 = math.exp %126 : vector<2x64x64xf32>
    %cst_49 = arith.constant dense<0.000000e+00> : vector<2x64xf32>
    %128 = vector.multi_reduction <add>, %127, %cst_49 [2] : vector<2x64x64xf32> to vector<2x64xf32>
    %129 = vector.shape_cast %128 : vector<2x64xf32> to vector<2x64x1xf32>
    %130 = tpu.reciprocal %129 {approx = true} : vector<2x64x1xf32> -> vector<2x64x1xf32>
    %131 = vector.broadcast %130 : vector<2x64x1xf32> to vector<2x64x64xf32>
    %132 = arith.mulf %127, %131 : vector<2x64x64xf32>
    %133 = arith.truncf %132 : vector<2x64x64xf32> to vector<2x64x64xbf16>
    %134 = arith.truncf %112 : vector<2x64x8xf32> to vector<2x64x8xbf16>
    "tpu.trace_start"() <{level = 10 : i32, message = "wqk,wkd->wqd"}> : () -> ()
    %cst_50 = arith.constant dense<0.000000e+00> : vector<2x64x8xf32>
    %135 = tpu.matmul %133, %134, %cst_50 {dimension_numbers = #tpu.dot_dimension_numbers<[2], [1], [1], [2], [0, 0, 0, 1, 1, 2], [0], [0]>} : vector<2x64x64xbf16>, vector<2x64x8xbf16>, vector<2x64x8xf32> -> vector<2x64x8xf32>
    "tpu.trace_stop"() : () -> ()
    %136 = vector.extract_strided_slice %33 {offsets = [0, 0, 24], sizes = [2, 64, 8], strides = [1, 1, 1]} : vector<2x64x32xf32> to vector<2x64x8xf32>
    %cst_51 = arith.constant 0.353553385 : f32
    %137 = vector.broadcast %cst_51 : f32 to vector<2x64x8xf32>
    %138 = arith.mulf %136, %137 : vector<2x64x8xf32>
    %139 = vector.extract_strided_slice %41 {offsets = [0, 0, 24], sizes = [2, 64, 8], strides = [1, 1, 1]} : vector<2x64x32xf32> to vector<2x64x8xf32>
    %140 = vector.extract_strided_slice %49 {offsets = [0, 0, 24], sizes = [2, 64, 8], strides = [1, 1, 1]} : vector<2x64x32xf32> to vector<2x64x8xf32>
    %141 = arith.truncf %138 : vector<2x64x8xf32> to vector<2x64x8xbf16>
    %142 = arith.truncf %139 : vector<2x64x8xf32> to vector<2x64x8xbf16>
    "tpu.trace_start"() <{level = 10 : i32, message = "wqd,wkd->wqk"}> : () -> ()
    %cst_52 = arith.constant dense<0.000000e+00> : vector<2x64x64xf32>
    %143 = tpu.matmul %141, %142, %cst_52 {dimension_numbers = #tpu.dot_dimension_numbers<[2], [2], [1], [1], [0, 0, 0, 1, 1, 1], [0], [0]>} : vector<2x64x8xbf16>, vector<2x64x8xbf16>, vector<2x64x64xf32> -> vector<2x64x64xf32>
    "tpu.trace_stop"() : () -> ()
    %144 = vector.extract_strided_slice %51 {offsets = [3, 0, 0], sizes = [1, 64, 64], strides = [1, 1, 1]} : vector<4x64x64xf32> to vector<1x64x64xf32>
    %145 = vector.shape_cast %144 : vector<1x64x64xf32> to vector<64x64xf32>
    %146 = vector.shape_cast %145 : vector<64x64xf32> to vector<1x64x64xf32>
    %147 = vector.broadcast %146 : vector<1x64x64xf32> to vector<2x64x64xf32>
    %148 = arith.addf %143, %147 : vector<2x64x64xf32>
    %149 = vector.broadcast %50 : vector<2x1x64xf32> to vector<2x64x64xf32>
    %150 = arith.addf %148, %149 : vector<2x64x64xf32>
    %cst_53 = arith.constant dense<0xFF800000> : vector<2x64xf32>
    %151 = vector.multi_reduction <maximumf>, %150, %cst_53 [2] : vector<2x64x64xf32> to vector<2x64xf32>
    %152 = vector.shape_cast %151 : vector<2x64xf32> to vector<2x64x1xf32>
    %153 = vector.broadcast %152 : vector<2x64x1xf32> to vector<2x64x64xf32>
    %154 = arith.subf %150, %153 : vector<2x64x64xf32>
    %155 = math.exp %154 : vector<2x64x64xf32>
    %cst_54 = arith.constant dense<0.000000e+00> : vector<2x64xf32>
    %156 = vector.multi_reduction <add>, %155, %cst_54 [2] : vector<2x64x64xf32> to vector<2x64xf32>
    %157 = vector.shape_cast %156 : vector<2x64xf32> to vector<2x64x1xf32>
    %158 = tpu.reciprocal %157 {approx = true} : vector<2x64x1xf32> -> vector<2x64x1xf32>
    %159 = vector.broadcast %158 : vector<2x64x1xf32> to vector<2x64x64xf32>
    %160 = arith.mulf %155, %159 : vector<2x64x64xf32>
    %161 = arith.truncf %160 : vector<2x64x64xf32> to vector<2x64x64xbf16>
    %162 = arith.truncf %140 : vector<2x64x8xf32> to vector<2x64x8xbf16>
    "tpu.trace_start"() <{level = 10 : i32, message = "wqk,wkd->wqd"}> : () -> ()
    %cst_55 = arith.constant dense<0.000000e+00> : vector<2x64x8xf32>
    %163 = tpu.matmul %161, %162, %cst_55 {dimension_numbers = #tpu.dot_dimension_numbers<[2], [1], [1], [2], [0, 0, 0, 1, 1, 2], [0], [0]>} : vector<2x64x64xbf16>, vector<2x64x8xbf16>, vector<2x64x8xf32> -> vector<2x64x8xf32>
    "tpu.trace_stop"() : () -> ()
    %164 = tpu.concatenate %79, %107, %135, %163 in 2 : vector<2x64x8xf32>, vector<2x64x8xf32>, vector<2x64x8xf32>, vector<2x64x8xf32> -> vector<2x64x32xf32>
    %165 = vector.shape_cast %164 : vector<2x64x32xf32> to vector<128x32xf32>
    %166 = arith.truncf %165 : vector<128x32xf32> to vector<128x32xbf16>
    %c0_56 = arith.constant 0 : index
    %c0_57 = arith.constant 0 : index
    %167 = vector.load %arg13[%c0_56, %c0_57] : memref<32x32xf32, #tpu.memory_space<vmem>>, vector<32x32xf32>
    %168 = arith.truncf %167 : vector<32x32xf32> to vector<32x32xbf16>
    %cst_58 = arith.constant dense<0.000000e+00> : vector<128x32xf32>
    %169 = tpu.matmul %166, %168, %cst_58 {dimension_numbers = #tpu.dot_dimension_numbers<[1], [0], [0], [1], [0, 0, 1, 1], [], []>} : vector<128x32xbf16>, vector<32x32xbf16>, vector<128x32xf32> -> vector<128x32xf32>
    %c0_59 = arith.constant 0 : index
    %c0_60 = arith.constant 0 : index
    %170 = vector.load %arg14[%c0_59, %c0_60] : memref<1x32xf32, #tpu.memory_space<vmem>>, vector<1x32xf32>
    %171 = vector.broadcast %170 : vector<1x32xf32> to vector<128x32xf32>
    %172 = arith.addf %169, %171 : vector<128x32xf32>
    %173 = vector.shape_cast %172 : vector<128x32xf32> to vector<2x64x32xf32>
    %c0_61 = arith.constant 0 : index
    %c0_62 = arith.constant 0 : index
    %c0_63 = arith.constant 0 : index
    %174 = vector.load %arg15[%c0_61, %c0_62, %c0_63] : memref<2x64x32xf32, #tpu.memory_space<vmem>>, vector<2x64x32xf32>
    tpu.vector_store %arg15[%c0_61, %c0_62, %c0_63], %173 {strides = array<i32>} : memref<2x64x32xf32, #tpu.memory_space<vmem>>, vector<2x64x32xf32>,
    return
  }
  func.func @transform_0(%arg0: i32) -> (i32, i32, i32) {
    %c0_i32 = arith.constant 0 : i32
    %c0_i32_0 = arith.constant 0 : i32
    %c0_i32_1 = arith.constant 0 : i32
    return %arg0, %c0_i32, %c0_i32_0 : i32, i32, i32
  }
  func.func @transform_1(%arg0: i32) -> (i32, i32, i32) {
    %c0_i32 = arith.constant 0 : i32
    %c0_i32_0 = arith.constant 0 : i32
    %c0_i32_1 = arith.constant 0 : i32
    return %arg0, %c0_i32, %c0_i32_0 : i32, i32, i32
  }
  func.func @transform_2(%arg0: i32) -> (i32, i32, i32) {
    %c0_i32 = arith.constant 0 : i32
    %c0_i32_0 = arith.constant 0 : i32
    %c0_i32_1 = arith.constant 0 : i32
    %c0_i32_2 = arith.constant 0 : i32
    return %c0_i32, %c0_i32_0, %c0_i32_1 : i32, i32, i32
  }
  func.func @transform_3(%arg0: i32) -> (i32, i32, i32) {
    %c0_i32 = arith.constant 0 : i32
    %c0_i32_0 = arith.constant 0 : i32
    %c0_i32_1 = arith.constant 0 : i32
    return %arg0, %c0_i32, %c0_i32_0 : i32, i32, i32
  }
  func.func @transform_4(%arg0: i32) -> (i32, i32, i32) {
    %c0_i32 = arith.constant 0 : i32
    %c0_i32_0 = arith.constant 0 : i32
    %c0_i32_1 = arith.constant 0 : i32
    %c0_i32_2 = arith.constant 0 : i32
    return %c0_i32, %c0_i32_0, %c0_i32_1 : i32, i32, i32
  }
  func.func @transform_5(%arg0: i32) -> (i32, i32, i32) {
    %c0_i32 = arith.constant 0 : i32
    %c0_i32_0 = arith.constant 0 : i32
    %c0_i32_1 = arith.constant 0 : i32
    %c0_i32_2 = arith.constant 0 : i32
    return %c0_i32, %c0_i32_0, %c0_i32_1 : i32, i32, i32
  }
  func.func @transform_6(%arg0: i32) -> (i32, i32) {
    %c0_i32 = arith.constant 0 : i32
    %c0_i32_0 = arith.constant 0 : i32
    %c0_i32_1 = arith.constant 0 : i32
    return %c0_i32, %c0_i32_0 : i32, i32
  }
  func.func @transform_7(%arg0: i32) -> (i32, i32) {
    %c0_i32 = arith.constant 0 : i32
    %c0_i32_0 = arith.constant 0 : i32
    %c0_i32_1 = arith.constant 0 : i32
    return %c0_i32, %c0_i32_0 : i32, i32
  }
  func.func @transform_8(%arg0: i32) -> (i32, i32) {
    %c0_i32 = arith.constant 0 : i32
    %c0_i32_0 = arith.constant 0 : i32
    %c0_i32_1 = arith.constant 0 : i32
    return %c0_i32, %c0_i32_0 : i32, i32
  }
  func.func @transform_9(%arg0: i32) -> (i32, i32) {
    %c0_i32 = arith.constant 0 : i32
    %c0_i32_0 = arith.constant 0 : i32
    %c0_i32_1 = arith.constant 0 : i32
    return %c0_i32, %c0_i32_0 : i32, i32
  }
  func.func @transform_10(%arg0: i32) -> (i32, i32) {
    %c0_i32 = arith.constant 0 : i32
    %c0_i32_0 = arith.constant 0 : i32
    %c0_i32_1 = arith.constant 0 : i32
    return %c0_i32, %c0_i32_0 : i32, i32
  }
  func.func @transform_11(%arg0: i32) -> (i32, i32) {
    %c0_i32 = arith.constant 0 : i32
    %c0_i32_0 = arith.constant 0 : i32
    %c0_i32_1 = arith.constant 0 : i32
    return %c0_i32, %c0_i32_0 : i32, i32
  }
  func.func @transform_12(%arg0: i32) -> (i32, i32) {
    %c0_i32 = arith.constant 0 : i32
    %c0_i32_0 = arith.constant 0 : i32
    %c0_i32_1 = arith.constant 0 : i32
    return %c0_i32, %c0_i32_0 : i32, i32
  }
  func.func @transform_13(%arg0: i32) -> (i32, i32) {
    %c0_i32 = arith.constant 0 : i32
    %c0_i32_0 = arith.constant 0 : i32
    %c0_i32_1 = arith.constant 0 : i32
    return %c0_i32, %c0_i32_0 : i32, i32
  }
  func.func @transform_14(%arg0: i32) -> (i32, i32, i32) {
    %c0_i32 = arith.constant 0 : i32
    %c0_i32_0 = arith.constant 0 : i32
    %c0_i32_1 = arith.constant 0 : i32
    return %arg0, %c0_i32, %c0_i32_0 : i32, i32, i32
  }
}

module attributes {stable_mosaic.version = 11 : i64} {
  func.func @_fused_mlp_kernel(%arg0: i32, %arg1: memref<128x32xf32, #tpu.memory_space<vmem>>, %arg2: memref<128x32xf32, #tpu.memory_space<vmem>>, %arg3: memref<1x32xf32, #tpu.memory_space<vmem>>, %arg4: memref<1x32xf32, #tpu.memory_space<vmem>>, %arg5: memref<32x128xf32, #tpu.memory_space<vmem>>, %arg6: memref<1x128xf32, #tpu.memory_space<vmem>>, %arg7: memref<128x32xf32, #tpu.memory_space<vmem>>, %arg8: memref<1x32xf32, #tpu.memory_space<vmem>>, %arg9: memref<128x32xf32, #tpu.memory_space<vmem>>) attributes {dimension_semantics = [#tpu.dimension_semantics<parallel>], iteration_bounds = array<i64: 1>, scalar_prefetch = 0 : i64, scratch_operands = 0 : i64, tpu.core_type = #tpu.core_type<tc>, window_params = [{transform_indices = @transform_0, window_bounds = array<i64: 128, 32>}, {transform_indices = @transform_1, window_bounds = array<i64: 128, 32>}, {pipeline_mode = #tpu.pipeline_mode<synchronous>, transform_indices = @transform_2, window_bounds = array<i64: 1, 32>}, {pipeline_mode = #tpu.pipeline_mode<synchronous>, transform_indices = @transform_3, window_bounds = array<i64: 1, 32>}, {pipeline_mode = #tpu.pipeline_mode<synchronous>, transform_indices = @transform_4, window_bounds = array<i64: 32, 128>}, {pipeline_mode = #tpu.pipeline_mode<synchronous>, transform_indices = @transform_5, window_bounds = array<i64: 1, 128>}, {pipeline_mode = #tpu.pipeline_mode<synchronous>, transform_indices = @transform_6, window_bounds = array<i64: 128, 32>}, {pipeline_mode = #tpu.pipeline_mode<synchronous>, transform_indices = @transform_7, window_bounds = array<i64: 1, 32>}, {transform_indices = @transform_8, window_bounds = array<i64: 128, 32>}]} {
    %c0 = arith.constant 0 : index
    %c0_0 = arith.constant 0 : index
    %0 = vector.load %arg1[%c0, %c0_0] : memref<128x32xf32, #tpu.memory_space<vmem>>, vector<128x32xf32>
    %c0_1 = arith.constant 0 : index
    %c0_2 = arith.constant 0 : index
    %1 = vector.load %arg2[%c0_1, %c0_2] : memref<128x32xf32, #tpu.memory_space<vmem>>, vector<128x32xf32>
    %2 = arith.addf %0, %1 : vector<128x32xf32>
    %cst = arith.constant dense<0.000000e+00> : vector<128xf32>
    %3 = vector.multi_reduction <add>, %2, %cst [1] : vector<128x32xf32> to vector<128xf32>
    %4 = vector.shape_cast %3 : vector<128xf32> to vector<128x1xf32>
    %cst_3 = arith.constant 3.200000e+01 : f32
    %5 = vector.broadcast %cst_3 : f32 to vector<128x1xf32>
    %6 = arith.divf %4, %5 : vector<128x1xf32>
    %7 = vector.broadcast %6 : vector<128x1xf32> to vector<128x32xf32>
    %8 = arith.subf %2, %7 : vector<128x32xf32>
    %9 = arith.mulf %8, %8 : vector<128x32xf32>
    %cst_4 = arith.constant dense<0.000000e+00> : vector<128xf32>
    %10 = vector.multi_reduction <add>, %9, %cst_4 [1] : vector<128x32xf32> to vector<128xf32>
    %11 = vector.shape_cast %10 : vector<128xf32> to vector<128x1xf32>
    %cst_5 = arith.constant 3.200000e+01 : f32
    %12 = vector.broadcast %cst_5 : f32 to vector<128x1xf32>
    %13 = arith.divf %11, %12 : vector<128x1xf32>
    %cst_6 = arith.constant 9.99999974E-6 : f32
    %14 = vector.broadcast %cst_6 : f32 to vector<128x1xf32>
    %15 = arith.addf %13, %14 : vector<128x1xf32>
    %16 = math.rsqrt %15 : vector<128x1xf32>
    %17 = vector.broadcast %16 : vector<128x1xf32> to vector<128x32xf32>
    %18 = arith.mulf %8, %17 : vector<128x32xf32>
    %c0_7 = arith.constant 0 : index
    %c0_8 = arith.constant 0 : index
    %19 = vector.load %arg3[%c0_7, %c0_8] : memref<1x32xf32, #tpu.memory_space<vmem>>, vector<1x32xf32>
    %20 = vector.broadcast %19 : vector<1x32xf32> to vector<128x32xf32>
    %21 = arith.mulf %18, %20 : vector<128x32xf32>
    %c0_9 = arith.constant 0 : index
    %c0_10 = arith.constant 0 : index
    %22 = vector.load %arg4[%c0_9, %c0_10] : memref<1x32xf32, #tpu.memory_space<vmem>>, vector<1x32xf32>
    %23 = vector.broadcast %22 : vector<1x32xf32> to vector<128x32xf32>
    %24 = arith.addf %21, %23 : vector<128x32xf32>
    %25 = arith.truncf %24 : vector<128x32xf32> to vector<128x32xbf16>
    %c0_11 = arith.constant 0 : index
    %c0_12 = arith.constant 0 : index
    %26 = vector.load %arg5[%c0_11, %c0_12] : memref<32x128xf32, #tpu.memory_space<vmem>>, vector<32x128xf32>
    %27 = arith.truncf %26 : vector<32x128xf32> to vector<32x128xbf16>
    %cst_13 = arith.constant dense<0.000000e+00> : vector<128x128xf32>
    %28 = tpu.matmul %25, %27, %cst_13 {dimension_numbers = #tpu.dot_dimension_numbers<[1], [0], [0], [1], [0, 0, 1, 1], [], []>} : vector<128x32xbf16>, vector<32x128xbf16>, vector<128x128xf32> -> vector<128x128xf32>
    %c0_14 = arith.constant 0 : index
    %c0_15 = arith.constant 0 : index
    %29 = vector.load %arg6[%c0_14, %c0_15] : memref<1x128xf32, #tpu.memory_space<vmem>>, vector<1x128xf32>
    %30 = vector.broadcast %29 : vector<1x128xf32> to vector<128x128xf32>
    %31 = arith.addf %28, %30 : vector<128x128xf32>
    %cst_16 = arith.constant 5.000000e-01 : f32
    %32 = vector.broadcast %cst_16 : f32 to vector<128x128xf32>
    %33 = arith.mulf %32, %31 : vector<128x128xf32>
    %cst_17 = arith.constant 4.471500e-02 : f32
    %34 = vector.broadcast %cst_17 : f32 to vector<128x128xf32>
    %35 = arith.mulf %34, %31 : vector<128x128xf32>
    %36 = arith.mulf %35, %31 : vector<128x128xf32>
    %37 = arith.mulf %36, %31 : vector<128x128xf32>
    %38 = arith.addf %31, %37 : vector<128x128xf32>
    %cst_18 = arith.constant 0.797884583 : f32
    %39 = vector.broadcast %cst_18 : f32 to vector<128x128xf32>
    %40 = arith.mulf %39, %38 : vector<128x128xf32>
    %41 = math.tanh %40 : vector<128x128xf32>
    %cst_19 = arith.constant 1.000000e+00 : f32
    %42 = vector.broadcast %cst_19 : f32 to vector<128x128xf32>
    %43 = arith.addf %42, %41 : vector<128x128xf32>
    %44 = arith.mulf %33, %43 : vector<128x128xf32>
    %45 = arith.truncf %44 : vector<128x128xf32> to vector<128x128xbf16>
    %c0_20 = arith.constant 0 : index
    %c0_21 = arith.constant 0 : index
    %46 = vector.load %arg7[%c0_20, %c0_21] : memref<128x32xf32, #tpu.memory_space<vmem>>, vector<128x32xf32>
    %47 = arith.truncf %46 : vector<128x32xf32> to vector<128x32xbf16>
    %cst_22 = arith.constant dense<0.000000e+00> : vector<128x32xf32>
    %48 = tpu.matmul %45, %47, %cst_22 {dimension_numbers = #tpu.dot_dimension_numbers<[1], [0], [0], [1], [0, 0, 1, 1], [], []>} : vector<128x128xbf16>, vector<128x32xbf16>, vector<128x32xf32> -> vector<128x32xf32>
    %c0_23 = arith.constant 0 : index
    %c0_24 = arith.constant 0 : index
    %49 = vector.load %arg8[%c0_23, %c0_24] : memref<1x32xf32, #tpu.memory_space<vmem>>, vector<1x32xf32>
    %50 = vector.broadcast %49 : vector<1x32xf32> to vector<128x32xf32>
    %51 = arith.addf %48, %50 : vector<128x32xf32>
    %52 = arith.addf %2, %51 : vector<128x32xf32>
    %c0_25 = arith.constant 0 : index
    %c0_26 = arith.constant 0 : index
    %53 = vector.load %arg9[%c0_25, %c0_26] : memref<128x32xf32, #tpu.memory_space<vmem>>, vector<128x32xf32>
    tpu.vector_store %arg9[%c0_25, %c0_26], %52 {strides = array<i32>} : memref<128x32xf32, #tpu.memory_space<vmem>>, vector<128x32xf32>,
    return
  }
  func.func @transform_0(%arg0: i32) -> (i32, i32) {
    %c0_i32 = arith.constant 0 : i32
    %c0_i32_0 = arith.constant 0 : i32
    return %arg0, %c0_i32 : i32, i32
  }
  func.func @transform_1(%arg0: i32) -> (i32, i32) {
    %c0_i32 = arith.constant 0 : i32
    %c0_i32_0 = arith.constant 0 : i32
    return %arg0, %c0_i32 : i32, i32
  }
  func.func @transform_2(%arg0: i32) -> (i32, i32) {
    %c0_i32 = arith.constant 0 : i32
    %c0_i32_0 = arith.constant 0 : i32
    %c0_i32_1 = arith.constant 0 : i32
    return %c0_i32, %c0_i32_0 : i32, i32
  }
  func.func @transform_3(%arg0: i32) -> (i32, i32) {
    %c0_i32 = arith.constant 0 : i32
    %c0_i32_0 = arith.constant 0 : i32
    %c0_i32_1 = arith.constant 0 : i32
    return %c0_i32, %c0_i32_0 : i32, i32
  }
  func.func @transform_4(%arg0: i32) -> (i32, i32) {
    %c0_i32 = arith.constant 0 : i32
    %c0_i32_0 = arith.constant 0 : i32
    %c0_i32_1 = arith.constant 0 : i32
    return %c0_i32, %c0_i32_0 : i32, i32
  }
  func.func @transform_5(%arg0: i32) -> (i32, i32) {
    %c0_i32 = arith.constant 0 : i32
    %c0_i32_0 = arith.constant 0 : i32
    %c0_i32_1 = arith.constant 0 : i32
    return %c0_i32, %c0_i32_0 : i32, i32
  }
  func.func @transform_6(%arg0: i32) -> (i32, i32) {
    %c0_i32 = arith.constant 0 : i32
    %c0_i32_0 = arith.constant 0 : i32
    %c0_i32_1 = arith.constant 0 : i32
    return %c0_i32, %c0_i32_0 : i32, i32
  }
  func.func @transform_7(%arg0: i32) -> (i32, i32) {
    %c0_i32 = arith.constant 0 : i32
    %c0_i32_0 = arith.constant 0 : i32
    %c0_i32_1 = arith.constant 0 : i32
    return %c0_i32, %c0_i32_0 : i32, i32
  }
  func.func @transform_8(%arg0: i32) -> (i32, i32) {
    %c0_i32 = arith.constant 0 : i32
    %c0_i32_0 = arith.constant 0 : i32
    return %arg0, %c0_i32 : i32, i32
  }
}

</mosaic_0001>

<bundles_post_ra>
// kernel: sub.20
= control target key start
LH: loop header
LB: loop body
LE: loop exit
PB: predicated region body
PF: predicated region fallthrough
CT: control target
= control target key end

     0   :  { %vm63_vm0 = vcmask 1041409   ;;  %vm67_vm1 = vcmask 1042434   ;;  %s324_s30 = smov 52   ;;  %s325_s2 = smov 56   ;;  %vm69_vm2 = vcmask 31744   ;;  %vm83_vm3 = vcmask 523744   ;;  %s420_s0 = inlined_call_operand.vmem [shape: s32[3,4,4,4], index: 0, kind: input, shape index: {}]   ;;  %s421_s1 = inlined_call_operand.vmem [shape: s32[3,64], index: 1, kind: output, shape index: {}]  }
   0x1   :  { %v297_v0 = vld [vmem:[%s420_s0 + $0x2c] sm:$0xf]  ;;  %v301_v1 = vld [vmem:[%s420_s0 + $0x1c] sm:$0xf]  ;;  %v298_v3 = vld [vmem:[%s420_s0 + $0x28] sm:$0xf] }
   0x2   :  { %v305_v2 = vld [vmem:[%s420_s0 + $0xc] sm:$0xf]  ;;  %8 = vst [vmem:[#allocation1 + $0x58] sm:$0xf] %v297_v0  ;;  %28 = vst [vmem:[#allocation1 + $0x38] sm:$0xf] %v301_v1 }
   0x3   :  { %48 = vst [vmem:[#allocation1 + $0x18] sm:$0xf] %v305_v2  ;;  %13 = vst [vmem:[#allocation1 + $0x50] sm:$0xf] %v298_v3  ;;  %v302_v4 = vld [vmem:[%s420_s0 + $0x18] sm:$0xf] }
   0x4   :  { %v306_v5 = vld [vmem:[%s420_s0 + $0x8] sm:$0xf]  ;;  %33 = vst [vmem:[#allocation1 + $0x30] sm:$0xf] %v302_v4  ;;  %v299_v6 = vld [vmem:[%s420_s0 + $0x24] sm:$0xf] }
   0x5   :  { %53 = vst [vmem:[#allocation1 + $0x10] sm:$0xf] %v306_v5  ;;  %v303_v7 = vld [vmem:[%s420_s0 + $0x14] sm:$0xf]  ;;  %18 = vst [vmem:[#allocation1 + $0x48] sm:$0xf] %v299_v6 }
   0x6   :  { %38 = vst [vmem:[#allocation1 + $0x28] sm:$0xf] %v303_v7  ;;  %v307_v8 = vld [vmem:[%s420_s0 + $0x4] sm:$0xf]  ;;  %v300_v9 = vld [vmem:[%s420_s0 + $0x20] sm:$0xf] }
   0x7   :  { %57 = vst [vmem:[#allocation1 + $0x8] sm:$0xf] %v307_v8  ;;  %23 = vst [vmem:[#allocation1 + $0x40] sm:$0xf] %v300_v9  ;;  %v304_v10 = vld [vmem:[%s420_s0 + $0x10] sm:$0xf] }
   0x8   :  { %v58_v11 = vld [vmem:[%s420_s0] sm:$0xf]  ;;  %43 = vst [vmem:[#allocation1 + $0x20] sm:$0xf] %v304_v10  ;;  %s323_s0 = smov 60   ;;  %s326_s3 = smov 48  }
   0x9   :  { %59 = vst [vmem:[#allocation1] sm:$0xf] %v58_v11  ;;  %v74_v13 = vld [vmem:[#allocation1 + $0x3a] sm:$0x2]   ;;  %v102_v17 = vld [vmem:[#allocation1 + $0x38] sm:$0x2]  }
   0xa   :  { %v72_v12 = vld [vmem:[#allocation1 + $0x1b] sm:$0x1]   ;;  %v100_v16 = vld [vmem:[#allocation1 + $0x19] sm:$0x1]   ;;  %v86_v21 = vld [vmem:[#allocation1 + $0x1a] sm:$0x1]  }
   0xb   :  { %v78_v14 = vld [vmem:[#allocation1 + $0x59] sm:$0x4]   ;;  %v76_v15 = vsel %vm63_vm0, %v74_v13, %v72_v12  ;;  %v106_v18 = vld [vmem:[#allocation1 + $0x57] sm:$0x4]   ;;  %v104_v20 = vsel %vm63_vm0, %v102_v17, %v100_v16  ;;  %v88_v22 = vld [vmem:[#allocation1 + $0x39] sm:$0x2]  }
   0xc   :  { %v80_v19 = vsel %vm67_vm1, %v78_v14, %v76_v15  ;;  %v92_v23 = vld [vmem:[#allocation1 + $0x58] sm:$0x4]   ;;  %v108_v24 = vsel %vm67_vm1, %v106_v18, %v104_v20  ;;  %v90_v25 = vsel %vm63_vm0, %v88_v22, %v86_v21  ;;  %v114_v26 = vld [vmem:[#allocation1 + $0x18] sm:$0x1]   ;;  %v128_v31 = vld [vmem:[#allocation1 + $0x13] sm:$0x1]  }
   0xd   :  { %81 = vrot.lane.b32.xlu0 %v80_v19, %s323_s0  ;;  %v116_v27 = vld [vmem:[#allocation1 + $0x37] sm:$0x2]   ;;  %109 = vrot.lane.b32.xlu1 %v108_v24, %s324_s30  ;;  %v94_v29 = vsel %vm67_vm1, %v92_v23, %v90_v25  ;;  %v130_v32 = vld [vmem:[#allocation1 + $0x32] sm:$0x2]   ;;  %v142_v36 = vld [vmem:[#allocation1 + $0x12] sm:$0x1]  }
   0xe   :  { %v120_v28 = vld [vmem:[#allocation1 + $0x56] sm:$0x4]   ;;  %v118_v30 = vsel %vm63_vm0, %v116_v27, %v114_v26  ;;  %v132_v34 = vsel %vm63_vm0, %v130_v32, %v128_v31  ;;  %v134_v35 = vld [vmem:[#allocation1 + $0x51] sm:$0x4]   ;;  %v144_v37 = vld [vmem:[#allocation1 + $0x31] sm:$0x2]  }
   0xf   :  { %v122_v33 = vsel %vm67_vm1, %v120_v28, %v118_v30  ;;  %v146_v38 = vsel %vm63_vm0, %v144_v37, %v142_v36  ;;  %v148_v39 = vld [vmem:[#allocation1 + $0x50] sm:$0x4]   ;;  %v156_v40 = vld [vmem:[#allocation1 + $0x11] sm:$0x1]   ;;  %v170_v42 = vld [vmem:[#allocation1 + $0x10] sm:$0x1]   ;;  %v136_v44 = vsel %vm67_vm1, %v134_v35, %v132_v34 }
  0x10   :  { %v158_v41 = vld [vmem:[#allocation1 + $0x30] sm:$0x2]   ;;  %v172_v43 = vld [vmem:[#allocation1 + $0x2f] sm:$0x2]   ;;  %v150_v45 = vsel %vm67_vm1, %v148_v39, %v146_v38  ;;  %v184_v50 = vld [vmem:[#allocation1 + $0xb] sm:$0x1]  }
  0x11   :  { %95 = vrot.lane.b32.xlu0 %v94_v29, %s325_s2  ;;  %123 = vrot.lane.b32.xlu1 %v122_v33, %s326_s3  ;;  %v160_v46 = vsel %vm63_vm0, %v158_v41, %v156_v40  ;;  %v162_v47 = vld [vmem:[#allocation1 + $0x4f] sm:$0x4]   ;;  %v174_v48 = vsel %vm63_vm0, %v172_v43, %v170_v42  ;;  %v176_v49 = vld [vmem:[#allocation1 + $0x4e] sm:$0x4]   ;;  %v186_v51 = vld [vmem:[#allocation1 + $0x2a] sm:$0x2]  }
  0x12   :  { %s327_s4 = smov 44   ;;  %v198_v52 = vld [vmem:[#allocation1 + $0xa] sm:$0x1]   ;;  %s328_s5 = smov 40   ;;  %v164_v54 = vsel %vm67_vm1, %v162_v47, %v160_v46  ;;  %v178_v55 = vsel %vm67_vm1, %v176_v49, %v174_v48  ;;  %v188_v56 = vsel %vm63_vm0, %v186_v51, %v184_v50  ;;  %v190_v57 = vld [vmem:[#allocation1 + $0x49] sm:$0x4]  }
  0x13   :  { %v200_v53 = vld [vmem:[#allocation1 + $0x29] sm:$0x2]   ;;  %v212_v60 = vld [vmem:[#allocation1 + $0x9] sm:$0x1]   ;;  %v226_v62 = vld [vmem:[#allocation1 + $0x8] sm:$0x1]   ;;  %v192_v2 = vsel %vm67_vm1, %v190_v57, %v188_v56 }
  0x14   :  { %v204_v58 = vld [vmem:[#allocation1 + $0x48] sm:$0x4]   ;;  %v202_v59 = vsel %vm63_vm0, %v200_v53, %v198_v52  ;;  %v214_v61 = vld [vmem:[#allocation1 + $0x28] sm:$0x2]   ;;  %s329_s6 = smov 36   ;;  %s330_s7 = smov 32  }
  0x15   :  { %137 = vrot.lane.b32.xlu0 %v136_v44, %s327_s4  ;;  %151 = vrot.lane.b32.xlu1 %v150_v45, %s328_s5  ;;  %v228_v63 = vld [vmem:[#allocation1 + $0x27] sm:$0x2]   ;;  %v60_v0 = vld [vmem:[#allocation1] sm:$0x1]   ;;  %v206_v5 = vsel %vm67_vm1, %v204_v58, %v202_v59  ;;  %v216_v6 = vsel %vm63_vm0, %v214_v61, %v212_v60  ;;  %v218_v7 = vld [vmem:[#allocation1 + $0x47] sm:$0x4]  }
  0x16   :  { %v62_v1 = vld [vmem:[#allocation1 + $0x1f] sm:$0x2]   ;;  %v230_v9 = vsel %vm63_vm0, %v228_v63, %v226_v62  ;;  %v232_v10 = vld [vmem:[#allocation1 + $0x46] sm:$0x4]   ;;  %v240_v11 = vld [vmem:[#allocation1 + $0x3] sm:$0x1]   ;;  %v220_v15 = vsel %vm67_vm1, %v218_v7, %v216_v6 }
  0x17   :  { %v64_v3 = vsel %vm63_vm0, %v62_v1, %v60_v0  ;;  %v66_v4 = vld [vmem:[#allocation1 + $0x3e] sm:$0x4]   ;;  %v242_v12 = vld [vmem:[#allocation1 + $0x22] sm:$0x2]   ;;  %s331_s8 = smov 28   ;;  %s332_s9 = smov 24   ;;  %v234_v16 = vsel %vm67_vm1, %v232_v10, %v230_v9 }
  0x18   :  { %v68_v8 = vsel %vm67_vm1, %v66_v4, %v64_v3  ;;  %v254_v13 = vld [vmem:[#allocation1 + $0x2] sm:$0x1]   ;;  %v244_v17 = vsel %vm63_vm0, %v242_v12, %v240_v11  ;;  %v246_v18 = vld [vmem:[#allocation1 + $0x41] sm:$0x4]   ;;  %v268_v21 = vld [vmem:[#allocation1 + $0x1] sm:$0x1]  }
  0x19   :  { %165 = vrot.lane.b32.xlu0 %v164_v54, %s329_s6  ;;  %179 = vrot.lane.b32.xlu1 %v178_v55, %s330_s7  ;;  %70 = vst.msk [vmem:[#allocation0] sm:$0x7] %vm69_vm2, %v68_v8   ;;  %v256_v14 = vld [vmem:[#allocation1 + $0x21] sm:$0x2]   ;;  %v270_v22 = vld [vmem:[#allocation1 + $0x20] sm:$0x2]   ;;  %v248_v23 = vsel %vm67_vm1, %v246_v18, %v244_v17 }
  0x1a   :  { %v258_v19 = vsel %vm63_vm0, %v256_v14, %v254_v13  ;;  %v260_v20 = vld [vmem:[#allocation1 + $0x40] sm:$0x4]   ;;  %s333_s10 = smov 20   ;;  %s334_s11 = smov 16   ;;  %v272_v25 = vsel %vm63_vm0, %v270_v22, %v268_v21  ;;  %v274_v26 = vld [vmem:[#allocation1 + $0x3f] sm:$0x4]  }
  0x1b   :  { %v262_v24 = vsel %vm67_vm1, %v260_v20, %v258_v19  ;;  %s335_s12 = smov 12   ;;  %s336_s13 = smov 8   ;;  %v276_v27 = vsel %vm67_vm1, %v274_v26, %v272_v25  ;;  %vm97_vm4 = vcmask 490944   ;;  %vm111_vm5 = vcmask 458144  }
  0x1c   :  { %s337_s14 = smov 4   ;;  %vm125_vm6 = vcmask 425344   ;;  %vm139_vm7 = vcmask 392544   ;;  %vm153_vm8 = vcmask 359744   ;;  %vm167_vm9 = vcmask 326944  }
  0x1d   :  { %193 = vrot.lane.b32.xlu0 %v192_v2, %s331_s8  ;;  %207 = vrot.lane.b32.xlu1 %v206_v5, %s332_s9  ;;  %vm181_vm10 = vcmask 294144   ;;  %vm195_vm11 = vcmask 261344   ;;  %vm209_vm12 = vcmask 228544   ;;  %vm223_vm13 = vcmask 195744  }
  0x1e   :  { %vm237_vm14 = vcmask 162944   ;;  %vm251_vm15 = vcmask 130144   ;;  %vm265_vm0 = vcmask 97344   ;;  %vm279_vm1 = vcmask 64544  }
  0x21   :  { %221 = vrot.lane.b32.xlu0 %v220_v15, %s333_s10  ;;  %235 = vrot.lane.b32.xlu1 %v234_v16, %s334_s11 }
  0x25   :  { %249 = vrot.lane.b32.xlu0 %v248_v23, %s335_s12  ;;  %263 = vrot.lane.b32.xlu1 %v262_v24, %s336_s13 }
  0x29   :  { %277 = vrot.lane.b32.xlu0 %v276_v27, %s337_s14 }
  0x7f   :  { %v82_v28 = vpop.permute.xlu0 %81   ;;  %v110_v29 = vpop.permute.xlu1 %109  }
  0x80   :  { %84 = vst.msk [vmem:[#allocation0] sm:$0x7] %vm83_vm3, %v82_v28  }
  0x83   :  { %v96_v30 = vpop.permute.xlu0 %95   ;;  %v124_v31 = vpop.permute.xlu1 %123  }
  0x84   :  { %98 = vst.msk [vmem:[#allocation0] sm:$0x7] %vm97_vm4, %v96_v30  }
  0x85   :  { %112 = vst.msk [vmem:[#allocation0] sm:$0x7] %vm111_vm5, %v110_v29  }
  0x86   :  { %126 = vst.msk [vmem:[#allocation0] sm:$0x7] %vm125_vm6, %v124_v31  }
  0x87   :  { %v138_v32 = vpop.permute.xlu0 %137   ;;  %v152_v33 = vpop.permute.xlu1 %151  }
  0x88   :  { %140 = vst.msk [vmem:[#allocation0] sm:$0x7] %vm139_vm7, %v138_v32  }
  0x89   :  { %154 = vst.msk [vmem:[#allocation0] sm:$0x7] %vm153_vm8, %v152_v33  }
  0x8b   :  { %v166_v34 = vpop.permute.xlu0 %165   ;;  %v180_v35 = vpop.permute.xlu1 %179  }
  0x8c   :  { %168 = vst.msk [vmem:[#allocation0] sm:$0x7] %vm167_vm9, %v166_v34  }
  0x8d   :  { %182 = vst.msk [vmem:[#allocation0] sm:$0x7] %vm181_vm10, %v180_v35  }
  0x8f   :  { %v194_v36 = vpop.permute.xlu0 %193   ;;  %v208_v37 = vpop.permute.xlu1 %207  }
  0x90   :  { %196 = vst.msk [vmem:[#allocation0] sm:$0x7] %vm195_vm11, %v194_v36  }
  0x91   :  { %210 = vst.msk [vmem:[#allocation0] sm:$0x7] %vm209_vm12, %v208_v37  }
  0x93   :  { %v222_v38 = vpop.permute.xlu0 %221   ;;  %v236_v39 = vpop.permute.xlu1 %235  }
  0x94   :  { %224 = vst.msk [vmem:[#allocation0] sm:$0x7] %vm223_vm13, %v222_v38  }
  0x95   :  { %238 = vst.msk [vmem:[#allocation0] sm:$0x7] %vm237_vm14, %v236_v39  }
  0x97   :  { %v250_v40 = vpop.permute.xlu0 %249   ;;  %v264_v41 = vpop.permute.xlu1 %263  }
  0x98   :  { %252 = vst.msk [vmem:[#allocation0] sm:$0x7] %vm251_vm15, %v250_v40  }
  0x99   :  { %266 = vst.msk [vmem:[#allocation0] sm:$0x7] %vm265_vm0, %v264_v41  }
  0x9b   :  { %v278_v42 = vpop.permute.xlu0 %277  }
  0x9c   :  { %280 = vst.msk [vmem:[#allocation0] sm:$0x7] %vm279_vm1, %v278_v42  }
  0xa3   :  { %v284_v43 = vld [vmem:[#allocation0] sm:$0xf] }
  0xa4   :  { %286 = vst [vmem:[%s421_s1] sm:$0xf] %v284_v43 }

// kernel: cross_attention_former_block.3
= control target key start
LH: loop header
LB: loop body
LE: loop exit
PB: predicated region body
PF: predicated region fallthrough
CT: control target
= control target key end

     0   :  { %vm78_vm0 = vcmask 261120   ;;  %s1587_s0 = inlined_call_operand.vmem [shape: f32[128,32], index: 0, kind: input, shape index: {}]   ;;  %s1588_s1 = inlined_call_operand.vmem [shape: f32[128,32], index: 1, kind: input, shape index: {}]   ;;  %s1589_s4 = inlined_call_operand.vmem [shape: f32[32,128], index: 4, kind: input, shape index: {}]   ;;  %s1590_s2 = inlined_call_operand.vmem [shape: f32[1,32], index: 2, kind: input, shape index: {}]   ;;  %s1591_s3 = inlined_call_operand.vmem [shape: f32[1,32], index: 3, kind: input, shape index: {}]   ;;  %s1592_s6 = inlined_call_operand.vmem [shape: f32[128,32], index: 6, kind: input, shape index: {}]   ;;  %s1593_s5 = inlined_call_operand.vmem [shape: f32[1,128], index: 5, kind: input, shape index: {}]   ;;  %s1594_s7 = inlined_call_operand.vmem [shape: f32[1,32], index: 7, kind: input, shape index: {}]   ;;  %s1595_s8 = inlined_call_operand.vmem [shape: f32[128,32], index: 8, kind: output, shape index: {}]  }
   0x1   :  { %v30_v0 = vld [vmem:[%s1587_s0] sm:$0xff]  ;;  %v32_v2 = vld [vmem:[%s1587_s0 + $0x10] sm:$0xff]  ;;  %v31_v5 = vld [vmem:[%s1587_s0 + $0x8] sm:$0xff] }
   0x2   :  { %v46_v1 = vld [vmem:[%s1588_s1] sm:$0xff]  ;;  %v48_v4 = vld [vmem:[%s1588_s1 + $0x10] sm:$0xff]  ;;  %v47_v6 = vld [vmem:[%s1588_s1 + $0x8] sm:$0xff] }
   0x3   :  { %v1016_v3 = vadd.f32 %v46_v1, %v30_v0  ;;  %v1027_v7 = vadd.f32 %v48_v4, %v32_v2  ;;  %v1029_v8 = vadd.f32 %v47_v6, %v31_v5  ;;  %v33_v9 = vld [vmem:[%s1587_s0 + $0x18] sm:$0xff]  ;;  %v34_v11 = vld [vmem:[%s1587_s0 + $0x20] sm:$0xff]  ;;  %v35_v15 = vld [vmem:[%s1587_s0 + $0x28] sm:$0xff] }
   0x4   :  { %v49_v10 = vld [vmem:[%s1588_s1 + $0x18] sm:$0xff]  ;;  %v50_v14 = vld [vmem:[%s1588_s1 + $0x20] sm:$0xff]  ;;  %v51_v16 = vld [vmem:[%s1588_s1 + $0x28] sm:$0xff] }
   0x5   :  { %v79_v12 = vsel %vm78_vm0, %v1016_v3, 0.0  ;;  %v1042_v13 = vadd.f32 %v49_v10, %v33_v9  ;;  %v85_v17 = vsel %vm78_vm0, %v1027_v7, 0.0  ;;  %v82_v18 = vsel %vm78_vm0, %v1029_v8, 0.0  ;;  %v36_v22 = vld [vmem:[%s1587_s0 + $0x30] sm:$0xff]  ;;  %v37_v24 = vld [vmem:[%s1587_s0 + $0x38] sm:$0xff]  ;;  %v38_v30 = vld [vmem:[%s1587_s0 + $0x40] sm:$0xff] }
   0x6   :  { %80 = vadd.xlane.f32.xlu0 %v79_v12  ;;  %86 = vadd.xlane.f32.xlu1 %v85_v17  ;;  %v1057_v19 = vadd.f32 %v50_v14, %v34_v11  ;;  %v1061_v21 = vadd.f32 %v51_v16, %v35_v15  ;;  %v52_v23 = vld [vmem:[%s1588_s1 + $0x30] sm:$0xff]  ;;  %v53_v25 = vld [vmem:[%s1588_s1 + $0x38] sm:$0xff]  ;;  %v54_v31 = vld [vmem:[%s1588_s1 + $0x40] sm:$0xff] }
   0x7   :  { %v88_v20 = vsel %vm78_vm0, %v1042_v13, 0.0  ;;  %v1077_v27 = vadd.f32 %v52_v23, %v36_v22  ;;  %v1081_v29 = vadd.f32 %v53_v25, %v37_v24  ;;  %v39_v32 = vld [vmem:[%s1587_s0 + $0x48] sm:$0xff]  ;;  %v1097_v35 = vadd.f32 %v54_v31, %v38_v30  ;;  %v40_v38 = vld [vmem:[%s1587_s0 + $0x50] sm:$0xff]  ;;  %v41_v40 = vld [vmem:[%s1587_s0 + $0x58] sm:$0xff] }
   0x8   :  { %v91_v26 = vsel %vm78_vm0, %v1057_v19, 0.0  ;;  %v94_v28 = vsel %vm78_vm0, %v1061_v21, 0.0  ;;  %v55_v33 = vld [vmem:[%s1588_s1 + $0x48] sm:$0xff]  ;;  %v56_v39 = vld [vmem:[%s1588_s1 + $0x50] sm:$0xff]  ;;  %v57_v41 = vld [vmem:[%s1588_s1 + $0x58] sm:$0xff] }
   0x9   :  { %v97_v34 = vsel %vm78_vm0, %v1077_v27, 0.0  ;;  %v100_v36 = vsel %vm78_vm0, %v1081_v29, 0.0  ;;  %v1101_v37 = vadd.f32 %v55_v33, %v39_v32  ;;  %v103_v42 = vsel %vm78_vm0, %v1097_v35, 0.0  ;;  %v42_v46 = vld [vmem:[%s1587_s0 + $0x60] sm:$0xff]  ;;  %v43_v48 = vld [vmem:[%s1587_s0 + $0x68] sm:$0xff]  ;;  %v44_v54 = vld [vmem:[%s1587_s0 + $0x70] sm:$0xff] }
   0xa   :  { %83 = vadd.xlane.f32.xlu0 %v82_v18  ;;  %89 = vadd.xlane.f32.xlu1 %v88_v20  ;;  %v1117_v43 = vadd.f32 %v56_v39, %v40_v38  ;;  %v1121_v45 = vadd.f32 %v57_v41, %v41_v40  ;;  %v58_v47 = vld [vmem:[%s1588_s1 + $0x60] sm:$0xff]  ;;  %v59_v49 = vld [vmem:[%s1588_s1 + $0x68] sm:$0xff]  ;;  %v60_v55 = vld [vmem:[%s1588_s1 + $0x70] sm:$0xff] }
   0xb   :  { %v106_v44 = vsel %vm78_vm0, %v1101_v37, 0.0  ;;  %v1137_v51 = vadd.f32 %v58_v47, %v42_v46  ;;  %v1141_v53 = vadd.f32 %v59_v49, %v43_v48  ;;  %v45_v56 = vld [vmem:[%s1587_s0 + $0x78] sm:$0xff]  ;;  %v1157_v59 = vadd.f32 %v60_v55, %v44_v54 }
   0xc   :  { %v109_v50 = vsel %vm78_vm0, %v1117_v43, 0.0  ;;  %v112_v52 = vsel %vm78_vm0, %v1121_v45, 0.0  ;;  %v61_v57 = vld [vmem:[%s1588_s1 + $0x78] sm:$0xff] }
   0xd   :  { %v115_v58 = vsel %vm78_vm0, %v1137_v51, 0.0  ;;  %v118_v60 = vsel %vm78_vm0, %v1141_v53, 0.0  ;;  %v1161_v61 = vadd.f32 %v61_v57, %v45_v56  ;;  %v121_v62 = vsel %vm78_vm0, %v1157_v59, 0.0 }
   0xe   :  { %92 = vadd.xlane.f32.xlu0 %v91_v26  ;;  %95 = vadd.xlane.f32.xlu1 %v94_v28 }
   0xf   :  { %v124_v63 = vsel %vm78_vm0, %v1161_v61, 0.0 }
  0x12   :  { %98 = vadd.xlane.f32.xlu0 %v97_v34  ;;  %101 = vadd.xlane.f32.xlu1 %v100_v36 }
  0x16   :  { %104 = vadd.xlane.f32.xlu0 %v103_v42  ;;  %107 = vadd.xlane.f32.xlu1 %v106_v44 }
  0x1a   :  { %110 = vadd.xlane.f32.xlu0 %v109_v50  ;;  %113 = vadd.xlane.f32.xlu1 %v112_v52 }
  0x1e   :  { %116 = vadd.xlane.f32.xlu0 %v115_v58  ;;  %119 = vadd.xlane.f32.xlu1 %v118_v60 }
  0x22   :  { %122 = vadd.xlane.f32.xlu0 %v121_v62  ;;  %125 = vadd.xlane.f32.xlu1 %v124_v63 }
  0x93   :  { %v81_v0 = vpop.xlane.xlu0 %80  ;;  %v87_v2 = vpop.xlane.xlu1 %86 }
  0x94   :  { %v128_v1 = vmul.f32 0.03125, %v81_v0  ;;  %v130_v4 = vmul.f32 0.03125, %v87_v2 }
  0x96   :  { %v1168_v5 = vsub.f32 %v1016_v3, %v128_v1  ;;  %v1171_v6 = vsub.f32 %v1027_v7, %v130_v4 }
  0x97   :  { %v84_v9 = vpop.xlane.xlu0 %83  ;;  %v90_v11 = vpop.xlane.xlu1 %89 }
  0x98   :  { %v129_v10 = vmul.f32 0.03125, %v84_v9  ;;  %v160_v12 = vmul.f32 %v1168_v5, %v1168_v5  ;;  %v131_v14 = vmul.f32 0.03125, %v90_v11  ;;  %v162_v15 = vmul.f32 %v1171_v6, %v1171_v6 }
  0x9a   :  { %v1178_v16 = vsub.f32 %v1029_v8, %v129_v10  ;;  %v176_v17 = vsel %vm78_vm0, %v160_v12, 0.0  ;;  %v1182_v18 = vsub.f32 %v1042_v13, %v131_v14  ;;  %v182_v24 = vsel %vm78_vm0, %v162_v15, 0.0 }
  0x9b   :  { %177 = vadd.xlane.f32.xlu0 %v176_v17  ;;  %v93_v20 = vpop.xlane.xlu0 %92  ;;  %v96_v23 = vpop.xlane.xlu1 %95 }
  0x9c   :  { %v132_v22 = vmul.f32 0.03125, %v93_v20  ;;  %v161_v25 = vmul.f32 %v1178_v16, %v1178_v16  ;;  %v133_v26 = vmul.f32 0.03125, %v96_v23  ;;  %v163_v28 = vmul.f32 %v1182_v18, %v1182_v18 }
  0x9e   :  { %v1190_v30 = vsub.f32 %v1057_v19, %v132_v22  ;;  %v179_v31 = vsel %vm78_vm0, %v161_v25, 0.0  ;;  %v1194_v32 = vsub.f32 %v1061_v21, %v133_v26  ;;  %v185_v38 = vsel %vm78_vm0, %v163_v28, 0.0 }
  0x9f   :  { %183 = vadd.xlane.f32.xlu0 %v182_v24  ;;  %180 = vadd.xlane.f32.xlu1 %v179_v31  ;;  %v99_v33 = vpop.xlane.xlu0 %98  ;;  %v102_v36 = vpop.xlane.xlu1 %101 }
  0xa0   :  { %v134_v34 = vmul.f32 0.03125, %v99_v33  ;;  %v164_v39 = vmul.f32 %v1190_v30, %v1190_v30  ;;  %v135_v40 = vmul.f32 0.03125, %v102_v36  ;;  %v165_v41 = vmul.f32 %v1194_v32, %v1194_v32 }
  0xa2   :  { %v1202_v42 = vsub.f32 %v1077_v27, %v134_v34  ;;  %v188_v44 = vsel %vm78_vm0, %v164_v39, 0.0  ;;  %v1206_v46 = vsub.f32 %v1081_v29, %v135_v40  ;;  %v191_v50 = vsel %vm78_vm0, %v165_v41, 0.0 }
  0xa3   :  { %186 = vadd.xlane.f32.xlu1 %v185_v38  ;;  %189 = vadd.xlane.f32.xlu0 %v188_v44  ;;  %v105_v47 = vpop.xlane.xlu0 %104  ;;  %v108_v49 = vpop.xlane.xlu1 %107 }
  0xa4   :  { %v136_v48 = vmul.f32 0.03125, %v105_v47  ;;  %v166_v52 = vmul.f32 %v1202_v42, %v1202_v42  ;;  %v137_v54 = vmul.f32 0.03125, %v108_v49  ;;  %v167_v55 = vmul.f32 %v1206_v46, %v1206_v46 }
  0xa6   :  { %v1214_v56 = vsub.f32 %v1097_v35, %v136_v48  ;;  %v194_v57 = vsel %vm78_vm0, %v166_v52, 0.0  ;;  %v1218_v58 = vsub.f32 %v1101_v37, %v137_v54  ;;  %v197_v0 = vsel %vm78_vm0, %v167_v55, 0.0  ;;  %v342_v54 = vld [vmem:[%s1589_s4] sm:$0xff]  ;;  %v343_v55 = vld [vmem:[%s1589_s4 + $0x8] sm:$0xff] }
  0xa7   :  { %192 = vadd.xlane.f32.xlu1 %v191_v50  ;;  %195 = vadd.xlane.f32.xlu0 %v194_v57  ;;  %v111_v60 = vpop.xlane.xlu0 %110  ;;  %v114_v63 = vpop.xlane.xlu1 %113  ;;  %v346_v57 = vpack.c.bf16 %v343_v55, %v342_v54  ;;  %v1279_v55 = vld [vmem:[%s1590_s2] ss:$0 sm:$0xff] }
  0xa8   :  { %v138_v62 = vmul.f32 0.03125, %v111_v60  ;;  %v168_v1 = vmul.f32 %v1214_v56, %v1214_v56  ;;  %v139_v2 = vmul.f32 0.03125, %v114_v63  ;;  %v169_v4 = vmul.f32 %v1218_v58, %v1218_v58  ;;  %v344_v60 = vld [vmem:[%s1589_s4 + $0x10] sm:$0xff] }
  0xa9   :  { %830 = vmatprep.subr.bf16.mxu0 %v346_v57 }
  0xaa   :  { %v1226_v9 = vsub.f32 %v1117_v43, %v138_v62  ;;  %v200_v10 = vsel %vm78_vm0, %v168_v1, 0.0  ;;  %v1230_v11 = vsub.f32 %v1121_v45, %v139_v2  ;;  %v203_v17 = vsel %vm78_vm0, %v169_v4, 0.0  ;;  %831 = vmatpush3.bf16.msra.mxu0 %v346_v57  ;;  %v345_v62 = vld [vmem:[%s1589_s4 + $0x18] sm:$0xff] }
  0xab   :  { %198 = vadd.xlane.f32.xlu1 %v197_v0  ;;  %201 = vadd.xlane.f32.xlu0 %v200_v10  ;;  %v117_v12 = vpop.xlane.xlu0 %116  ;;  %v120_v15 = vpop.xlane.xlu1 %119  ;;  %v347_v63 = vpack.c.bf16 %v345_v62, %v344_v60 }
  0xac   :  { %v140_v14 = vmul.f32 0.03125, %v117_v12  ;;  %v170_v20 = vmul.f32 %v1226_v9, %v1226_v9  ;;  %v141_v22 = vmul.f32 0.03125, %v120_v15  ;;  %v171_v23 = vmul.f32 %v1230_v11, %v1230_v11 }
  0xad   :  { %832 = vmatprep.subr.bf16.mxu0 %v347_v63 }
  0xae   :  { %v1238_v24 = vsub.f32 %v1137_v51, %v140_v14  ;;  %v206_v25 = vsel %vm78_vm0, %v170_v20, 0.0  ;;  %v1242_v26 = vsub.f32 %v1141_v53, %v141_v22  ;;  %v209_v34 = vsel %vm78_vm0, %v171_v23, 0.0  ;;  %833 = vmatpush3.bf16.msra.mxu0 %v347_v63 }
  0xaf   :  { %204 = vadd.xlane.f32.xlu1 %v203_v17  ;;  %207 = vadd.xlane.f32.xlu0 %v206_v25  ;;  %v123_v28 = vpop.xlane.xlu0 %122  ;;  %v126_v33 = vpop.xlane.xlu1 %125 }
  0xb0   :  { %v142_v31 = vmul.f32 0.03125, %v123_v28  ;;  %v172_v36 = vmul.f32 %v1238_v24, %v1238_v24  ;;  %v143_v38 = vmul.f32 0.03125, %v126_v33  ;;  %v173_v39 = vmul.f32 %v1242_v26, %v1242_v26 }
  0xb2   :  { %v1250_v40 = vsub.f32 %v1157_v59, %v142_v31  ;;  %v212_v41 = vsel %vm78_vm0, %v172_v36, 0.0  ;;  %v1254_v44 = vsub.f32 %v1161_v61, %v143_v38  ;;  %v215_v47 = vsel %vm78_vm0, %v173_v39, 0.0 }
  0xb3   :  { %210 = vadd.xlane.f32.xlu1 %v209_v34  ;;  %213 = vadd.xlane.f32.xlu0 %v212_v41 }
  0xb4   :  { %v174_v48 = vmul.f32 %v1250_v40, %v1250_v40  ;;  %v175_v49 = vmul.f32 %v1254_v44, %v1254_v44 }
  0xb6   :  { %v218_v50 = vsel %vm78_vm0, %v174_v48, 0.0  ;;  %v221_v52 = vsel %vm78_vm0, %v175_v49, 0.0 }
  0xb7   :  { %216 = vadd.xlane.f32.xlu1 %v215_v47  ;;  %219 = vadd.xlane.f32.xlu0 %v218_v50 }
  0xbb   :  { %222 = vadd.xlane.f32.xlu1 %v221_v52 }
 0x128   :  { %v178_v0 = vpop.xlane.xlu0 %177 }
 0x129   :  { %v224_v1 = vmul.f32 0.03125, %v178_v0 }
 0x12b   :  { %v240_v2 = vadd.f32 1e-05, %v224_v1 }
 0x12c   :  { %v181_v4 = vpop.xlane.xlu1 %180  ;;  %v184_v10 = vpop.xlane.xlu0 %183 }
 0x12d   :  { %898 = vrsqrt.f32 %v240_v2  ;;  %v225_v12 = vmul.f32 0.03125, %v181_v4  ;;  %v226_v14 = vmul.f32 0.03125, %v184_v10 }
 0x12f   :  { %v241_v15 = vadd.f32 1e-05, %v225_v12  ;;  %v242_v17 = vadd.f32 1e-05, %v226_v14  ;;  %v1287_v14 = vld [vmem:[%s1591_s3] ss:$0 sm:$0xff] }
 0x130   :  { %v187_v20 = vpop.xlane.xlu1 %186  ;;  %v190_v22 = vpop.xlane.xlu0 %189 }
 0x131   :  { %900 = vrsqrt.f32 %v241_v15  ;;  %v227_v23 = vmul.f32 0.03125, %v187_v20  ;;  %v228_v25 = vmul.f32 0.03125, %v190_v22 }
 0x132   :  { %902 = vrsqrt.f32 %v242_v17 }
 0x133   :  { %v243_v28 = vadd.f32 1e-05, %v227_v23  ;;  %v244_v31 = vadd.f32 1e-05, %v228_v25 }
 0x134   :  { %v193_v33 = vpop.xlane.xlu1 %192  ;;  %v196_v34 = vpop.xlane.xlu0 %195 }
 0x135   :  { %904 = vrsqrt.f32 %v243_v28  ;;  %v229_v36 = vmul.f32 0.03125, %v193_v33  ;;  %v230_v38 = vmul.f32 0.03125, %v196_v34 }
 0x136   :  { %906 = vrsqrt.f32 %v244_v31 }
 0x137   :  { %v899_v39 = vpop.eup %898  ;;  %v245_v41 = vadd.f32 1e-05, %v229_v36  ;;  %v246_v47 = vadd.f32 1e-05, %v230_v38 }
 0x138   :  { %v199_v48 = vpop.xlane.xlu1 %198  ;;  %v202_v49 = vpop.xlane.xlu0 %201  ;;  %v272_v50 = vmul.f32 %v899_v39, %v1168_v5 }
 0x139   :  { %908 = vrsqrt.f32 %v245_v41  ;;  %v231_v52 = vmul.f32 0.03125, %v199_v48  ;;  %v232_v54 = vmul.f32 0.03125, %v202_v49 }
 0x13a   :  { %910 = vrsqrt.f32 %v246_v47  ;;  %v295_v4 = vmul.f32 %v1279_v55, %v272_v50 }
 0x13b   :  { %v901_v57 = vpop.eup %900  ;;  %v247_v60 = vadd.f32 1e-05, %v231_v52  ;;  %v248_v62 = vadd.f32 1e-05, %v232_v54 }
 0x13c   :  { %v903_v63 = vpop.eup %902  ;;  %v205_v0 = vpop.xlane.xlu1 %204  ;;  %v273_v2 = vmul.f32 %v901_v57, %v1178_v16 }
 0x13d   :  { %v208_v1 = vpop.xlane.xlu0 %207  ;;  %v274_v5 = vmul.f32 %v903_v63, %v1171_v6  ;;  %912 = vrsqrt.f32 %v247_v60  ;;  %v233_v10 = vmul.f32 0.03125, %v205_v0  ;;  %v318_v6 = vadd.f32 %v1287_v14, %v295_v4 }
 0x13e   :  { %v234_v12 = vmul.f32 0.03125, %v208_v1  ;;  %914 = vrsqrt.f32 %v248_v62  ;;  %v296_v15 = vmul.f32 %v1279_v55, %v273_v2 }
 0x13f   :  { %v905_v17 = vpop.eup %904  ;;  %v249_v20 = vadd.f32 1e-05, %v233_v10  ;;  %v297_v33 = vmul.f32 %v1279_v55, %v274_v5 }
 0x140   :  { %v250_v22 = vadd.f32 1e-05, %v234_v12  ;;  %v907_v23 = vpop.eup %906  ;;  %v275_v16 = vmul.f32 %v905_v17, %v1182_v18  ;;  %v211_v25 = vpop.xlane.xlu1 %210  ;;  %v319_v31 = vadd.f32 %v1287_v14, %v296_v15 }
 0x141   :  { %v214_v28 = vpop.xlane.xlu0 %213  ;;  %v276_v34 = vmul.f32 %v907_v23, %v1190_v30  ;;  %916 = vrsqrt.f32 %v249_v20  ;;  %v235_v36 = vmul.f32 0.03125, %v211_v25  ;;  %v320_v57 = vadd.f32 %v1287_v14, %v297_v33 }
 0x142   :  { %v236_v38 = vmul.f32 0.03125, %v214_v28  ;;  %918 = vrsqrt.f32 %v250_v22  ;;  %v334_v39 = vpack.c.bf16 %v319_v31, %v318_v6  ;;  %v298_v41 = vmul.f32 %v1279_v55, %v275_v16 }
 0x143   :  { %v909_v47 = vpop.eup %908  ;;  %v251_v48 = vadd.f32 1e-05, %v235_v36  ;;  %v299_v60 = vmul.f32 %v1279_v55, %v276_v34 }
 0x144   :  { %v252_v18 = vadd.f32 1e-05, %v236_v38  ;;  %v911_v49 = vpop.eup %910  ;;  %v277_v50 = vmul.f32 %v909_v47, %v1194_v32  ;;  %v217_v52 = vpop.xlane.xlu1 %216  ;;  %834 = vmatprep.mubr.msk.bf16.mxu0 %vm78_vm0, %v334_v39  ;;  %v321_v30 = vadd.f32 %v1287_v14, %v298_v41 }
 0x145   :  { %v220_v54 = vpop.xlane.xlu0 %219  ;;  %v278_v62 = vmul.f32 %v911_v49, %v1202_v42  ;;  %920 = vrsqrt.f32 %v251_v48  ;;  %v237_v63 = vmul.f32 0.03125, %v217_v52  ;;  %v322_v17 = vadd.f32 %v1287_v14, %v299_v60 }
 0x146   :  { %v238_v0 = vmul.f32 0.03125, %v220_v54  ;;  %922 = vrsqrt.f32 %v252_v18  ;;  %v335_v1 = vpack.c.bf16 %v321_v30, %v320_v57  ;;  %v300_v2 = vmul.f32 %v1279_v55, %v277_v50 }
 0x147   :  { %v913_v32 = vpop.eup %912  ;;  %v253_v4 = vadd.f32 1e-05, %v237_v63  ;;  %v301_v20 = vmul.f32 %v1279_v55, %v278_v62 }
 0x148   :  { %v254_v5 = vadd.f32 1e-05, %v238_v0  ;;  %v915_v10 = vpop.eup %914  ;;  %v279_v12 = vmul.f32 %v913_v32, %v1206_v46  ;;  %v223_v15 = vpop.xlane.xlu1 %222  ;;  %835 = vmatmul.mubr.msk.bf16.vlgmr.msra.gmra.mrb[0].mxu0 %vm78_vm0, %v335_v1  ;;  %v323_v42 = vadd.f32 %v1287_v14, %v300_v2 }
 0x149   :  { %v280_v22 = vmul.f32 %v915_v10, %v1214_v56  ;;  %924 = vrsqrt.f32 %v253_v4  ;;  %v239_v23 = vmul.f32 0.03125, %v223_v15  ;;  %v324_v33 = vadd.f32 %v1287_v14, %v301_v20 }
 0x14a   :  { %926 = vrsqrt.f32 %v254_v5  ;;  %v336_v16 = vpack.c.bf16 %v323_v42, %v322_v17  ;;  %v302_v25 = vmul.f32 %v1279_v55, %v279_v12  ;;  %v629_v17 = vld [vmem:[%s1592_s6 + $0x8] sm:$0xff] }
 0x14b   :  { %v917_v28 = vpop.eup %916  ;;  %v255_v6 = vadd.f32 1e-05, %v239_v23  ;;  %v303_v36 = vmul.f32 %v1279_v55, %v280_v22  ;;  %v632_v22 = vld [vmem:[%s1592_s6 + $0x20] sm:$0xff]  ;;  %v633_v23 = vld [vmem:[%s1592_s6 + $0x28] sm:$0xff] }
 0x14c   :  { %v919_v46 = vpop.eup %918  ;;  %v281_v31 = vmul.f32 %v917_v28, %v1218_v58  ;;  %838 = vmatprep.mubr.msk.bf16.mxu0 %vm78_vm0, %v336_v16  ;;  %v325_v34 = vadd.f32 %v1287_v14, %v302_v25  ;;  %v646_v16 = vpack.c.bf16 %v633_v23, %v632_v22  ;;  %v634_v25 = vld [vmem:[%s1592_s6 + $0x30] sm:$0xff]  ;;  %v635_v28 = vld [vmem:[%s1592_s6 + $0x38] sm:$0xff] }
 0x14d   :  { %v282_v56 = vmul.f32 %v919_v46, %v1226_v9  ;;  %928 = vrsqrt.f32 %v255_v6  ;;  %v326_v58 = vadd.f32 %v1287_v14, %v303_v36  ;;  %v647_v6 = vpack.c.bf16 %v635_v28, %v634_v25  ;;  %v636_v46 = vld [vmem:[%s1592_s6 + $0x40] sm:$0xff]  ;;  %v639_v36 = vld [vmem:[%s1592_s6 + $0x58] sm:$0xff] }
 0x14e   :  { %v337_v38 = vpack.c.bf16 %v325_v34, %v324_v33  ;;  %v304_v39 = vmul.f32 %v1279_v55, %v281_v31  ;;  %v637_v31 = vld [vmem:[%s1592_s6 + $0x48] sm:$0xff]  ;;  %v638_v34 = vld [vmem:[%s1592_s6 + $0x50] sm:$0xff] }
 0x14f   :  { %v921_v41 = vpop.eup %920  ;;  %v305_v49 = vmul.f32 %v1279_v55, %v282_v56  ;;  %v648_v33 = vpack.c.bf16 %v637_v31, %v636_v46  ;;  %v649_v56 = vpack.c.bf16 %v639_v36, %v638_v34 }
 0x150   :  { %v923_v47 = vpop.eup %922  ;;  %v283_v48 = vmul.f32 %v921_v41, %v1230_v11  ;;  %839 = vmatmul.mubr.msk.bf16.gmra.mrb[4].mxu0 %vm78_vm0, %v337_v38  ;;  %v327_v18 = vadd.f32 %v1287_v14, %v304_v39  ;;  %v640_v38 = vld [vmem:[%s1592_s6 + $0x60] sm:$0xff]  ;;  %v641_v39 = vld [vmem:[%s1592_s6 + $0x68] sm:$0xff] }
 0x151   :  { %v284_v50 = vmul.f32 %v923_v47, %v1238_v24  ;;  %v328_v11 = vadd.f32 %v1287_v14, %v305_v49  ;;  %v650_v41 = vpack.c.bf16 %v641_v39, %v640_v38  ;;  %v642_v47 = vld [vmem:[%s1592_s6 + $0x70] sm:$0xff] }
 0x152   :  { %v338_v52 = vpack.c.bf16 %v327_v18, %v326_v58  ;;  %v306_v9 = vmul.f32 %v1279_v55, %v283_v48  ;;  %v643_v48 = vld [vmem:[%s1592_s6 + $0x78] sm:$0xff]  ;;  %v1392_v18 = vld [vmem:[%s1593_s5] ss:$0 sm:$0xff] }
 0x153   :  { %v925_v54 = vpop.eup %924  ;;  %v307_v62 = vmul.f32 %v1279_v55, %v284_v50  ;;  %v651_v58 = vpack.c.bf16 %v643_v48, %v642_v47 }
 0x154   :  { %v927_v57 = vpop.eup %926  ;;  %v285_v30 = vmul.f32 %v925_v54, %v1242_v26  ;;  %842 = vmatprep.mubr.msk.bf16.mxu0 %vm78_vm0, %v338_v52  ;;  %v329_v60 = vadd.f32 %v1287_v14, %v306_v9 }
 0x155   :  { %v286_v63 = vmul.f32 %v927_v57, %v1250_v40  ;;  %v330_v26 = vadd.f32 %v1287_v14, %v307_v62 }
 0x156   :  { %v339_v0 = vpack.c.bf16 %v329_v60, %v328_v11  ;;  %v308_v24 = vmul.f32 %v1279_v55, %v285_v30 }
 0x157   :  { %v929_v1 = vpop.eup %928  ;;  %v309_v4 = vmul.f32 %v1279_v55, %v286_v63 }
 0x158   :  { %v287_v2 = vmul.f32 %v929_v1, %v1254_v44  ;;  %843 = vmatmul.mubr.msk.bf16.gmra.mrb[8].mxu0 %vm78_vm0, %v339_v0  ;;  %v331_v32 = vadd.f32 %v1287_v14, %v308_v24  ;;  %v628_v44 = vld [vmem:[%s1592_s6] sm:$0xff] }
 0x159   :  { %v332_v40 = vadd.f32 %v1287_v14, %v309_v4  ;;  %v644_v42 = vpack.c.bf16 %v629_v17, %v628_v44 }
 0x15a   :  { %v340_v5 = vpack.c.bf16 %v331_v32, %v330_v26  ;;  %v310_v10 = vmul.f32 %v1279_v55, %v287_v2  ;;  %v630_v55 = vld [vmem:[%s1592_s6 + $0x10] sm:$0xff] }
 0x15b   :  { %850 = vmatprep.subr.bf16.mxu0 %v644_v42  ;;  %882 = vmatprep.subr.bf16.mxu1 %v644_v42 }
 0x15c   :  { %846 = vmatprep.mubr.msk.bf16.mxu0 %vm78_vm0, %v340_v5  ;;  %v333_v12 = vadd.f32 %v1287_v14, %v310_v10  ;;  %851 = vmatpush3.bf16.msra.mxu0 %v644_v42  ;;  %v631_v14 = vld [vmem:[%s1592_s6 + $0x18] sm:$0xff] }
 0x15d   :  { %890 = vmatpush3.bf16.msra.mxu1 %v644_v42  ;;  %v645_v20 = vpack.c.bf16 %v631_v14, %v630_v55 }
 0x15e   :  { %v341_v15 = vpack.c.bf16 %v333_v12, %v332_v40 }
 0x15f   :  { %852 = vmatprep.subr.bf16.mxu0 %v645_v20  ;;  %883 = vmatprep.subr.bf16.mxu1 %v645_v20 }
 0x160   :  { %847 = vmatmul.mubr.msk.bf16.gmra.mrb[12].mxu0 %vm78_vm0, %v341_v15 }
 0x161   :  { %853 = vmatpush3.bf16.msra.mxu0 %v645_v20  ;;  %891 = vmatpush3.bf16.msra.mxu1 %v645_v20 }
 0x162   :  { %854 = vmatprep.subr.bf16.mxu0 %v646_v16  ;;  %884 = vmatprep.subr.bf16.mxu1 %v646_v16 }
 0x165   :  { %855 = vmatpush3.bf16.msra.mxu0 %v646_v16  ;;  %892 = vmatpush3.bf16.msra.mxu1 %v646_v16 }
 0x166   :  { %856 = vmatprep.subr.bf16.mxu0 %v647_v6  ;;  %885 = vmatprep.subr.bf16.mxu1 %v647_v6 }
 0x169   :  { %857 = vmatpush3.bf16.msra.mxu0 %v647_v6  ;;  %893 = vmatpush3.bf16.msra.mxu1 %v647_v6 }
 0x16a   :  { %858 = vmatprep.subr.bf16.mxu0 %v648_v33  ;;  %886 = vmatprep.subr.bf16.mxu1 %v648_v33 }
 0x16d   :  { %859 = vmatpush3.bf16.msra.mxu0 %v648_v33  ;;  %894 = vmatpush3.bf16.msra.mxu1 %v648_v33 }
 0x16e   :  { %860 = vmatprep.subr.bf16.mxu0 %v649_v56  ;;  %887 = vmatprep.subr.bf16.mxu1 %v649_v56 }
 0x171   :  { %861 = vmatpush3.bf16.msra.mxu0 %v649_v56  ;;  %895 = vmatpush3.bf16.msra.mxu1 %v649_v56 }
 0x172   :  { %862 = vmatprep.subr.bf16.mxu0 %v650_v41  ;;  %888 = vmatprep.subr.bf16.mxu1 %v650_v41 }
 0x175   :  { %863 = vmatpush3.bf16.msra.mxu0 %v650_v41  ;;  %896 = vmatpush3.bf16.msra.mxu1 %v650_v41 }
 0x176   :  { %864 = vmatprep.subr.bf16.mxu0 %v651_v58  ;;  %889 = vmatprep.subr.bf16.mxu1 %v651_v58 }
 0x179   :  { %865 = vmatpush3.bf16.msra.mxu0 %v651_v58  ;;  %897 = vmatpush3.bf16.msra.mxu1 %v651_v58 }
 0x21b   :  { %v836_v49 = vpop.f32.mrb[0].mxu0 }
 0x21c   :  { %v422_v50 = vadd.f32 %v836_v49, %v1392_v18  ;;  %v413_v52 = vpop.f32.mrb[1].mxu0 }
 0x21d   :  { %v414_v9 = vadd.f32 %v1392_v18, %v413_v52  ;;  %v837_v54 = vpop.f32.mrb[2].mxu0 }
 0x21e   :  { %v494_v57 = vmul.f32 0.044715, %v422_v50  ;;  %v1397_v30 = vadd.f32 %v837_v54, %v1392_v18  ;;  %v416_v11 = vpop.f32.mrb[3].mxu0  ;;  %v478_v58 = vmul.f32 0.5, %v422_v50 }
 0x21f   :  { %v492_v60 = vmul.f32 0.044715, %v414_v9  ;;  %v1400_v62 = vadd.f32 %v1392_v18, %v416_v11 }
 0x220   :  { %v510_v63 = vmul.f32 %v494_v57, %v422_v50  ;;  %v495_v0 = vmul.f32 0.044715, %v1397_v30 }
 0x221   :  { %v508_v24 = vmul.f32 %v492_v60, %v414_v9  ;;  %v493_v1 = vmul.f32 0.044715, %v1400_v62 }
 0x222   :  { %v526_v2 = vmul.f32 %v510_v63, %v422_v50  ;;  %v511_v26 = vmul.f32 %v495_v0, %v1397_v30  ;;  %v476_v63 = vmul.f32 0.5, %v414_v9 }
 0x223   :  { %v524_v32 = vmul.f32 %v508_v24, %v414_v9  ;;  %v509_v4 = vmul.f32 %v493_v1, %v1400_v62  ;;  %v840_v5 = vpop.f32.mrb[4].mxu0 }
 0x224   :  { %v542_v10 = vadd.f32 %v526_v2, %v422_v50  ;;  %v527_v40 = vmul.f32 %v511_v26, %v1397_v30  ;;  %v1408_v12 = vadd.f32 %v840_v5, %v1392_v18  ;;  %v429_v15 = vpop.f32.mrb[5].mxu0 }
 0x225   :  { %v525_v44 = vmul.f32 %v509_v4, %v1400_v62  ;;  %v430_v17 = vadd.f32 %v1392_v18, %v429_v15  ;;  %v841_v42 = vpop.f32.mrb[6].mxu0  ;;  %v540_v55 = vadd.f32 %v524_v32, %v414_v9 }
 0x226   :  { %v558_v14 = vmul.f32 0.7978846, %v542_v10  ;;  %v543_v20 = vadd.f32 %v527_v40, %v1397_v30  ;;  %v498_v22 = vmul.f32 0.044715, %v1408_v12  ;;  %v1415_v23 = vadd.f32 %v841_v42, %v1392_v18  ;;  %v432_v16 = vpop.f32.mrb[7].mxu0 }
 0x227   :  { %v496_v25 = vmul.f32 0.044715, %v430_v17  ;;  %v1418_v28 = vadd.f32 %v1392_v18, %v432_v16  ;;  %v541_v6 = vadd.f32 %v525_v44, %v1400_v62  ;;  %v556_v46 = vmul.f32 0.7978846, %v540_v55 }
 0x228   :  { %930 = vtanh.f32 %v558_v14  ;;  %v559_v31 = vmul.f32 0.7978846, %v543_v20  ;;  %v514_v33 = vmul.f32 %v498_v22, %v1408_v12  ;;  %v499_v34 = vmul.f32 0.044715, %v1415_v23 }
 0x229   :  { %v497_v36 = vmul.f32 0.044715, %v1418_v28  ;;  %v557_v56 = vmul.f32 0.7978846, %v541_v6  ;;  %932 = vtanh.f32 %v556_v46  ;;  %v512_v47 = vmul.f32 %v496_v25, %v430_v17 }
 0x22a   :  { %934 = vtanh.f32 %v559_v31  ;;  %v530_v38 = vmul.f32 %v514_v33, %v1408_v12  ;;  %v515_v39 = vmul.f32 %v499_v34, %v1415_v23  ;;  %v479_v16 = vmul.f32 0.5, %v1397_v30 }
 0x22b   :  { %v844_v41 = vpop.f32.mrb[8].mxu0  ;;  %936 = vtanh.f32 %v557_v56  ;;  %v513_v48 = vmul.f32 %v497_v36, %v1418_v28  ;;  %v528_v0 = vmul.f32 %v512_v47, %v430_v17  ;;  %v477_v25 = vmul.f32 0.5, %v1400_v62 }
 0x22c   :  { %v531_v49 = vmul.f32 %v515_v39, %v1415_v23  ;;  %v1429_v52 = vadd.f32 %v844_v41, %v1392_v18  ;;  %v445_v54 = vpop.f32.mrb[9].mxu0  ;;  %v546_v57 = vadd.f32 %v530_v38, %v1408_v12  ;;  %v1452_v6 = vmul.f32 0.5, %v430_v17 }
 0x22d   :  { %v1433_v11 = vadd.f32 %v1392_v18, %v445_v54  ;;  %v845_v60 = vpop.f32.mrb[10].mxu0  ;;  %v529_v24 = vmul.f32 %v513_v48, %v1418_v28  ;;  %v544_v10 = vadd.f32 %v528_v0, %v430_v17 }
 0x22e   :  { %v502_v1 = vmul.f32 0.044715, %v1429_v52  ;;  %v1438_v50 = vadd.f32 %v845_v60, %v1392_v18  ;;  %v448_v2 = vpop.f32.mrb[11].mxu0  ;;  %v547_v26 = vadd.f32 %v531_v49, %v1415_v23  ;;  %v562_v32 = vmul.f32 0.7978846, %v546_v57 }
 0x22f   :  { %v500_v4 = vmul.f32 0.044715, %v1433_v11  ;;  %v1443_v5 = vadd.f32 %v1392_v18, %v448_v2  ;;  %v545_v9 = vadd.f32 %v529_v24, %v1418_v28  ;;  %v560_v14 = vmul.f32 0.7978846, %v544_v10 }
 0x230   :  { %v518_v40 = vmul.f32 %v502_v1, %v1429_v52  ;;  %v503_v15 = vmul.f32 0.044715, %v1438_v50  ;;  %v563_v44 = vmul.f32 0.7978846, %v547_v26  ;;  %938 = vtanh.f32 %v562_v32 }
 0x231   :  { %v516_v42 = vmul.f32 %v500_v4, %v1433_v11  ;;  %v501_v55 = vmul.f32 0.044715, %v1443_v5  ;;  %v561_v20 = vmul.f32 0.7978846, %v545_v9 }
 0x232   :  { %v931_v22 = vpop.eup %930  ;;  %940 = vtanh.f32 %v563_v44  ;;  %v534_v31 = vmul.f32 %v518_v40, %v1429_v52  ;;  %v519_v17 = vmul.f32 %v503_v15, %v1438_v50 }
 0x233   :  { %v933_v46 = vpop.eup %932  ;;  %v517_v33 = vmul.f32 %v501_v55, %v1443_v5  ;;  %v848_v34 = vpop.f32.mrb[12].mxu0  ;;  %v590_v36 = vadd.f32 1.0, %v931_v22  ;;  %942 = vtanh.f32 %v560_v14  ;;  %v532_v38 = vmul.f32 %v516_v42, %v1433_v11 }
 0x234   :  { %v935_v56 = vpop.eup %934  ;;  %v1458_v39 = vadd.f32 %v848_v34, %v1392_v18  ;;  %v461_v30 = vpop.f32.mrb[13].mxu0  ;;  %v588_v41 = vadd.f32 1.0, %v933_v46  ;;  %944 = vtanh.f32 %v561_v20 }
 0x235   :  { %v937_v62 = vpop.eup %936  ;;  %v533_v47 = vmul.f32 %v517_v33, %v1443_v5  ;;  %v1463_v48 = vadd.f32 %v1392_v18, %v461_v30  ;;  %v849_v49 = vpop.f32.mrb[14].mxu0  ;;  %v591_v54 = vadd.f32 1.0, %v935_v56  ;;  %v606_v1 = vmul.f32 %v590_v36, %v478_v58 }
 0x236   :  { %v506_v57 = vmul.f32 0.044715, %v1458_v39  ;;  %v1467_v60 = vadd.f32 %v849_v49, %v1392_v18  ;;  %v464_v0 = vpop.f32.mrb[15].mxu0  ;;  %v589_v24 = vadd.f32 1.0, %v937_v62  ;;  %v604_v32 = vmul.f32 %v588_v41, %v476_v63 }
 0x237   :  { %v504_v2 = vmul.f32 0.044715, %v1463_v48  ;;  %v1471_v26 = vadd.f32 %v1392_v18, %v464_v0  ;;  %v607_v4 = vmul.f32 %v591_v54, %v479_v16  ;;  %v548_v15 = vadd.f32 %v532_v38, %v1433_v11 }
 0x238   :  { %v522_v10 = vmul.f32 %v506_v57, %v1458_v39  ;;  %v507_v9 = vmul.f32 0.044715, %v1467_v60  ;;  %v605_v40 = vmul.f32 %v589_v24, %v477_v25  ;;  %v549_v58 = vadd.f32 %v533_v47, %v1443_v5 }
 0x239   :  { %v520_v44 = vmul.f32 %v504_v2, %v1463_v48  ;;  %v505_v42 = vmul.f32 0.044715, %v1471_v26  ;;  %v621_v55 = vpack.c.bf16 %v607_v4, %v606_v1  ;;  %v535_v18 = vmul.f32 %v519_v17, %v1438_v50 }
 0x23a   :  { %v939_v14 = vpop.eup %938  ;;  %v523_v63 = vmul.f32 %v507_v9, %v1467_v60  ;;  %v620_v20 = vpack.c.bf16 %v605_v40, %v604_v32  ;;  %v564_v22 = vmul.f32 0.7978846, %v548_v15  ;;  %v565_v33 = vmul.f32 0.7978846, %v549_v58 }
 0x23b   :  { %v536_v16 = vmul.f32 %v520_v44, %v1463_v48  ;;  %v521_v25 = vmul.f32 %v505_v42, %v1471_v26  ;;  %v594_v46 = vadd.f32 1.0, %v939_v14  ;;  %v481_v36 = vmul.f32 0.5, %v1418_v28 }
 0x23c   :  { %v941_v34 = vpop.eup %940  ;;  %866 = vmatprep.mubr.bf16.mxu0 %v620_v20  ;;  %v482_v56 = vmul.f32 0.5, %v1408_v12  ;;  %v483_v38 = vmul.f32 0.5, %v1415_v23  ;;  %946 = vtanh.f32 %v564_v22  ;;  %v538_v41 = vmul.f32 %v522_v10, %v1458_v39 }
 0x23d   :  { %v943_v30 = vpop.eup %942  ;;  %v537_v62 = vmul.f32 %v521_v25, %v1471_v26  ;;  %867 = vmatmul.mubr.bf16.vlgmr.msra.gmra.mrb[16].mxu0 %v621_v55  ;;  %v595_v17 = vadd.f32 1.0, %v941_v34  ;;  %948 = vtanh.f32 %v565_v33  ;;  %v539_v49 = vmul.f32 %v523_v63, %v1467_v60 }
 0x23e   :  { %v945_v47 = vpop.eup %944  ;;  %v592_v54 = vadd.f32 1.0, %v943_v30  ;;  %v550_v57 = vadd.f32 %v534_v31, %v1429_v52  ;;  %v551_v28 = vadd.f32 %v535_v18, %v1438_v50  ;;  %v610_v0 = vmul.f32 %v594_v46, %v482_v56 }
 0x23f   :  { %v593_v12 = vadd.f32 1.0, %v945_v47  ;;  %v611_v23 = vmul.f32 %v595_v17, %v483_v38  ;;  %v552_v24 = vadd.f32 %v536_v16, %v1463_v48  ;;  %v553_v32 = vadd.f32 %v537_v62, %v1471_v26 }
 0x240   :  { %v566_v1 = vmul.f32 0.7978846, %v550_v57  ;;  %v567_v2 = vmul.f32 0.7978846, %v551_v28  ;;  %v608_v4 = vmul.f32 %v592_v54, %v1452_v6  ;;  %v554_v31 = vadd.f32 %v538_v41, %v1458_v39 }
 0x241   :  { %v609_v10 = vmul.f32 %v593_v12, %v481_v36  ;;  %v623_v9 = vpack.c.bf16 %v611_v23, %v610_v0  ;;  %v568_v40 = vmul.f32 0.7978846, %v552_v24  ;;  %v569_v15 = vmul.f32 0.7978846, %v553_v32 }
 0x242   :  { %950 = vtanh.f32 %v566_v1  ;;  %v555_v42 = vadd.f32 %v539_v49, %v1467_v60  ;;  %v570_v55 = vmul.f32 0.7978846, %v554_v31  ;;  %v484_v63 = vmul.f32 0.5, %v1433_v11 }
 0x243   :  { %v622_v44 = vpack.c.bf16 %v609_v10, %v608_v4  ;;  %952 = vtanh.f32 %v567_v2  ;;  %v485_v20 = vmul.f32 0.5, %v1443_v5  ;;  %v486_v38 = vmul.f32 0.5, %v1429_v52 }
 0x244   :  { %954 = vtanh.f32 %v568_v40  ;;  %v571_v58 = vmul.f32 0.7978846, %v555_v42  ;;  %v487_v30 = vmul.f32 0.5, %v1438_v50  ;;  %v488_v17 = vmul.f32 0.5, %v1463_v48 }
 0x245   :  { %870 = vmatprep.mubr.bf16.mxu1 %v622_v44  ;;  %956 = vtanh.f32 %v569_v15  ;;  %v489_v54 = vmul.f32 0.5, %v1471_v26  ;;  %v490_v12 = vmul.f32 0.5, %v1458_v39  ;;  %v491_v0 = vmul.f32 0.5, %v1467_v60  ;;  %v803_v26 = vld [vmem:[%s1594_s7] ss:$0 sm:$0xff] }
 0x246   :  { %v947_v14 = vpop.eup %946  ;;  %871 = vmatmul.mubr.bf16.vlgmr.msra.gmra.mrb[0].mxu1 %v623_v9  ;;  %958 = vtanh.f32 %v570_v55 }
 0x247   :  { %v949_v6 = vpop.eup %948  ;;  %v596_v18 = vadd.f32 1.0, %v947_v14  ;;  %960 = vtanh.f32 %v571_v58 }
 0x248   :  { %v597_v22 = vadd.f32 1.0, %v949_v6 }
 0x249   :  { %v612_v16 = vmul.f32 %v596_v18, %v484_v63 }
 0x24a   :  { %v613_v25 = vmul.f32 %v597_v22, %v485_v20 }
 0x24c   :  { %v951_v46 = vpop.eup %950  ;;  %v624_v33 = vpack.c.bf16 %v613_v25, %v612_v16 }
 0x24d   :  { %v953_v34 = vpop.eup %952  ;;  %v598_v36 = vadd.f32 1.0, %v951_v46 }
 0x24e   :  { %v955_v56 = vpop.eup %954  ;;  %874 = vmatprep.mubr.bf16.mxu1 %v624_v33  ;;  %v599_v41 = vadd.f32 1.0, %v953_v34 }
 0x24f   :  { %v957_v62 = vpop.eup %956  ;;  %v600_v11 = vadd.f32 1.0, %v955_v56  ;;  %v614_v5 = vmul.f32 %v598_v36, %v486_v38 }
 0x250   :  { %v959_v47 = vpop.eup %958  ;;  %v615_v49 = vmul.f32 %v599_v41, %v487_v30  ;;  %v601_v57 = vadd.f32 1.0, %v957_v62 }
 0x251   :  { %v961_v28 = vpop.eup %960  ;;  %v602_v23 = vadd.f32 1.0, %v959_v47  ;;  %v616_v24 = vmul.f32 %v600_v11, %v488_v17 }
 0x252   :  { %v625_v52 = vpack.c.bf16 %v615_v49, %v614_v5  ;;  %v617_v50 = vmul.f32 %v601_v57, %v489_v54  ;;  %v603_v1 = vadd.f32 1.0, %v961_v28 }
 0x253   :  { %v618_v48 = vmul.f32 %v602_v23, %v490_v12 }
 0x254   :  { %875 = vmatmul.mubr.bf16.gmra.mrb[4].mxu1 %v625_v52  ;;  %v626_v2 = vpack.c.bf16 %v617_v50, %v616_v24  ;;  %v619_v32 = vmul.f32 %v603_v1, %v491_v0 }
 0x256   :  { %878 = vmatprep.mubr.bf16.mxu1 %v626_v2  ;;  %v627_v4 = vpack.c.bf16 %v619_v32, %v618_v48 }
 0x25c   :  { %879 = vmatmul.mubr.bf16.gmra.mrb[8].mxu1 %v627_v4 }
 0x310   :  { %v868_v10 = vpop.f32.mrb[16].mxu0 }
 0x311   :  { %v702_v39 = vadd.f32 %v868_v10, %v803_v26  ;;  %v693_v9 = vpop.f32.mrb[17].mxu0 }
 0x312   :  { %v694_v60 = vadd.f32 %v803_v26, %v693_v9  ;;  %v869_v40 = vpop.f32.mrb[18].mxu0 }
 0x313   :  { %v758_v15 = vadd.f32 %v702_v39, %v1027_v7  ;;  %v705_v31 = vadd.f32 %v869_v40, %v803_v26  ;;  %v696_v44 = vpop.f32.mrb[19].mxu0 }
 0x314   :  { %v756_v42 = vadd.f32 %v694_v60, %v1016_v3  ;;  %v697_v55 = vadd.f32 %v803_v26, %v696_v44 }
 0x315   :  { %774 = vst.msk [vmem:[%s1595_s8 + $0x10] sm:$0xff] %vm78_vm0, %v758_v15  ;;  %v759_v58 = vadd.f32 %v705_v31, %v1042_v13 }
 0x316   :  { %772 = vst.msk [vmem:[%s1595_s8] sm:$0xff] %vm78_vm0, %v756_v42  ;;  %v757_v14 = vadd.f32 %v697_v55, %v1029_v8 }
 0x317   :  { %775 = vst.msk [vmem:[%s1595_s8 + $0x18] sm:$0xff] %vm78_vm0, %v759_v58 }
 0x318   :  { %773 = vst.msk [vmem:[%s1595_s8 + $0x8] sm:$0xff] %vm78_vm0, %v757_v14 }
 0x319   :  { %v872_v3 = vpop.f32.mrb[0].mxu1 }
 0x31a   :  { %v718_v7 = vadd.f32 %v872_v3, %v803_v26  ;;  %v709_v13 = vpop.f32.mrb[1].mxu1 }
 0x31b   :  { %v710_v6 = vadd.f32 %v803_v26, %v709_v13  ;;  %v873_v18 = vpop.f32.mrb[2].mxu1 }
 0x31c   :  { %v762_v63 = vadd.f32 %v718_v7, %v1077_v27  ;;  %v721_v20 = vadd.f32 %v873_v18, %v803_v26  ;;  %v712_v22 = vpop.f32.mrb[3].mxu1 }
 0x31d   :  { %v760_v8 = vadd.f32 %v710_v6, %v1057_v19  ;;  %v713_v16 = vadd.f32 %v803_v26, %v712_v22 }
 0x31e   :  { %778 = vst.msk [vmem:[%s1595_s8 + $0x30] sm:$0xff] %vm78_vm0, %v762_v63  ;;  %v763_v25 = vadd.f32 %v721_v20, %v1081_v29 }
 0x31f   :  { %776 = vst.msk [vmem:[%s1595_s8 + $0x20] sm:$0xff] %vm78_vm0, %v760_v8  ;;  %v761_v46 = vadd.f32 %v713_v16, %v1061_v21 }
 0x320   :  { %779 = vst.msk [vmem:[%s1595_s8 + $0x38] sm:$0xff] %vm78_vm0, %v763_v25 }
 0x321   :  { %777 = vst.msk [vmem:[%s1595_s8 + $0x28] sm:$0xff] %vm78_vm0, %v761_v46 }
 0x327   :  { %v876_v19 = vpop.f32.mrb[4].mxu1 }
 0x328   :  { %v734_v27 = vadd.f32 %v876_v19, %v803_v26  ;;  %v725_v29 = vpop.f32.mrb[5].mxu1 }
 0x329   :  { %v726_v33 = vadd.f32 %v803_v26, %v725_v29  ;;  %v877_v34 = vpop.f32.mrb[6].mxu1 }
 0x32a   :  { %v766_v36 = vadd.f32 %v734_v27, %v1117_v43  ;;  %v737_v56 = vadd.f32 %v877_v34, %v803_v26  ;;  %v728_v38 = vpop.f32.mrb[7].mxu1 }
 0x32b   :  { %v764_v21 = vadd.f32 %v726_v33, %v1097_v35  ;;  %v729_v30 = vadd.f32 %v803_v26, %v728_v38 }
 0x32c   :  { %782 = vst.msk [vmem:[%s1595_s8 + $0x50] sm:$0xff] %vm78_vm0, %v766_v36  ;;  %v767_v41 = vadd.f32 %v737_v56, %v1121_v45 }
 0x32d   :  { %780 = vst.msk [vmem:[%s1595_s8 + $0x40] sm:$0xff] %vm78_vm0, %v764_v21  ;;  %v765_v62 = vadd.f32 %v729_v30, %v1101_v37 }
 0x32e   :  { %783 = vst.msk [vmem:[%s1595_s8 + $0x58] sm:$0xff] %vm78_vm0, %v767_v41 }
 0x32f   :  { %781 = vst.msk [vmem:[%s1595_s8 + $0x48] sm:$0xff] %vm78_vm0, %v765_v62  ;;  %v880_v35 = vpop.f32.mrb[8].mxu1 }
 0x330   :  { %v750_v43 = vadd.f32 %v880_v35, %v803_v26  ;;  %v741_v45 = vpop.f32.mrb[9].mxu1 }
 0x331   :  { %v742_v17 = vadd.f32 %v803_v26, %v741_v45  ;;  %v881_v11 = vpop.f32.mrb[10].mxu1 }
 0x332   :  { %v770_v47 = vadd.f32 %v750_v43, %v1157_v59  ;;  %v753_v5 = vadd.f32 %v881_v11, %v803_v26  ;;  %v744_v49 = vpop.f32.mrb[11].mxu1 }
 0x333   :  { %v768_v37 = vadd.f32 %v742_v17, %v1137_v51  ;;  %v745_v54 = vadd.f32 %v803_v26, %v744_v49 }
 0x334   :  { %786 = vst.msk [vmem:[%s1595_s8 + $0x70] sm:$0xff] %vm78_vm0, %v770_v47  ;;  %v771_v57 = vadd.f32 %v753_v5, %v1161_v61 }
 0x335   :  { %784 = vst.msk [vmem:[%s1595_s8 + $0x60] sm:$0xff] %vm78_vm0, %v768_v37  ;;  %v769_v28 = vadd.f32 %v745_v54, %v1141_v53 }
 0x336   :  { %787 = vst.msk [vmem:[%s1595_s8 + $0x78] sm:$0xff] %vm78_vm0, %v771_v57 }
 0x337   :  { %785 = vst.msk [vmem:[%s1595_s8 + $0x68] sm:$0xff] %vm78_vm0, %v769_v28 }

// kernel: cross_attention_former_block.2
= control target key start
LH: loop header
LB: loop body
LE: loop exit
PB: predicated region body
PF: predicated region fallthrough
CT: control target
= control target key end

     0   :  { %vm64_vm0 = vcmask 261120   ;;  %vm796_vm1 = vcmask 64512   ;;  %vm1003_vm2 = vcmask 523264   ;;  %s4603_s21 = smov 112   ;;  %s4604_s15 = smov 104   ;;  %vm3346_vm3 = vcmask 130048   ;;  %s6688_s0 = inlined_call_operand.vmem [shape: f32[2,64,32], index: 0, kind: input, shape index: {}]   ;;  %s6689_s6 = inlined_call_operand.vmem [shape: f32[32,32], index: 6, kind: input, shape index: {}]   ;;  %s6690_s8 = inlined_call_operand.vmem [shape: f32[32,32], index: 8, kind: input, shape index: {}]   ;;  %s6691_s10 = inlined_call_operand.vmem [shape: f32[32,32], index: 10, kind: input, shape index: {}]   ;;  %s6692_s4 = inlined_call_operand.vmem [shape: f32[1,1,32], index: 4, kind: input, shape index: {}]   ;;  %s6693_s5 = inlined_call_operand.vmem [shape: f32[1,1,32], index: 5, kind: input, shape index: {}]   ;;  %s6694_s1 = inlined_call_operand.vmem [shape: f32[2,64,32], index: 1, kind: input, shape index: {}]   ;;  %s6695_s7 = inlined_call_operand.vmem [shape: f32[1,32], index: 7, kind: input, shape index: {}]   ;;  %s6696_s9 = inlined_call_operand.vmem [shape: f32[1,32], index: 9, kind: input, shape index: {}]   ;;  %s6697_s11 = inlined_call_operand.vmem [shape: f32[1,32], index: 11, kind: input, shape index: {}]   ;;  %s6698_s2 = inlined_call_operand.vmem [shape: f32[4,64,64], index: 2, kind: input, shape index: {}]   ;;  %s6699_s3 = inlined_call_operand.vmem [shape: f32[2,1,64], index: 3, kind: input, shape index: {}]   ;;  %s6700_s12 = inlined_call_operand.vmem [shape: f32[32,32], index: 12, kind: input, shape index: {}]   ;;  %s6701_s13 = inlined_call_operand.vmem [shape: f32[1,32], index: 13, kind: input, shape index: {}]   ;;  %s6702_s14 = inlined_call_operand.vmem [shape: f32[2,64,32], index: 14, kind: output, shape index: {}]  }
   0x1   :  { %v56_v0 = vld [vmem:[%s6688_s0 + $0x40] sm:$0xff]  ;;  %v58_v1 = vld [vmem:[%s6688_s0 + $0x50] sm:$0xff]  ;;  %v57_v2 = vld [vmem:[%s6688_s0 + $0x48] sm:$0xff]  ;;  %vm3363_vm4 = vcmask 195584  }
   0x2   :  { %v89_v3 = vsel %vm64_vm0, %v56_v0, 0.0  ;;  %v95_v4 = vsel %vm64_vm0, %v58_v1, 0.0  ;;  %v59_v5 = vld [vmem:[%s6688_s0 + $0x58] sm:$0xff]  ;;  %v92_v6 = vsel %vm64_vm0, %v57_v2, 0.0  ;;  %v60_v8 = vld [vmem:[%s6688_s0 + $0x60] sm:$0xff]  ;;  %v61_v9 = vld [vmem:[%s6688_s0 + $0x68] sm:$0xff] }
   0x3   :  { %90 = vadd.xlane.f32.xlu0 %v89_v3  ;;  %96 = vadd.xlane.f32.xlu1 %v95_v4  ;;  %v98_v7 = vsel %vm64_vm0, %v59_v5, 0.0  ;;  %v101_v10 = vsel %vm64_vm0, %v60_v8, 0.0  ;;  %v104_v11 = vsel %vm64_vm0, %v61_v9, 0.0  ;;  %v4710_v12 = vld [vmem:[%s6688_s0 + $0x70] sm:$0xff]  ;;  %v4715_v13 = vld [vmem:[%s6688_s0 + $0x78] sm:$0xff]  ;;  %v4724_v16 = vld [vmem:[%s6688_s0] sm:$0xff] }
   0x4   :  { %v107_v14 = vsel %vm64_vm0, %v4710_v12, 0.0  ;;  %v110_v15 = vsel %vm64_vm0, %v4715_v13, 0.0  ;;  %v4729_v17 = vld [vmem:[%s6688_s0 + $0x8] sm:$0xff]  ;;  %v65_v18 = vsel %vm64_vm0, %v4724_v16, 0.0  ;;  %v4738_v20 = vld [vmem:[%s6688_s0 + $0x10] sm:$0xff]  ;;  %v4743_v21 = vld [vmem:[%s6688_s0 + $0x18] sm:$0xff] }
   0x5   :  { %v68_v19 = vsel %vm64_vm0, %v4729_v17, 0.0  ;;  %v71_v22 = vsel %vm64_vm0, %v4738_v20, 0.0  ;;  %v74_v23 = vsel %vm64_vm0, %v4743_v21, 0.0  ;;  %v4752_v24 = vld [vmem:[%s6688_s0 + $0x20] sm:$0xff]  ;;  %v4757_v25 = vld [vmem:[%s6688_s0 + $0x28] sm:$0xff]  ;;  %v4766_v28 = vld [vmem:[%s6688_s0 + $0x30] sm:$0xff] }
   0x6   :  { %v77_v26 = vsel %vm64_vm0, %v4752_v24, 0.0  ;;  %v80_v27 = vsel %vm64_vm0, %v4757_v25, 0.0  ;;  %v4771_v29 = vld [vmem:[%s6688_s0 + $0x38] sm:$0xff]  ;;  %v83_v30 = vsel %vm64_vm0, %v4766_v28, 0.0 }
   0x7   :  { %93 = vadd.xlane.f32.xlu0 %v92_v6  ;;  %99 = vadd.xlane.f32.xlu1 %v98_v7  ;;  %v86_v31 = vsel %vm64_vm0, %v4771_v29, 0.0 }
   0xb   :  { %102 = vadd.xlane.f32.xlu0 %v101_v10  ;;  %105 = vadd.xlane.f32.xlu1 %v104_v11 }
   0xf   :  { %108 = vadd.xlane.f32.xlu0 %v107_v14  ;;  %111 = vadd.xlane.f32.xlu1 %v110_v15 }
  0x13   :  { %66 = vadd.xlane.f32.xlu0 %v65_v18  ;;  %69 = vadd.xlane.f32.xlu1 %v68_v19 }
  0x17   :  { %72 = vadd.xlane.f32.xlu0 %v71_v22  ;;  %75 = vadd.xlane.f32.xlu1 %v74_v23 }
  0x1b   :  { %78 = vadd.xlane.f32.xlu0 %v77_v26  ;;  %81 = vadd.xlane.f32.xlu1 %v80_v27 }
  0x1f   :  { %84 = vadd.xlane.f32.xlu0 %v83_v30  ;;  %87 = vadd.xlane.f32.xlu1 %v86_v31 }
  0x90   :  { %v91_v32 = vpop.xlane.xlu0 %90  ;;  %v97_v33 = vpop.xlane.xlu1 %96 }
  0x91   :  { %v122_v34 = vmul.f32 0.03125, %v91_v32  ;;  %v124_v35 = vmul.f32 0.03125, %v97_v33 }
  0x93   :  { %v4777_v36 = vsub.f32 %v56_v0, %v122_v34  ;;  %v4779_v37 = vsub.f32 %v58_v1, %v124_v35 }
  0x94   :  { %v94_v38 = vpop.xlane.xlu0 %93  ;;  %v100_v39 = vpop.xlane.xlu1 %99 }
  0x95   :  { %v123_v40 = vmul.f32 0.03125, %v94_v38  ;;  %v125_v41 = vmul.f32 0.03125, %v100_v39  ;;  %v154_v42 = vmul.f32 %v4777_v36, %v4777_v36  ;;  %v156_v43 = vmul.f32 %v4779_v37, %v4779_v37 }
  0x97   :  { %v4785_v44 = vsub.f32 %v57_v2, %v123_v40  ;;  %v4787_v45 = vsub.f32 %v59_v5, %v125_v41  ;;  %v186_v46 = vsel %vm64_vm0, %v154_v42, 0.0  ;;  %v192_v49 = vsel %vm64_vm0, %v156_v43, 0.0 }
  0x98   :  { %v103_v47 = vpop.xlane.xlu0 %102  ;;  %187 = vadd.xlane.f32.xlu0 %v186_v46  ;;  %v106_v48 = vpop.xlane.xlu1 %105 }
  0x99   :  { %v126_v50 = vmul.f32 0.03125, %v103_v47  ;;  %v127_v51 = vmul.f32 0.03125, %v106_v48  ;;  %v155_v52 = vmul.f32 %v4785_v44, %v4785_v44  ;;  %v157_v53 = vmul.f32 %v4787_v45, %v4787_v45 }
  0x9b   :  { %v4795_v54 = vsub.f32 %v60_v8, %v126_v50  ;;  %v4797_v55 = vsub.f32 %v61_v9, %v127_v51  ;;  %v189_v56 = vsel %vm64_vm0, %v155_v52, 0.0  ;;  %v195_v59 = vsel %vm64_vm0, %v157_v53, 0.0  ;;  %v345_v53 = vld [vmem:[%s6689_s6 + $0x8] sm:$0xff] }
  0x9c   :  { %v109_v57 = vpop.xlane.xlu0 %108  ;;  %190 = vadd.xlane.f32.xlu1 %v189_v56  ;;  %193 = vadd.xlane.f32.xlu0 %v192_v49  ;;  %v112_v58 = vpop.xlane.xlu1 %111 }
  0x9d   :  { %v128_v60 = vmul.f32 0.03125, %v109_v57  ;;  %v129_v61 = vmul.f32 0.03125, %v112_v58  ;;  %v158_v62 = vmul.f32 %v4795_v54, %v4795_v54  ;;  %v159_v63 = vmul.f32 %v4797_v55, %v4797_v55  ;;  %v346_v57 = vld [vmem:[%s6689_s6 + $0x10] sm:$0xff]  ;;  %v347_v58 = vld [vmem:[%s6689_s6 + $0x18] sm:$0xff] }
  0x9f   :  { %v4806_v0 = vsub.f32 %v4710_v12, %v128_v60  ;;  %v4809_v1 = vsub.f32 %v4715_v13, %v129_v61  ;;  %v198_v2 = vsel %vm64_vm0, %v158_v62, 0.0  ;;  %v201_v4 = vsel %vm64_vm0, %v159_v63, 0.0  ;;  %v486_v60 = vld [vmem:[%s6690_s8] sm:$0xff]  ;;  %v487_v61 = vld [vmem:[%s6690_s8 + $0x8] sm:$0xff] }
  0xa0   :  { %196 = vadd.xlane.f32.xlu1 %v195_v59  ;;  %199 = vadd.xlane.f32.xlu0 %v198_v2  ;;  %v67_v3 = vpop.xlane.xlu0 %66  ;;  %v70_v5 = vpop.xlane.xlu1 %69  ;;  %v349_v59 = vpack.c.bf16 %v347_v58, %v346_v57  ;;  %v4885_v62 = vpack.c.bf16 %v487_v61, %v486_v60  ;;  %v620_v63 = vld [vmem:[%s6691_s10] sm:$0xff]  ;;  %v621_v2 = vld [vmem:[%s6691_s10 + $0x8] sm:$0xff] }
  0xa1   :  { %v114_v6 = vmul.f32 0.03125, %v67_v3  ;;  %v115_v7 = vmul.f32 0.03125, %v70_v5  ;;  %v160_v8 = vmul.f32 %v4806_v0, %v4806_v0  ;;  %v161_v9 = vmul.f32 %v4809_v1, %v4809_v1 }
  0xa2   :  { %v4894_v3 = vpack.c.bf16 %v621_v2, %v620_v63 }
  0xa3   :  { %v4818_v10 = vsub.f32 %v4724_v16, %v114_v6  ;;  %v4821_v11 = vsub.f32 %v4729_v17, %v115_v7  ;;  %v204_v12 = vsel %vm64_vm0, %v160_v8, 0.0  ;;  %v207_v14 = vsel %vm64_vm0, %v161_v9, 0.0 }
  0xa4   :  { %202 = vadd.xlane.f32.xlu1 %v201_v4  ;;  %205 = vadd.xlane.f32.xlu0 %v204_v12  ;;  %v73_v13 = vpop.xlane.xlu0 %72  ;;  %v76_v15 = vpop.xlane.xlu1 %75 }
  0xa5   :  { %v116_v18 = vmul.f32 0.03125, %v73_v13  ;;  %v117_v19 = vmul.f32 0.03125, %v76_v15  ;;  %v146_v22 = vmul.f32 %v4818_v10, %v4818_v10  ;;  %v147_v16 = vmul.f32 %v4821_v11, %v4821_v11 }
  0xa7   :  { %v4830_v23 = vsub.f32 %v4738_v20, %v116_v18  ;;  %v4833_v17 = vsub.f32 %v4743_v21, %v117_v19  ;;  %v162_v26 = vsel %vm64_vm0, %v146_v22, 0.0  ;;  %v165_v30 = vsel %vm64_vm0, %v147_v16, 0.0 }
  0xa8   :  { %208 = vadd.xlane.f32.xlu1 %v207_v14  ;;  %163 = vadd.xlane.f32.xlu0 %v162_v26  ;;  %v79_v27 = vpop.xlane.xlu0 %78  ;;  %v82_v31 = vpop.xlane.xlu1 %81 }
  0xa9   :  { %v118_v32 = vmul.f32 0.03125, %v79_v27  ;;  %v119_v33 = vmul.f32 0.03125, %v82_v31  ;;  %v148_v34 = vmul.f32 %v4830_v23, %v4830_v23  ;;  %v149_v20 = vmul.f32 %v4833_v17, %v4833_v17 }
  0xab   :  { %v4842_v35 = vsub.f32 %v4752_v24, %v118_v32  ;;  %v4845_v21 = vsub.f32 %v4757_v25, %v119_v33  ;;  %v168_v38 = vsel %vm64_vm0, %v148_v34, 0.0  ;;  %v171_v40 = vsel %vm64_vm0, %v149_v20, 0.0 }
  0xac   :  { %166 = vadd.xlane.f32.xlu1 %v165_v30  ;;  %169 = vadd.xlane.f32.xlu0 %v168_v38  ;;  %v85_v39 = vpop.xlane.xlu0 %84  ;;  %v88_v41 = vpop.xlane.xlu1 %87 }
  0xad   :  { %v120_v42 = vmul.f32 0.03125, %v85_v39  ;;  %v121_v43 = vmul.f32 0.03125, %v88_v41  ;;  %v150_v46 = vmul.f32 %v4842_v35, %v4842_v35  ;;  %v151_v24 = vmul.f32 %v4845_v21, %v4845_v21 }
  0xaf   :  { %v4854_v47 = vsub.f32 %v4766_v28, %v120_v42  ;;  %v4857_v25 = vsub.f32 %v4771_v29, %v121_v43  ;;  %v174_v48 = vsel %vm64_vm0, %v150_v46, 0.0  ;;  %v177_v49 = vsel %vm64_vm0, %v151_v24, 0.0  ;;  %v344_v29 = vld [vmem:[%s6689_s6] sm:$0xff] }
  0xb0   :  { %172 = vadd.xlane.f32.xlu1 %v171_v40  ;;  %175 = vadd.xlane.f32.xlu0 %v174_v48  ;;  %v348_v56 = vpack.c.bf16 %v345_v53, %v344_v29  ;;  %v4901_v43 = vld [vmem:[%s6692_s4] ss:$0 sm:$0xff] }
  0xb1   :  { %v152_v50 = vmul.f32 %v4854_v47, %v4854_v47  ;;  %v153_v51 = vmul.f32 %v4857_v25, %v4857_v25  ;;  %v4908_v53 = vld [vmem:[%s6693_s5] ss:$0 sm:$0xff] }
  0xb2   :  { %4150 = vmatprep.subr.bf16.mxu1 %v348_v56  ;;  %3814 = vmatprep.subr.bf16.mxu0 %v348_v56 }
  0xb3   :  { %v180_v52 = vsel %vm64_vm0, %v152_v50, 0.0  ;;  %v183_v28 = vsel %vm64_vm0, %v153_v51, 0.0  ;;  %4152 = vmatpush3.bf16.msra.mxu1 %v348_v56  ;;  %3815 = vmatpush3.bf16.msra.mxu0 %v348_v56 }
  0xb4   :  { %178 = vadd.xlane.f32.xlu1 %v177_v49  ;;  %181 = vadd.xlane.f32.xlu0 %v180_v52 }
  0xb5   :  { %4151 = vmatprep.subr.bf16.mxu1 %v349_v59  ;;  %3816 = vmatprep.subr.bf16.mxu0 %v349_v59 }
  0xb7   :  { %4153 = vmatpush3.bf16.msra.mxu1 %v349_v59  ;;  %3817 = vmatpush3.bf16.msra.mxu0 %v349_v59 }
  0xb8   :  { %184 = vadd.xlane.f32.xlu1 %v183_v28  ;;  %3834 = vmatprep.subr.bf16.mxu1 %v4885_v62 }
  0xb9   :  { %3854 = vmatprep.subr.bf16.mxu0 %v4894_v3 }
 0x125   :  { %v188_v4 = vpop.xlane.xlu0 %187 }
 0x126   :  { %v218_v5 = vmul.f32 0.03125, %v188_v4 }
 0x128   :  { %v234_v6 = vadd.f32 1e-05, %v218_v5 }
 0x129   :  { %v191_v7 = vpop.xlane.xlu1 %190  ;;  %v194_v8 = vpop.xlane.xlu0 %193 }
 0x12a   :  { %4312 = vrsqrt.f32 %v234_v6  ;;  %v219_v9 = vmul.f32 0.03125, %v191_v7  ;;  %v220_v12 = vmul.f32 0.03125, %v194_v8 }
 0x12c   :  { %v235_v13 = vadd.f32 1e-05, %v219_v9  ;;  %v236_v14 = vadd.f32 1e-05, %v220_v12 }
 0x12d   :  { %v197_v15 = vpop.xlane.xlu1 %196  ;;  %v200_v18 = vpop.xlane.xlu0 %199 }
 0x12e   :  { %4314 = vrsqrt.f32 %v235_v13  ;;  %v221_v19 = vmul.f32 0.03125, %v197_v15  ;;  %v222_v22 = vmul.f32 0.03125, %v200_v18  ;;  %v488_v18 = vld [vmem:[%s6690_s8 + $0x10] sm:$0xff] }
 0x12f   :  { %4316 = vrsqrt.f32 %v236_v14 }
 0x130   :  { %v237_v16 = vadd.f32 1e-05, %v221_v19  ;;  %v238_v26 = vadd.f32 1e-05, %v222_v22 }
 0x131   :  { %v203_v27 = vpop.xlane.xlu1 %202  ;;  %v206_v30 = vpop.xlane.xlu0 %205 }
 0x132   :  { %4318 = vrsqrt.f32 %v237_v16  ;;  %v223_v31 = vmul.f32 0.03125, %v203_v27  ;;  %v224_v32 = vmul.f32 0.03125, %v206_v30 }
 0x133   :  { %4320 = vrsqrt.f32 %v238_v26 }
 0x134   :  { %v4313_v33 = vpop.eup %4312  ;;  %v239_v34 = vadd.f32 1e-05, %v223_v31  ;;  %v240_v20 = vadd.f32 1e-05, %v224_v32 }
 0x135   :  { %v209_v38 = vpop.xlane.xlu1 %208  ;;  %v164_v39 = vpop.xlane.xlu0 %163  ;;  %v266_v40 = vmul.f32 %v4313_v33, %v4777_v36 }
 0x136   :  { %4322 = vrsqrt.f32 %v239_v34  ;;  %v225_v41 = vmul.f32 0.03125, %v209_v38  ;;  %v210_v42 = vmul.f32 0.03125, %v164_v39 }
 0x137   :  { %4324 = vrsqrt.f32 %v240_v20  ;;  %v289_v28 = vmul.f32 %v4901_v43, %v266_v40 }
 0x138   :  { %v4315_v46 = vpop.eup %4314  ;;  %v241_v24 = vadd.f32 1e-05, %v225_v41  ;;  %v226_v48 = vadd.f32 1e-05, %v210_v42 }
 0x139   :  { %v4317_v49 = vpop.eup %4316  ;;  %v167_v50 = vpop.xlane.xlu1 %166  ;;  %v267_v52 = vmul.f32 %v4315_v46, %v4785_v44  ;;  %v312_v2 = vadd.f32 %v4908_v53, %v289_v28  ;;  %v320_v28 = vld [vmem:[%s6694_s1] sm:$0xff] }
 0x13a   :  { %v170_v51 = vpop.xlane.xlu0 %169  ;;  %4326 = vrsqrt.f32 %v241_v24  ;;  %v211_v36 = vmul.f32 0.03125, %v167_v50  ;;  %v268_v56 = vmul.f32 %v4317_v49, %v4779_v37 }
 0x13b   :  { %v212_v29 = vmul.f32 0.03125, %v170_v51  ;;  %4328 = vrsqrt.f32 %v226_v48  ;;  %v290_v57 = vmul.f32 %v4901_v43, %v267_v52 }
 0x13c   :  { %v4319_v58 = vpop.eup %4318  ;;  %v227_v59 = vadd.f32 1e-05, %v211_v36  ;;  %v291_v6 = vmul.f32 %v4901_v43, %v268_v56 }
 0x13d   :  { %v228_v60 = vadd.f32 1e-05, %v212_v29  ;;  %v4321_v61 = vpop.eup %4320  ;;  %v173_v44 = vpop.xlane.xlu1 %172  ;;  %v313_v4 = vadd.f32 %v4908_v53, %v290_v57  ;;  %v269_v5 = vmul.f32 %v4319_v58, %v4787_v45  ;;  %v489_v45 = vld [vmem:[%s6690_s8 + $0x18] sm:$0xff]  ;;  %s4607_s8 = smov 24  }
 0x13e   :  { %v176_v63 = vpop.xlane.xlu0 %175  ;;  %4330 = vrsqrt.f32 %v227_v59  ;;  %v213_v7 = vmul.f32 0.03125, %v173_v44  ;;  %v270_v12 = vmul.f32 %v4321_v61, %v4795_v54  ;;  %v314_v26 = vadd.f32 %v4908_v53, %v291_v6 }
 0x13f   :  { %v214_v37 = vmul.f32 0.03125, %v176_v63  ;;  %4332 = vrsqrt.f32 %v228_v60  ;;  %v340_v8 = vpack.c.bf16 %v313_v4, %v312_v2  ;;  %v292_v9 = vmul.f32 %v4901_v43, %v269_v5 }
 0x140   :  { %v4323_v13 = vpop.eup %4322  ;;  %v229_v14 = vadd.f32 1e-05, %v213_v7  ;;  %v293_v30 = vmul.f32 %v4901_v43, %v270_v12  ;;  %v491_v38 = vpack.c.bf16 %v489_v45, %v488_v18  ;;  %v323_v7 = vld [vmem:[%s6694_s1 + $0x18] sm:$0xff]  ;;  %v325_v12 = vld [vmem:[%s6694_s1 + $0x28] sm:$0xff] }
 0x141   :  { %v230_v15 = vadd.f32 1e-05, %v214_v37  ;;  %v4325_v19 = vpop.eup %4324  ;;  %v179_v22 = vpop.xlane.xlu1 %178  ;;  %3826 = vmatprep.mubr.msk.bf16.mxu1 %vm64_vm0, %v340_v8  ;;  %v315_v54 = vadd.f32 %v4908_v53, %v292_v9  ;;  %v271_v27 = vmul.f32 %v4323_v13, %v4797_v55 }
 0x142   :  { %v182_v16 = vpop.xlane.xlu0 %181  ;;  %4334 = vrsqrt.f32 %v229_v14  ;;  %v215_v31 = vmul.f32 0.03125, %v179_v22  ;;  %v272_v33 = vmul.f32 %v4325_v19, %v4806_v0  ;;  %v316_v55 = vadd.f32 %v4908_v53, %v293_v30 }
 0x143   :  { %v216_v32 = vmul.f32 0.03125, %v182_v16  ;;  %4336 = vrsqrt.f32 %v230_v15  ;;  %v341_v34 = vpack.c.bf16 %v315_v54, %v314_v26  ;;  %v294_v20 = vmul.f32 %v4901_v43, %v271_v27  ;;  %v622_v15 = vld [vmem:[%s6691_s10 + $0x10] sm:$0xff] }
 0x144   :  { %v4327_v39 = vpop.eup %4326  ;;  %v231_v40 = vadd.f32 1e-05, %v215_v31  ;;  %v295_v0 = vmul.f32 %v4901_v43, %v272_v33 }
 0x145   :  { %v232_v41 = vadd.f32 1e-05, %v216_v32  ;;  %v4329_v42 = vpop.eup %4328  ;;  %v185_v46 = vpop.xlane.xlu1 %184  ;;  %3827 = vmatmul.mubr.msk.bf16.vlgmr.msra.gmra.mrb[0].mxu1 %vm64_vm0, %v341_v34  ;;  %v317_v24 = vadd.f32 %v4908_v53, %v294_v20  ;;  %v273_v48 = vmul.f32 %v4327_v39, %v4809_v1  ;;  %v321_v1 = vld [vmem:[%s6694_s1 + $0x8] sm:$0xff] }
 0x146   :  { %4338 = vrsqrt.f32 %v231_v40  ;;  %v217_v49 = vmul.f32 0.03125, %v185_v46  ;;  %3835 = vmatpush3.bf16.msra.mxu1 %v4885_v62  ;;  %v258_v50 = vmul.f32 %v4329_v42, %v4818_v10  ;;  %v318_v10 = vadd.f32 %v4908_v53, %v295_v0  ;;  %v333_v0 = vld [vmem:[%s6694_s1 + $0x68] sm:$0xff] }
 0x147   :  { %4340 = vrsqrt.f32 %v232_v41  ;;  %v342_v51 = vpack.c.bf16 %v317_v24, %v316_v55  ;;  %v296_v52 = vmul.f32 %v4901_v43, %v273_v48  ;;  %3836 = vmatprep.subr.bf16.mxu1 %v491_v38  ;;  %v478_v59 = vpack.c.bf16 %v321_v1, %v320_v28  ;;  %v329_v41 = vld [vmem:[%s6694_s1 + $0x48] sm:$0xff]  ;;  %v331_v48 = vld [vmem:[%s6694_s1 + $0x58] sm:$0xff]  ;;  %v5044_v1 = vld [vmem:[%s6695_s7] ss:$0 sm:$0xff] }
 0x148   :  { %v4331_v36 = vpop.eup %4330  ;;  %v233_v29 = vadd.f32 1e-05, %v217_v49  ;;  %v281_v58 = vmul.f32 %v4901_v43, %v258_v50 }
 0x149   :  { %v4333_v56 = vpop.eup %4332  ;;  %3830 = vmatprep.mubr.msk.bf16.mxu1 %vm64_vm0, %v342_v51  ;;  %v319_v62 = vadd.f32 %v4908_v53, %v296_v52  ;;  %v259_v57 = vmul.f32 %v4331_v36, %v4821_v11  ;;  %v334_v51 = vld [vmem:[%s6694_s1 + $0x70] sm:$0xff]  ;;  %v335_v52 = vld [vmem:[%s6694_s1 + $0x78] sm:$0xff] }
 0x14a   :  { %4342 = vrsqrt.f32 %v233_v29  ;;  %3837 = vmatpush3.bf16.msra.mxu1 %v491_v38  ;;  %v260_v60 = vmul.f32 %v4333_v56, %v4830_v23  ;;  %v304_v4 = vadd.f32 %v4908_v53, %v281_v58  ;;  %v322_v23 = vld [vmem:[%s6694_s1 + $0x10] sm:$0xff]  ;;  %v327_v38 = vld [vmem:[%s6694_s1 + $0x38] sm:$0xff]  ;;  %v485_v28 = vpack.c.bf16 %v335_v52, %v334_v51 }
 0x14b   :  { %v343_v61 = vpack.c.bf16 %v319_v62, %v318_v10  ;;  %v282_v44 = vmul.f32 %v4901_v43, %v259_v57  ;;  %v479_v22 = vpack.c.bf16 %v323_v7, %v322_v23 }
 0x14c   :  { %v4335_v63 = vpop.eup %4334  ;;  %v283_v6 = vmul.f32 %v4901_v43, %v260_v60 }
 0x14d   :  { %v4337_v2 = vpop.eup %4336  ;;  %3831 = vmatmul.mubr.msk.bf16.gmra.mrb[4].mxu1 %vm64_vm0, %v343_v61  ;;  %v305_v5 = vadd.f32 %v4908_v53, %v282_v44  ;;  %v261_v11 = vmul.f32 %v4335_v63, %v4833_v17  ;;  %v324_v17 = vld [vmem:[%s6694_s1 + $0x20] sm:$0xff] }
 0x14e   :  { %3838 = vmatprep.mubr.msk.bf16.mxu1 %vm64_vm0, %v478_v59  ;;  %v262_v37 = vmul.f32 %v4337_v2, %v4842_v35  ;;  %v623_v35 = vld [vmem:[%s6691_s10 + $0x18] sm:$0xff]  ;;  %v306_v45 = vadd.f32 %v4908_v53, %v283_v6  ;;  %v480_v26 = vpack.c.bf16 %v325_v12, %v324_v17 }
 0x14f   :  { %v336_v8 = vpack.c.bf16 %v305_v5, %v304_v4  ;;  %v284_v9 = vmul.f32 %v4901_v43, %v261_v11  ;;  %v625_v31 = vpack.c.bf16 %v623_v35, %v622_v15 }
 0x150   :  { %v4339_v13 = vpop.eup %4338  ;;  %v285_v14 = vmul.f32 %v4901_v43, %v262_v37 }
 0x151   :  { %v4341_v18 = vpop.eup %4340  ;;  %3818 = vmatprep.mubr.msk.bf16.mxu0 %vm64_vm0, %v336_v8  ;;  %v307_v19 = vadd.f32 %v4908_v53, %v284_v9  ;;  %v263_v16 = vmul.f32 %v4339_v13, %v4845_v21 }
 0x152   :  { %v264_v54 = vmul.f32 %v4341_v18, %v4854_v47  ;;  %v308_v33 = vadd.f32 %v4908_v53, %v285_v14  ;;  %v326_v47 = vld [vmem:[%s6694_s1 + $0x30] sm:$0xff] }
 0x153   :  { %v337_v27 = vpack.c.bf16 %v307_v19, %v306_v45  ;;  %v286_v30 = vmul.f32 %v4901_v43, %v263_v16  ;;  %v481_v55 = vpack.c.bf16 %v327_v38, %v326_v47  ;;  %v5067_v19 = vld [vmem:[%s6696_s9] ss:$0 sm:$0xff]  ;;  %s4602_s9 = smov 120  }
 0x154   :  { %v4343_v32 = vpop.eup %4342  ;;  %v287_v21 = vmul.f32 %v4901_v43, %v264_v54 }
 0x155   :  { %3819 = vmatmul.mubr.msk.bf16.vlgmr.msra.gmra.mrb[0].mxu0 %vm64_vm0, %v337_v27  ;;  %3839 = vmatmul.mubr.msk.bf16.vlgmr.msra.gmra.mrb[8].mxu1 %vm64_vm0, %v479_v22  ;;  %v309_v34 = vadd.f32 %v4908_v53, %v286_v30  ;;  %v265_v20 = vmul.f32 %v4343_v32, %v4857_v25  ;;  %v328_v25 = vld [vmem:[%s6694_s1 + $0x40] sm:$0xff] }
 0x156   :  { %3842 = vmatprep.mubr.msk.bf16.mxu1 %vm64_vm0, %v480_v26  ;;  %3855 = vmatpush3.bf16.msra.mxu0 %v4894_v3  ;;  %v310_v42 = vadd.f32 %v4908_v53, %v287_v21  ;;  %v482_v3 = vpack.c.bf16 %v329_v41, %v328_v25 }
 0x157   :  { %v338_v39 = vpack.c.bf16 %v309_v34, %v308_v33  ;;  %v288_v40 = vmul.f32 %v4901_v43, %v265_v20  ;;  %3856 = vmatprep.subr.bf16.mxu0 %v625_v31  ;;  %v330_v43 = vld [vmem:[%s6694_s1 + $0x50] sm:$0xff] }
 0x158   :  { %v483_v49 = vpack.c.bf16 %v331_v48, %v330_v43 }
 0x159   :  { %3822 = vmatprep.mubr.msk.bf16.mxu0 %vm64_vm0, %v338_v39  ;;  %v311_v46 = vadd.f32 %v4908_v53, %v288_v40  ;;  %v332_v53 = vld [vmem:[%s6694_s1 + $0x60] sm:$0xff]  ;;  %s4606_s1 = smov 16  }
 0x15a   :  { %3857 = vmatpush3.bf16.msra.mxu0 %v625_v31  ;;  %v484_v50 = vpack.c.bf16 %v333_v0, %v332_v53 }
 0x15b   :  { %v339_v24 = vpack.c.bf16 %v311_v46, %v310_v42 }
 0x15d   :  { %3823 = vmatmul.mubr.msk.bf16.gmra.mrb[4].mxu0 %vm64_vm0, %v339_v24  ;;  %3843 = vmatmul.mubr.msk.bf16.gmra.mrb[12].mxu1 %vm64_vm0, %v481_v55 }
 0x15e   :  { %3846 = vmatprep.mubr.msk.bf16.mxu1 %vm64_vm0, %v482_v3  ;;  %3858 = vmatprep.mubr.msk.bf16.mxu0 %vm64_vm0, %v478_v59 }
 0x165   :  { %3847 = vmatmul.mubr.msk.bf16.gmra.mrb[16].mxu1 %vm64_vm0, %v483_v49  ;;  %3859 = vmatmul.mubr.msk.bf16.vlgmr.msra.gmra.mrb[8].mxu0 %vm64_vm0, %v479_v22 }
 0x166   :  { %3850 = vmatprep.mubr.msk.bf16.mxu1 %vm64_vm0, %v484_v50  ;;  %3862 = vmatprep.mubr.msk.bf16.mxu0 %vm64_vm0, %v480_v26 }
 0x16d   :  { %3851 = vmatmul.mubr.msk.bf16.gmra.mrb[20].mxu1 %vm64_vm0, %v485_v28  ;;  %3863 = vmatmul.mubr.msk.bf16.gmra.mrb[12].mxu0 %vm64_vm0, %v481_v55 }
 0x16e   :  { %3866 = vmatprep.mubr.msk.bf16.mxu0 %vm64_vm0, %v482_v3 }
 0x175   :  { %3867 = vmatmul.mubr.msk.bf16.gmra.mrb[16].mxu0 %vm64_vm0, %v483_v49 }
 0x176   :  { %3870 = vmatprep.mubr.msk.bf16.mxu0 %vm64_vm0, %v484_v50 }
 0x17d   :  { %3871 = vmatmul.mubr.msk.bf16.gmra.mrb[20].mxu0 %vm64_vm0, %v485_v28 }
 0x218   :  { %v3828_v36 = vpop.f32.mrb[0].mxu1 }
 0x219   :  { %v456_v29 = vadd.f32 %v3828_v36, %v5044_v1  ;;  %v447_v56 = vpop.f32.mrb[1].mxu1 }
 0x21a   :  { %v448_v10 = vadd.f32 %v5044_v1, %v447_v56  ;;  %v3829_v62 = vpop.f32.mrb[2].mxu1 }
 0x21b   :  { %v459_v57 = vadd.f32 %v3829_v62, %v5044_v1  ;;  %v450_v58 = vpop.f32.mrb[3].mxu1  ;;  %v774_v60 = vmul.f32 0.35355338, %v456_v29 }
 0x21c   :  { %v451_v59 = vadd.f32 %v5044_v1, %v450_v58  ;;  %v772_v44 = vmul.f32 0.35355338, %v448_v10 }
 0x21d   :  { %v775_v61 = vmul.f32 0.35355338, %v459_v57 }
 0x21e   :  { %v773_v63 = vmul.f32 0.35355338, %v451_v59 }
 0x21f   :  { %v5050_v2 = vpack.c.bf16 %v775_v61, %v774_v60 }
 0x220   :  { %v5052_v4 = vpack.c.bf16 %v773_v63, %v772_v44  ;;  %v3832_v5 = vpop.f32.mrb[4].mxu1 }
 0x221   :  { %v472_v11 = vadd.f32 %v3832_v5, %v5044_v1  ;;  %v463_v6 = vpop.f32.mrb[5].mxu1 }
 0x222   :  { %v464_v23 = vadd.f32 %v5044_v1, %v463_v6  ;;  %v3833_v7 = vpop.f32.mrb[6].mxu1  ;;  %3898 = vmatprep.mubr.msk.bf16.mxu0 %vm796_vm1, %v5052_v4 }
 0x223   :  { %v475_v37 = vadd.f32 %v3833_v7, %v5044_v1  ;;  %v466_v8 = vpop.f32.mrb[7].mxu1  ;;  %v778_v17 = vmul.f32 0.35355338, %v472_v11 }
 0x224   :  { %v467_v9 = vadd.f32 %v5044_v1, %v466_v8  ;;  %v776_v13 = vmul.f32 0.35355338, %v464_v23 }
 0x225   :  { %v779_v12 = vmul.f32 0.35355338, %v475_v37 }
 0x226   :  { %v777_v14 = vmul.f32 0.35355338, %v467_v9 }
 0x227   :  { %v5060_v15 = vpack.c.bf16 %v779_v12, %v778_v17 }
 0x228   :  { %v5062_v35 = vpack.c.bf16 %v777_v14, %v776_v13  ;;  %v3820_v18 = vpop.f32.mrb[0].mxu0  ;;  %v3840_v45 = vpop.f32.mrb[8].mxu1 }
 0x229   :  { %v424_v22 = vadd.f32 %v3820_v18, %v5044_v1  ;;  %v415_v16 = vpop.f32.mrb[1].mxu0  ;;  %v557_v26 = vpop.f32.mrb[9].mxu1  ;;  %v566_v31 = vadd.f32 %v3840_v45, %v5067_v19 }
 0x22a   :  { %v416_v54 = vadd.f32 %v5044_v1, %v415_v16  ;;  %v3821_v27 = vpop.f32.mrb[2].mxu0  ;;  %v3841_v30 = vpop.f32.mrb[10].mxu1  ;;  %v558_v21 = vadd.f32 %v5067_v19, %v557_v26 }
 0x22b   :  { %v427_v32 = vadd.f32 %v3821_v27, %v5044_v1  ;;  %v569_v33 = vadd.f32 %v3841_v30, %v5067_v19  ;;  %v418_v34 = vpop.f32.mrb[3].mxu0  ;;  %v560_v20 = vpop.f32.mrb[11].mxu1  ;;  %v766_v39 = vmul.f32 0.35355338, %v424_v22 }
 0x22c   :  { %v419_v47 = vadd.f32 %v5044_v1, %v418_v34  ;;  %v561_v38 = vadd.f32 %v5067_v19, %v560_v20  ;;  %v764_v41 = vmul.f32 0.35355338, %v416_v54 }
 0x22d   :  { %v767_v40 = vmul.f32 0.35355338, %v427_v32  ;;  %v5077_v25 = vpack.c.bf16 %v569_v33, %v566_v31 }
 0x22e   :  { %v765_v42 = vmul.f32 0.35355338, %v419_v47  ;;  %v5079_v46 = vpack.c.bf16 %v561_v38, %v558_v21 }
 0x22f   :  { %v5081_v55 = vpack.c.bf16 %v767_v40, %v766_v39  ;;  %1368 = vrot.lane.b32.xlu1 %v5077_v25, %s4602_s9  ;;  %v813_v7 = vsel %vm796_vm1, %v5077_v25, 0 }
 0x230   :  { %v5085_v3 = vpack.c.bf16 %v765_v42, %v764_v41  ;;  %1366 = vrot.lane.b32.xlu0 %v5079_v46, %s4602_s9  ;;  %v3824_v24 = vpop.f32.mrb[4].mxu0  ;;  %4154 = vmatprep.subr.msk.bf16.mxu1 %vm796_vm1, %v5079_v46  ;;  %v810_v43 = vsel %vm796_vm1, %v5079_v46, 0  ;;  %v3844_v48 = vpop.f32.mrb[12].mxu1  ;;  %v3562_v41 = vld [vmem:[%s6697_s11] ss:$0 sm:$0xff] }
 0x231   :  { %v440_v53 = vadd.f32 %v3824_v24, %v5044_v1  ;;  %v431_v0 = vpop.f32.mrb[5].mxu0  ;;  %3875 = vmatpush3.bf16.xpose.msra.mxu1 %v810_v43  ;;  %v582_v49 = vadd.f32 %v3844_v48, %v5067_v19  ;;  %v573_v50 = vpop.f32.mrb[13].mxu1 }
 0x232   :  { %v432_v51 = vadd.f32 %v5044_v1, %v431_v0  ;;  %v3825_v52 = vpop.f32.mrb[6].mxu0  ;;  %4155 = vmatprep.subr.msk.bf16.mxu1 %vm796_vm1, %v5077_v25  ;;  %3882 = vmatprep.mubr.msk.bf16.mxu1 %vm796_vm1, %v5085_v3  ;;  %v574_v28 = vadd.f32 %v5067_v19, %v573_v50  ;;  %v3845_v36 = vpop.f32.mrb[14].mxu1 }
 0x233   :  { %v443_v29 = vadd.f32 %v3825_v52, %v5044_v1  ;;  %v434_v56 = vpop.f32.mrb[7].mxu0  ;;  %v585_v10 = vadd.f32 %v3845_v36, %v5067_v19  ;;  %v576_v62 = vpop.f32.mrb[15].mxu1  ;;  %v770_v59 = vmul.f32 0.35355338, %v440_v53 }
 0x234   :  { %v435_v57 = vadd.f32 %v5044_v1, %v434_v56  ;;  %v577_v58 = vadd.f32 %v5067_v19, %v576_v62  ;;  %v768_v44 = vmul.f32 0.35355338, %v432_v51 }
 0x235   :  { %v771_v60 = vmul.f32 0.35355338, %v443_v29  ;;  %v5105_v61 = vpack.c.bf16 %v585_v10, %v582_v49 }
 0x236   :  { %v769_v63 = vmul.f32 0.35355338, %v435_v57  ;;  %v5107_v5 = vpack.c.bf16 %v577_v58, %v574_v28 }
 0x237   :  { %v5109_v11 = vpack.c.bf16 %v771_v60, %v770_v59  ;;  %v819_v38 = vsel %vm796_vm1, %v5105_v61, 0 }
 0x238   :  { %v5111_v6 = vpack.c.bf16 %v769_v63, %v768_v44  ;;  %v3848_v23 = vpop.f32.mrb[16].mxu1  ;;  %v3860_v37 = vpop.f32.mrb[8].mxu0  ;;  %v816_v22 = vsel %vm796_vm1, %v5107_v5, 0 }
 0x239   :  { %v598_v1 = vadd.f32 %v3848_v23, %v5067_v19  ;;  %v589_v8 = vpop.f32.mrb[17].mxu1  ;;  %3877 = vmatpush3.bf16.xpose.msra.mxu1 %v813_v7  ;;  %v676_v43 = vadd.f32 %v3860_v37, %v3562_v41  ;;  %v667_v48 = vpop.f32.mrb[9].mxu0 }
 0x23a   :  { %v590_v9 = vadd.f32 %v5067_v19, %v589_v8  ;;  %v3849_v17 = vpop.f32.mrb[18].mxu1  ;;  %4156 = vmatprep.subr.msk.bf16.mxu1 %vm796_vm1, %v5107_v5  ;;  %v668_v53 = vadd.f32 %v3562_v41, %v667_v48  ;;  %v3861_v0 = vpop.f32.mrb[10].mxu0 }
 0x23b   :  { %v601_v12 = vadd.f32 %v3849_v17, %v5067_v19  ;;  %v592_v13 = vpop.f32.mrb[19].mxu1  ;;  %v679_v49 = vadd.f32 %v3861_v0, %v3562_v41  ;;  %v670_v50 = vpop.f32.mrb[11].mxu0 }
 0x23c   :  { %v593_v14 = vadd.f32 %v5067_v19, %v592_v13  ;;  %v671_v51 = vadd.f32 %v3562_v41, %v670_v50 }
 0x23d   :  { %v5121_v18 = vpack.c.bf16 %v601_v12, %v598_v1  ;;  %v5173_v28 = vpack.c.bf16 %v679_v49, %v676_v43 }
 0x23e   :  { %v5123_v45 = vpack.c.bf16 %v593_v14, %v590_v9  ;;  %v5175_v56 = vpack.c.bf16 %v671_v51, %v668_v53 }
 0x23f   :  { %v902_v21 = vsel %vm796_vm1, %v5121_v18, 0 }
 0x240   :  { %4158 = vmatprep.subr.msk.bf16.mxu0 %vm796_vm1, %v5123_v45  ;;  %v899_v16 = vsel %vm796_vm1, %v5123_v45, 0  ;;  %v3852_v26 = vpop.f32.mrb[20].mxu1  ;;  %v3864_v52 = vpop.f32.mrb[12].mxu0 }
 0x241   :  { %3879 = vmatpush3.bf16.xpose.msra.mxu1 %v816_v22  ;;  %3891 = vmatpush3.bf16.xpose.msra.mxu0 %v899_v16  ;;  %v614_v54 = vadd.f32 %v3852_v26, %v5067_v19  ;;  %v605_v27 = vpop.f32.mrb[21].mxu1  ;;  %v692_v36 = vadd.f32 %v3864_v52, %v3562_v41  ;;  %v683_v29 = vpop.f32.mrb[13].mxu0 }
 0x242   :  { %4157 = vmatprep.subr.msk.bf16.mxu1 %vm796_vm1, %v5105_v61  ;;  %4159 = vmatprep.subr.msk.bf16.mxu0 %vm796_vm1, %v5121_v18  ;;  %v606_v30 = vadd.f32 %v5067_v19, %v605_v27  ;;  %v3853_v31 = vpop.f32.mrb[22].mxu1  ;;  %v684_v10 = vadd.f32 %v3562_v41, %v683_v29  ;;  %v3865_v62 = vpop.f32.mrb[14].mxu0  ;;  %v738_v29 = vld [vmem:[%s6698_s2 + $0x30] sm:$0xff] }
 0x243   :  { %v617_v32 = vadd.f32 %v3853_v31, %v5067_v19  ;;  %v608_v33 = vpop.f32.mrb[23].mxu1  ;;  %v695_v57 = vadd.f32 %v3865_v62, %v3562_v41  ;;  %v686_v58 = vpop.f32.mrb[15].mxu0  ;;  %v736_v62 = vld [vmem:[%s6698_s2 + $0x20] sm:$0xff] }
 0x244   :  { %v609_v34 = vadd.f32 %v5067_v19, %v608_v33  ;;  %v687_v60 = vadd.f32 %v3562_v41, %v686_v58 }
 0x245   :  { %v5139_v20 = vpack.c.bf16 %v617_v32, %v614_v54  ;;  %v5179_v63 = vpack.c.bf16 %v695_v57, %v692_v36 }
 0x246   :  { %v5143_v47 = vpack.c.bf16 %v609_v34, %v606_v30  ;;  %v5182_v37 = vpack.c.bf16 %v687_v60, %v684_v10 }
 0x247   :  { %v908_v19 = vsel %vm796_vm1, %v5139_v20, 0 }
 0x248   :  { %v905_v39 = vsel %vm796_vm1, %v5143_v47, 0  ;;  %v3868_v44 = vpop.f32.mrb[16].mxu0 }
 0x249   :  { %3881 = vmatpush3.bf16.xpose.msra.mxu1 %v819_v38  ;;  %3893 = vmatpush3.bf16.xpose.msra.mxu0 %v902_v21  ;;  %v708_v23 = vadd.f32 %v3868_v44, %v3562_v41  ;;  %v699_v7 = vpop.f32.mrb[17].mxu0  ;;  %v734_v21 = vld [vmem:[%s6698_s2 + $0x10] sm:$0xff]  ;;  %v732_v38 = vld [vmem:[%s6698_s2] sm:$0xff] }
 0x24a   :  { %4160 = vmatprep.subr.msk.bf16.mxu0 %vm796_vm1, %v5143_v47  ;;  %3906 = vmatprep.subr.bf16.mxu1 %v5175_v56  ;;  %v700_v1 = vadd.f32 %v3562_v41, %v699_v7  ;;  %v3869_v8 = vpop.f32.mrb[18].mxu0  ;;  %v737_v7 = vld [vmem:[%s6698_s2 + $0x28] sm:$0xff] }
 0x24b   :  { %v711_v9 = vadd.f32 %v3869_v8, %v3562_v41  ;;  %v702_v17 = vpop.f32.mrb[19].mxu0 }
 0x24c   :  { %v703_v12 = vadd.f32 %v3562_v41, %v702_v17 }
 0x24d   :  { %v5185_v14 = vpack.c.bf16 %v711_v9, %v708_v23 }
 0x24e   :  { %v5188_v26 = vpack.c.bf16 %v703_v12, %v700_v1 }
 0x250   :  { %3883 = vmatmul.mubr.msk.bf16.vlgmr.msra.gmra.mrb[24].mxu1 %vm796_vm1, %v5081_v55  ;;  %v3872_v13 = vpop.f32.mrb[20].mxu0 }
 0x251   :  { %3886 = vmatprep.mubr.msk.bf16.mxu1 %vm796_vm1, %v5111_v6  ;;  %3895 = vmatpush3.bf16.xpose.msra.mxu0 %v905_v39  ;;  %v724_v22 = vadd.f32 %v3872_v13, %v3562_v41  ;;  %v715_v16 = vpop.f32.mrb[21].mxu0 }
 0x252   :  { %4161 = vmatprep.subr.msk.bf16.mxu0 %vm796_vm1, %v5139_v20  ;;  %3907 = vmatpush3.bf16.msra.mxu1 %v5175_v56  ;;  %v716_v54 = vadd.f32 %v3562_v41, %v715_v16  ;;  %v3873_v27 = vpop.f32.mrb[22].mxu0 }
 0x253   :  { %3908 = vmatprep.subr.bf16.mxu1 %v5173_v28  ;;  %v727_v30 = vadd.f32 %v3873_v27, %v3562_v41  ;;  %v718_v31 = vpop.f32.mrb[23].mxu0 }
 0x254   :  { %v719_v32 = vadd.f32 %v3562_v41, %v718_v31 }
 0x255   :  { %v5191_v33 = vpack.c.bf16 %v727_v30, %v724_v22 }
 0x256   :  { %3909 = vmatpush3.bf16.msra.mxu1 %v5173_v28  ;;  %v5194_v34 = vpack.c.bf16 %v719_v32, %v716_v54 }
 0x257   :  { %3910 = vmatprep.subr.bf16.mxu1 %v5182_v37 }
 0x258   :  { %3887 = vmatmul.mubr.msk.bf16.gmra.mrb[28].mxu1 %vm796_vm1, %v5109_v11 }
 0x259   :  { %3897 = vmatpush3.bf16.xpose.msra.mxu0 %v908_v19  ;;  %v735_v19 = vld [vmem:[%s6698_s2 + $0x18] sm:$0xff] }
 0x25a   :  { %3911 = vmatpush3.bf16.msra.mxu1 %v5182_v37 }
 0x25b   :  { %3912 = vmatprep.subr.bf16.mxu1 %v5179_v63 }
 0x25e   :  { %3913 = vmatpush3.bf16.msra.mxu1 %v5179_v63 }
 0x25f   :  { %3922 = vmatprep.subr.bf16.mxu1 %v5188_v26 }
 0x260   :  { %3899 = vmatmul.mubr.msk.bf16.vlgmr.msra.gmra.mrb[24].mxu0 %vm796_vm1, %v5050_v2 }
 0x261   :  { %3902 = vmatprep.mubr.msk.bf16.mxu0 %vm796_vm1, %v5062_v35 }
 0x268   :  { %3903 = vmatmul.mubr.msk.bf16.gmra.mrb[28].mxu0 %vm796_vm1, %v5060_v15 }
 0x2a1   :  { %v1369_v24 = vpop.permute.xlu1 %1368 }
 0x2a2   :  { %v1367_v40 = vpop.permute.xlu0 %1366  ;;  %v1390_v59 = vsel %vm796_vm1, %v1369_v24, 0 }
 0x2a3   :  { %4162 = vmatprep.subr.msk.bf16.mxu0 %vm796_vm1, %v1367_v40  ;;  %v1387_v42 = vsel %vm796_vm1, %v1367_v40, 0  ;;  %v5211_v40 = vld [vmem:[%s6699_s3] ss:$0 sm:$0xff] }
 0x2a4   :  { %3939 = vmatpush3.bf16.xpose.msra.mxu0 %v1387_v42 }
 0x2a5   :  { %4163 = vmatprep.subr.msk.bf16.mxu0 %vm796_vm1, %v1369_v24  ;;  %v733_v24 = vld [vmem:[%s6698_s2 + $0x8] sm:$0xff] }
 0x2ac   :  { %3941 = vmatpush3.bf16.xpose.msra.mxu0 %v1390_v59  ;;  %v739_v59 = vld [vmem:[%s6698_s2 + $0x38] sm:$0xff] }
 0x323   :  { %v3884_v39 = vpop.f32.mrb[24].mxu1 }
 0x324   :  { %v864_v41 = vadd.f32 %v3884_v39, %v734_v21  ;;  %v855_v42 = vpop.f32.mrb[25].mxu1  ;;  %v5267_v39 = vld [vmem:[%s6699_s3 + $0x1] ss:$0 sm:$0xff] }
 0x325   :  { %v856_v43 = vadd.f32 %v855_v42, %v732_v38  ;;  %v3885_v48 = vpop.f32.mrb[26].mxu1 }
 0x326   :  { %v867_v53 = vadd.f32 %v3885_v48, %v735_v19  ;;  %v858_v0 = vpop.f32.mrb[27].mxu1  ;;  %v5217_v49 = vadd.f32 %v5211_v40, %v864_v41 }
 0x327   :  { %v859_v50 = vadd.f32 %v858_v0, %v733_v24  ;;  %v5225_v36 = vadd.f32 %v5211_v40, %v856_v43 }
 0x328   :  { %v1010_v51 = vsel %vm1003_vm2, %v5217_v49, -inf  ;;  %v5222_v52 = vadd.f32 %v5211_v40, %v867_v53 }
 0x329   :  { %1011 = vmax.xlane.f32.xlu0 %v1010_v51  ;;  %v5236_v57 = vadd.f32 %v5211_v40, %v859_v50  ;;  %v1004_v23 = vsel %vm1003_vm2, %v5225_v36, -inf }
 0x32a   :  { %v1013_v10 = vsel %vm1003_vm2, %v5222_v52, -inf }
 0x32b   :  { %1014 = vmax.xlane.f32.xlu1 %v1013_v10  ;;  %v3888_v58 = vpop.f32.mrb[28].mxu1  ;;  %v1007_v12 = vsel %vm1003_vm2, %v5236_v57, -inf }
 0x32c   :  { %v880_v60 = vadd.f32 %v3888_v58, %v738_v29  ;;  %v871_v44 = vpop.f32.mrb[29].mxu1 }
 0x32d   :  { %v872_v1 = vadd.f32 %v871_v44, %v736_v62  ;;  %1005 = vmax.xlane.f32.xlu0 %v1004_v23  ;;  %v3889_v8 = vpop.f32.mrb[30].mxu1 }
 0x32e   :  { %v883_v9 = vadd.f32 %v3889_v8, %v739_v59  ;;  %v874_v17 = vpop.f32.mrb[31].mxu1  ;;  %v5249_v13 = vadd.f32 %v5211_v40, %v880_v60 }
 0x32f   :  { %v875_v22 = vadd.f32 %v874_v17, %v737_v7  ;;  %1008 = vmax.xlane.f32.xlu1 %v1007_v12  ;;  %v5257_v27 = vadd.f32 %v5211_v40, %v872_v1 }
 0x330   :  { %v1022_v16 = vsel %vm1003_vm2, %v5249_v13, -inf  ;;  %v5254_v54 = vadd.f32 %v5211_v40, %v883_v9 }
 0x331   :  { %1023 = vmax.xlane.f32.xlu0 %v1022_v16  ;;  %v5262_v31 = vadd.f32 %v5211_v40, %v875_v22  ;;  %v1016_v43 = vsel %vm1003_vm2, %v5257_v27, -inf }
 0x332   :  { %v1025_v30 = vsel %vm1003_vm2, %v5254_v54, -inf }
 0x333   :  { %v3900_v32 = vpop.f32.mrb[24].mxu0  ;;  %1026 = vmax.xlane.f32.xlu1 %v1025_v30  ;;  %v1019_v51 = vsel %vm1003_vm2, %v5262_v31, -inf }
 0x334   :  { %v953_v41 = vadd.f32 %v3900_v32, %v734_v21  ;;  %v944_v42 = vpop.f32.mrb[25].mxu0 }
 0x335   :  { %v945_v48 = vadd.f32 %v944_v42, %v732_v38  ;;  %v3901_v53 = vpop.f32.mrb[26].mxu0  ;;  %1017 = vmax.xlane.f32.xlu0 %v1016_v43 }
 0x336   :  { %v956_v0 = vadd.f32 %v3901_v53, %v735_v19  ;;  %v947_v50 = vpop.f32.mrb[27].mxu0  ;;  %v5274_v10 = vadd.f32 %v5267_v39, %v953_v41 }
 0x337   :  { %v948_v58 = vadd.f32 %v947_v50, %v733_v24  ;;  %1020 = vmax.xlane.f32.xlu1 %v1019_v51  ;;  %v5279_v60 = vadd.f32 %v5267_v39, %v945_v48 }
 0x338   :  { %v1034_v21 = vsel %vm1003_vm2, %v5274_v10, -inf }
 0x339   :  { %1035 = vmax.xlane.f32.xlu0 %v1034_v21  ;;  %v1028_v19 = vsel %vm1003_vm2, %v5279_v60, -inf }
 0x33b   :  { %v3904_v38 = vpop.f32.mrb[28].mxu0 }
 0x33c   :  { %v969_v44 = vadd.f32 %v3904_v38, %v738_v29  ;;  %v960_v23 = vpop.f32.mrb[29].mxu0  ;;  %v5290_v29 = vadd.f32 %v5267_v39, %v956_v0 }
 0x33d   :  { %v961_v1 = vadd.f32 %v960_v23, %v736_v62  ;;  %v3905_v8 = vpop.f32.mrb[30].mxu0  ;;  %1029 = vmax.xlane.f32.xlu0 %v1028_v19 }
 0x33e   :  { %v972_v9 = vadd.f32 %v3905_v8, %v739_v59  ;;  %v963_v17 = vpop.f32.mrb[31].mxu0  ;;  %v5293_v12 = vadd.f32 %v5267_v39, %v969_v44  ;;  %v1037_v62 = vsel %vm1003_vm2, %v5290_v29, -inf  ;;  %v5298_v59 = vadd.f32 %v5267_v39, %v948_v58 }
 0x33f   :  { %v964_v24 = vadd.f32 %v963_v17, %v737_v7  ;;  %v5303_v22 = vadd.f32 %v5267_v39, %v961_v1 }
 0x340   :  { %v1046_v7 = vsel %vm1003_vm2, %v5293_v12, -inf  ;;  %v1031_v16 = vsel %vm1003_vm2, %v5298_v59, -inf  ;;  %v5308_v30 = vadd.f32 %v5267_v39, %v972_v9 }
 0x341   :  { %v1040_v32 = vsel %vm1003_vm2, %v5303_v22, -inf  ;;  %v5315_v42 = vadd.f32 %v5267_v39, %v964_v24 }
 0x342   :  { %v1049_v41 = vsel %vm1003_vm2, %v5308_v30, -inf }
 0x343   :  { %v1043_v43 = vsel %vm1003_vm2, %v5315_v42, -inf }
 0x348   :  { %1479 = vrot.lane.b32.xlu1 %v5123_v45, %s4602_s9 }
 0x34c   :  { %1372 = vrot.lane.b32.xlu1 %v5105_v61, %s4602_s9 }
 0x353   :  { %1370 = vrot.lane.b32.xlu0 %v5107_v5, %s4602_s9 }
 0x370   :  { %1038 = vmax.xlane.f32.xlu1 %v1037_v62 }
 0x372   :  { %1047 = vmax.xlane.f32.xlu0 %v1046_v7 }
 0x374   :  { %1032 = vmax.xlane.f32.xlu1 %v1031_v16 }
 0x376   :  { %1041 = vmax.xlane.f32.xlu0 %v1040_v32 }
 0x378   :  { %1050 = vmax.xlane.f32.xlu1 %v1049_v41 }
 0x37c   :  { %1044 = vmax.xlane.f32.xlu1 %v1043_v43 }
 0x38d   :  { %1481 = vrot.lane.b32.xlu1 %v5121_v18, %s4602_s9 }
 0x3b6   :  { %v1012_v48 = vpop.xlane.xlu0 %1011 }
 0x3b7   :  { %v1054_v53 = vsub.f32 %v5217_v49, %v1012_v48 }
 0x3b8   :  { %v1015_v0 = vpop.xlane.xlu1 %1014 }
 0x3b9   :  { %v1072_v50 = vmul.f32 1.442695, %v1054_v53  ;;  %v1055_v51 = vsub.f32 %v5222_v52, %v1015_v0 }
 0x3ba   :  { %v1006_v58 = vpop.xlane.xlu0 %1005 }
 0x3bb   :  { %4344 = vpow2.f32 %v1072_v50  ;;  %v1074_v21 = vmul.f32 1.442695, %v1055_v51  ;;  %v1052_v38 = vsub.f32 %v5225_v36, %v1006_v58 }
 0x3bc   :  { %v1009_v44 = vpop.xlane.xlu1 %1008 }
 0x3bd   :  { %4346 = vpow2.f32 %v1074_v21  ;;  %v1068_v23 = vmul.f32 1.442695, %v1052_v38  ;;  %v1053_v19 = vsub.f32 %v5236_v57, %v1009_v44 }
 0x3be   :  { %v1024_v1 = vpop.xlane.xlu0 %1023 }
 0x3bf   :  { %4348 = vpow2.f32 %v1068_v23  ;;  %v1070_v8 = vmul.f32 1.442695, %v1053_v19  ;;  %v1058_v9 = vsub.f32 %v5249_v13, %v1024_v1 }
 0x3c0   :  { %v1027_v49 = vpop.xlane.xlu1 %1026 }
 0x3c1   :  { %4350 = vpow2.f32 %v1070_v8  ;;  %v1080_v17 = vmul.f32 1.442695, %v1058_v9  ;;  %v1059_v52 = vsub.f32 %v5254_v54, %v1027_v49 }
 0x3c2   :  { %v1018_v24 = vpop.xlane.xlu0 %1017 }
 0x3c3   :  { %4352 = vpow2.f32 %v1080_v17  ;;  %v1082_v62 = vmul.f32 1.442695, %v1059_v52  ;;  %v1056_v36 = vsub.f32 %v5257_v27, %v1018_v24 }
 0x3c4   :  { %v1021_v7 = vpop.xlane.xlu1 %1020 }
 0x3c5   :  { %v5328_v16 = vpop.eup %4344  ;;  %4354 = vpow2.f32 %v1082_v62  ;;  %v1076_v57 = vmul.f32 1.442695, %v1056_v36  ;;  %v1057_v32 = vsub.f32 %v5262_v31, %v1021_v7 }
 0x3c6   :  { %v1036_v41 = vpop.xlane.xlu0 %1035  ;;  %v1106_v13 = vsel %vm1003_vm2, %v5328_v16, 0.0 }
 0x3c7   :  { %v5333_v43 = vpop.eup %4346  ;;  %4356 = vpow2.f32 %v1076_v57  ;;  %v1078_v54 = vmul.f32 1.442695, %v1057_v32  ;;  %v1062_v48 = vsub.f32 %v5274_v10, %v1036_v41  ;;  %1107 = vadd.xlane.f32.xlu0 %v1106_v13 }
 0x3c8   :  { %v1109_v27 = vsel %vm1003_vm2, %v5333_v43, 0.0  ;;  %v5340_v31 = vpop.permute.xlu1 %1479 }
 0x3c9   :  { %v5338_v53 = vpop.eup %4348  ;;  %4358 = vpow2.f32 %v1078_v54  ;;  %v1088_v0 = vmul.f32 1.442695, %v1062_v48  ;;  %1110 = vadd.xlane.f32.xlu1 %v1109_v27 }
 0x3ca   :  { %v1030_v50 = vpop.xlane.xlu0 %1029  ;;  %v1100_v51 = vsel %vm1003_vm2, %v5338_v53, 0.0 }
 0x3cb   :  { %v5344_v58 = vpop.eup %4350  ;;  %4360 = vpow2.f32 %v1088_v0  ;;  %v1060_v10 = vsub.f32 %v5279_v60, %v1030_v50  ;;  %1101 = vadd.xlane.f32.xlu0 %v1100_v51 }
 0x3cc   :  { %v1103_v21 = vsel %vm1003_vm2, %v5344_v58, 0.0  ;;  %v1373_v8 = vpop.permute.xlu1 %1372 }
 0x3cd   :  { %v5349_v38 = vpop.eup %4352  ;;  %v1084_v44 = vmul.f32 1.442695, %v1060_v10  ;;  %1104 = vadd.xlane.f32.xlu1 %v1103_v21  ;;  %v1396_v7 = vsel %vm796_vm1, %v1373_v8, 0 }
 0x3ce   :  { %v1371_v23 = vpop.permute.xlu0 %1370  ;;  %v1118_v19 = vsel %vm1003_vm2, %v5349_v38, 0.0 }
 0x3cf   :  { %v5353_v1 = vpop.eup %4354  ;;  %4362 = vpow2.f32 %v1084_v44  ;;  %1119 = vadd.xlane.f32.xlu0 %v1118_v19  ;;  %4164 = vmatprep.subr.msk.bf16.mxu0 %vm796_vm1, %v1371_v23  ;;  %v1393_v60 = vsel %vm796_vm1, %v1371_v23, 0 }
 0x3d0   :  { %3943 = vmatpush3.bf16.xpose.msra.mxu0 %v1393_v60  ;;  %v1121_v9 = vsel %vm1003_vm2, %v5353_v1, 0.0 }
 0x3d1   :  { %v5359_v49 = vpop.eup %4356  ;;  %1122 = vadd.xlane.f32.xlu1 %v1121_v9  ;;  %4165 = vmatprep.subr.msk.bf16.mxu0 %vm796_vm1, %v1373_v8 }
 0x3d2   :  { %v1112_v17 = vsel %vm1003_vm2, %v5359_v49, 0.0 }
 0x3d3   :  { %v5364_v52 = vpop.eup %4358  ;;  %1113 = vadd.xlane.f32.xlu0 %v1112_v17 }
 0x3d4   :  { %v1115_v24 = vsel %vm1003_vm2, %v5364_v52, 0.0 }
 0x3d5   :  { %v5368_v62 = vpop.eup %4360  ;;  %1116 = vadd.xlane.f32.xlu1 %v1115_v24 }
 0x3d6   :  { %v1130_v36 = vsel %vm1003_vm2, %v5368_v62, 0.0 }
 0x3d7   :  { %1131 = vadd.xlane.f32.xlu0 %v1130_v36 }
 0x3d8   :  { %3945 = vmatpush3.bf16.xpose.msra.mxu0 %v1396_v7 }
 0x3d9   :  { %v5373_v57 = vpop.eup %4362 }
 0x3da   :  { %v1124_v32 = vsel %vm1003_vm2, %v5373_v57, 0.0 }
 0x3db   :  { %1125 = vadd.xlane.f32.xlu0 %v1124_v32 }
 0x3f1   :  { %1354 = vrot.lane.b32.xlu0 %v5085_v3, %s4602_s9 }
 0x3fd   :  { %v1039_v41 = vpop.xlane.xlu1 %1038 }
 0x3fe   :  { %v1063_v13 = vsub.f32 %v5290_v29, %v1039_v41 }
 0x3ff   :  { %v1048_v54 = vpop.xlane.xlu0 %1047 }
 0x400   :  { %v1090_v48 = vmul.f32 1.442695, %v1063_v13  ;;  %v1066_v27 = vsub.f32 %v5293_v12, %v1048_v54 }
 0x401   :  { %v1033_v0 = vpop.xlane.xlu1 %1032 }
 0x402   :  { %4364 = vpow2.f32 %v1090_v48  ;;  %v1096_v50 = vmul.f32 1.442695, %v1066_v27  ;;  %v1061_v51 = vsub.f32 %v5298_v59, %v1033_v0 }
 0x403   :  { %v1042_v24 = vpop.xlane.xlu0 %1041 }
 0x404   :  { %4366 = vpow2.f32 %v1096_v50  ;;  %v1086_v10 = vmul.f32 1.442695, %v1061_v51  ;;  %v1064_v36 = vsub.f32 %v5303_v22, %v1042_v24 }
 0x405   :  { %v1051_v21 = vpop.xlane.xlu1 %1050 }
 0x406   :  { %4368 = vpow2.f32 %v1086_v10  ;;  %v1092_v7 = vmul.f32 1.442695, %v1064_v36  ;;  %v1067_v32 = vsub.f32 %v5308_v30, %v1051_v21 }
 0x408   :  { %v1098_v41 = vmul.f32 1.442695, %v1067_v32 }
 0x409   :  { %v1045_v44 = vpop.xlane.xlu1 %1044 }
 0x40a   :  { %v1065_v23 = vsub.f32 %v5315_v42, %v1045_v44 }
 0x40c   :  { %v5383_v19 = vpop.eup %4364  ;;  %v1094_v60 = vmul.f32 1.442695, %v1065_v23 }
 0x40d   :  { %v1133_v29 = vsel %vm1003_vm2, %v5383_v19, 0.0  ;;  %v5419_v48 = vpop.permute.xlu1 %1481 }
 0x40e   :  { %v5387_v8 = vpop.eup %4366  ;;  %4370 = vpow2.f32 %v1094_v60  ;;  %1134 = vadd.xlane.f32.xlu1 %v1133_v29 }
 0x40f   :  { %v1142_v12 = vsel %vm1003_vm2, %v5387_v8, 0.0  ;;  %4372 = vpow2.f32 %v1092_v7 }
 0x410   :  { %v5391_v59 = vpop.eup %4368  ;;  %1143 = vadd.xlane.f32.xlu0 %v1142_v12  ;;  %4374 = vpow2.f32 %v1098_v41 }
 0x411   :  { %v1127_v9 = vsel %vm1003_vm2, %v5391_v59, 0.0 }
 0x412   :  { %1128 = vadd.xlane.f32.xlu1 %v1127_v9 }
 0x418   :  { %v5395_v42 = vpop.eup %4370 }
 0x419   :  { %v1139_v17 = vsel %vm1003_vm2, %v5395_v42, 0.0  ;;  %v5411_v13 = vpop.eup %4372 }
 0x41a   :  { %1140 = vadd.xlane.f32.xlu0 %v1139_v17  ;;  %v1136_v22 = vsel %vm1003_vm2, %v5411_v13, 0.0  ;;  %v5415_v54 = vpop.eup %4374 }
 0x41b   :  { %v1145_v30 = vsel %vm1003_vm2, %v5415_v54, 0.0 }
 0x423   :  { %1356 = vrot.lane.b32.xlu1 %v5081_v55, %s4602_s9 }
 0x430   :  { %1483 = vrot.lane.b32.xlu0 %v5143_v47, %s4602_s9 }
 0x434   :  { %1467 = vrot.lane.b32.xlu0 %v5052_v4, %s4602_s9 }
 0x438   :  { %1358 = vrot.lane.b32.xlu0 %v5111_v6, %s4602_s9 }
 0x43c   :  { %1471 = vrot.lane.b32.xlu0 %v5062_v35, %s4602_s9 }
 0x447   :  { %1137 = vadd.xlane.f32.xlu1 %v1136_v22 }
 0x44b   :  { %1146 = vadd.xlane.f32.xlu1 %v1145_v30 }
 0x454   :  { %v1108_v27 = vpop.xlane.xlu0 %1107 }
 0x456   :  { %v1111_v0 = vpop.xlane.xlu1 %1110 }
 0x457   :  { %4376 = vrcp.f32 %v1111_v0 }
 0x458   :  { %v1102_v50 = vpop.xlane.xlu0 %1101 }
 0x459   :  { %4378 = vrcp.f32 %v1102_v50 }
 0x45a   :  { %4380 = vrcp.f32 %v1108_v27  ;;  %v1105_v51 = vpop.xlane.xlu1 %1104 }
 0x45b   :  { %4382 = vrcp.f32 %v1105_v51 }
 0x45c   :  { %1485 = vrot.lane.b32.xlu1 %v5139_v20, %s4602_s9  ;;  %v1120_v10 = vpop.xlane.xlu0 %1119 }
 0x45e   :  { %v1123_v21 = vpop.xlane.xlu1 %1122 }
 0x45f   :  { %4384 = vrcp.f32 %v1123_v21 }
 0x460   :  { %1469 = vrot.lane.b32.xlu1 %v5050_v2, %s4602_s9  ;;  %v1114_v44 = vpop.xlane.xlu0 %1113 }
 0x461   :  { %4386 = vrcp.f32 %v1114_v44  ;;  %v4377_v23 = vpop.eup %4376 }
 0x462   :  { %4388 = vrcp.f32 %v1120_v10  ;;  %v1117_v60 = vpop.xlane.xlu1 %1116  ;;  %v1167_v24 = vmul.f32 %v4377_v23, %v5333_v43 }
 0x463   :  { %v4379_v29 = vpop.eup %4378  ;;  %4390 = vrcp.f32 %v1117_v60 }
 0x464   :  { %v4381_v12 = vpop.eup %4380  ;;  %1360 = vrot.lane.b32.xlu1 %v5109_v11, %s4602_s9  ;;  %v1132_v9 = vpop.xlane.xlu0 %1131  ;;  %v1164_v36 = vmul.f32 %v4379_v29, %v5338_v53 }
 0x465   :  { %v4383_v17 = vpop.eup %4382  ;;  %v1166_v32 = vmul.f32 %v4381_v12, %v5328_v16 }
 0x466   :  { %v1165_v7 = vmul.f32 %v4383_v17, %v5344_v58 }
 0x467   :  { %v1181_v30 = vpack.c.bf16 %v1167_v24, %v1166_v32 }
 0x468   :  { %1473 = vrot.lane.b32.xlu1 %v5060_v15, %s4602_s9  ;;  %v1126_v41 = vpop.xlane.xlu0 %1125  ;;  %v1180_v22 = vpack.c.bf16 %v1165_v7, %v1164_v36 }
 0x469   :  { %v4385_v27 = vpop.eup %4384 }
 0x46a   :  { %3914 = vmatprep.mubr.msk.bf16.mxu1 %vm1003_vm2, %v1180_v22  ;;  %v1171_v16 = vmul.f32 %v4385_v27, %v5353_v1  ;;  %v1500_v27 = vsel %vm796_vm1, %v5340_v31, 0 }
 0x46b   :  { %v4387_v0 = vpop.eup %4386  ;;  %3915 = vmatmul.mubr.msk.bf16.vlgmr.msra.gmra.mrb[32].mxu1 %vm1003_vm2, %v1181_v30 }
 0x46c   :  { %v4389_v50 = vpop.eup %4388  ;;  %3923 = vmatpush3.bf16.msra.mxu1 %v5188_v26  ;;  %v1355_v43 = vpop.permute.xlu0 %1354  ;;  %v1168_v58 = vmul.f32 %v4387_v0, %v5359_v49 }
 0x46d   :  { %v4391_v53 = vpop.eup %4390  ;;  %3924 = vmatprep.subr.bf16.mxu1 %v5185_v14  ;;  %3946 = vmatprep.mubr.msk.bf16.mxu0 %vm796_vm1, %v1355_v43  ;;  %v1170_v10 = vmul.f32 %v4389_v50, %v5349_v38 }
 0x46e   :  { %v1169_v51 = vmul.f32 %v4391_v53, %v5364_v52 }
 0x46f   :  { %v1183_v44 = vpack.c.bf16 %v1171_v16, %v1170_v10 }
 0x470   :  { %3925 = vmatpush3.bf16.msra.mxu1 %v5185_v14  ;;  %v1182_v21 = vpack.c.bf16 %v1169_v51, %v1168_v58 }
 0x471   :  { %3926 = vmatprep.subr.bf16.mxu1 %v5194_v34 }
 0x472   :  { %3918 = vmatprep.mubr.msk.bf16.mxu1 %vm1003_vm2, %v1182_v21 }
 0x473   :  { %3919 = vmatmul.mubr.msk.bf16.gmra.mrb[36].mxu1 %vm1003_vm2, %v1183_v44 }
 0x474   :  { %3927 = vmatpush3.bf16.msra.mxu1 %v5194_v34 }
 0x475   :  { %3928 = vmatprep.subr.bf16.mxu1 %v5191_v33 }
 0x478   :  { %3929 = vmatpush3.bf16.msra.mxu1 %v5191_v33 }
 0x479   :  { %4166 = vmatprep.subr.msk.bf16.mxu1 %vm796_vm1, %v5340_v31 }
 0x49b   :  { %v1135_v38 = vpop.xlane.xlu1 %1134 }
 0x49c   :  { %4392 = vrcp.f32 %v1135_v38 }
 0x49d   :  { %4394 = vrcp.f32 %v1126_v41  ;;  %v1144_v49 = vpop.xlane.xlu0 %1143 }
 0x49e   :  { %4396 = vrcp.f32 %v1132_v9 }
 0x49f   :  { %v1129_v1 = vpop.xlane.xlu1 %1128 }
 0x4a0   :  { %4398 = vrcp.f32 %v1129_v1 }
 0x4a3   :  { %v1357_v52 = vpop.permute.xlu1 %1356 }
 0x4a4   :  { %3947 = vmatmul.mubr.msk.bf16.vlgmr.msra.gmra.mrb[32].mxu0 %vm796_vm1, %v1357_v52 }
 0x4a6   :  { %v4393_v23 = vpop.eup %4392 }
 0x4a7   :  { %v1141_v60 = vpop.xlane.xlu0 %1140  ;;  %v4395_v29 = vpop.eup %4394  ;;  %v1175_v24 = vmul.f32 %v4393_v23, %v5383_v19 }
 0x4a8   :  { %v4397_v12 = vpop.eup %4396  ;;  %v1172_v7 = vmul.f32 %v4395_v29, %v5373_v57  ;;  %4400 = vrcp.f32 %v1141_v60 }
 0x4a9   :  { %v1174_v9 = vmul.f32 %v4397_v12, %v5368_v62  ;;  %v1503_v62 = vsel %vm796_vm1, %v5419_v48, 0 }
 0x4aa   :  { %v4399_v17 = vpop.eup %4398 }
 0x4ab   :  { %v1484_v36 = vpop.permute.xlu0 %1483  ;;  %v1173_v32 = vmul.f32 %v4399_v17, %v5391_v59  ;;  %v1185_v22 = vpack.c.bf16 %v1175_v24, %v1174_v9  ;;  %v5499_v24 = vld [vmem:[%s6698_s2 + $0x50] sm:$0xff]  ;;  %v5509_v9 = vld [vmem:[%s6698_s2 + $0x48] sm:$0xff] }
 0x4ac   :  { %v1506_v57 = vsel %vm796_vm1, %v1484_v36, 0 }
 0x4ad   :  { %v1184_v41 = vpack.c.bf16 %v1173_v32, %v1172_v7 }
 0x4af   :  { %3930 = vmatprep.mubr.msk.bf16.mxu1 %vm1003_vm2, %v1184_v41  ;;  %v1468_v30 = vpop.permute.xlu0 %1467 }
 0x4b0   :  { %3931 = vmatmul.mubr.msk.bf16.vlgmr.msra.gmra.mrb[40].mxu1 %vm1003_vm2, %v1185_v22 }
 0x4b1   :  { %3955 = vmatpush3.bf16.xpose.msra.mxu1 %v1500_v27  ;;  %v5516_v27 = vld [vmem:[%s6698_s2 + $0x58] sm:$0xff] }
 0x4b2   :  { %4167 = vmatprep.subr.msk.bf16.mxu1 %vm796_vm1, %v5419_v48  ;;  %v4401_v50 = vpop.eup %4400 }
 0x4b3   :  { %v1359_v19 = vpop.permute.xlu0 %1358  ;;  %v1177_v58 = vmul.f32 %v4401_v50, %v5395_v42 }
 0x4b4   :  { %3950 = vmatprep.mubr.msk.bf16.mxu0 %vm796_vm1, %v1359_v19 }
 0x4b9   :  { %3957 = vmatpush3.bf16.xpose.msra.mxu1 %v1503_v62 }
 0x4ba   :  { %4168 = vmatprep.subr.msk.bf16.mxu1 %vm796_vm1, %v1484_v36  ;;  %v5504_v36 = vld [vmem:[%s6698_s2 + $0x40] sm:$0xff] }
 0x4c1   :  { %3959 = vmatpush3.bf16.xpose.msra.mxu1 %v1506_v57 }
 0x4d4   :  { %v1138_v59 = vpop.xlane.xlu1 %1137 }
 0x4d5   :  { %4402 = vrcp.f32 %v1138_v59 }
 0x4d6   :  { %4404 = vrcp.f32 %v1144_v49 }
 0x4d8   :  { %v1147_v31 = vpop.xlane.xlu1 %1146 }
 0x4d9   :  { %4406 = vrcp.f32 %v1147_v31 }
 0x4dc   :  { %v1486_v0 = vpop.permute.xlu1 %1485 }
 0x4dd   :  { %4169 = vmatprep.subr.msk.bf16.mxu1 %vm796_vm1, %v1486_v0  ;;  %v1509_v43 = vsel %vm796_vm1, %v1486_v0, 0 }
 0x4de   :  { %3961 = vmatpush3.bf16.xpose.msra.mxu1 %v1509_v43 }
 0x4df   :  { %v4403_v48 = vpop.eup %4402 }
 0x4e0   :  { %v1470_v53 = vpop.permute.xlu1 %1469  ;;  %v1176_v16 = vmul.f32 %v4403_v48, %v5411_v13  ;;  %v4405_v51 = vpop.eup %4404 }
 0x4e1   :  { %v1178_v38 = vmul.f32 %v4405_v51, %v5387_v8  ;;  %v1472_v13 = vpop.permute.xlu0 %1471 }
 0x4e2   :  { %v1186_v10 = vpack.c.bf16 %v1177_v58, %v1176_v16 }
 0x4e3   :  { %v4407_v21 = vpop.eup %4406 }
 0x4e4   :  { %v1361_v44 = vpop.permute.xlu1 %1360  ;;  %3934 = vmatprep.mubr.msk.bf16.mxu1 %vm1003_vm2, %v1186_v10  ;;  %v1179_v1 = vmul.f32 %v4407_v21, %v5415_v54 }
 0x4e5   :  { %3951 = vmatmul.mubr.msk.bf16.gmra.mrb[36].mxu0 %vm796_vm1, %v1361_v44  ;;  %v746_v44 = vld [vmem:[%s6698_s2 + $0x70] sm:$0xff] }
 0x4e6   :  { %v1187_v49 = vpack.c.bf16 %v1179_v1, %v1178_v38  ;;  %v744_v38 = vld [vmem:[%s6698_s2 + $0x60] sm:$0xff] }
 0x4e8   :  { %3935 = vmatmul.mubr.msk.bf16.gmra.mrb[44].mxu1 %vm1003_vm2, %v1187_v49  ;;  %v1474_v42 = vpop.permute.xlu1 %1473 }
 0x4e9   :  { %3962 = vmatprep.mubr.msk.bf16.mxu1 %vm796_vm1, %v1468_v30 }
 0x4f0   :  { %3963 = vmatmul.mubr.msk.bf16.vlgmr.msra.gmra.mrb[48].mxu1 %vm796_vm1, %v1470_v53 }
 0x4f1   :  { %3966 = vmatprep.mubr.msk.bf16.mxu1 %vm796_vm1, %v1472_v13  ;;  %v747_v13 = vld [vmem:[%s6698_s2 + $0x78] sm:$0xff] }
 0x4f8   :  { %3967 = vmatmul.mubr.msk.bf16.gmra.mrb[52].mxu1 %vm796_vm1, %v1474_v42  ;;  %v745_v42 = vld [vmem:[%s6698_s2 + $0x68] sm:$0xff] }
 0x53e   :  { %v5480_v52 = vpop.f32.mrb[32].mxu1 }
 0x53f   :  { %6717 = vst [vmem:[#allocation2_spill] sm:$0xff] %v5480_v52  ;;  %v5482_v8 = vpop.f32.mrb[33].mxu1 }
 0x540   :  { %6718 = vst [vmem:[#allocation3_spill] sm:$0xff] %v5482_v8  ;;  %v5484_v54 = vpop.f32.mrb[34].mxu1 }
 0x541   :  { %6719 = vst [vmem:[#allocation4_spill] sm:$0xff] %v5484_v54  ;;  %v5486_v23 = vpop.f32.mrb[35].mxu1 }
 0x542   :  { %6720 = vst [vmem:[#allocation5_spill] sm:$0xff] %v5486_v23 }
 0x546   :  { %v5488_v60 = vpop.f32.mrb[36].mxu1 }
 0x547   :  { %6721 = vst [vmem:[#allocation6_spill] sm:$0xff] %v5488_v60  ;;  %v5490_v29 = vpop.f32.mrb[37].mxu1 }
 0x548   :  { %6722 = vst [vmem:[#allocation7_spill] sm:$0xff] %v5490_v29  ;;  %v5492_v12 = vpop.f32.mrb[38].mxu1 }
 0x549   :  { %6723 = vst [vmem:[#allocation8_spill] sm:$0xff] %v5492_v12  ;;  %v5494_v17 = vpop.f32.mrb[39].mxu1 }
 0x54a   :  { %6724 = vst [vmem:[#allocation9_spill] sm:$0xff] %v5494_v17 }
 0x577   :  { %v3948_v7 = vpop.f32.mrb[32].mxu0 }
 0x578   :  { %v1432_v32 = vpop.f32.mrb[33].mxu0  ;;  %v1441_v41 = vadd.f32 %v3948_v7, %v5499_v24 }
 0x579   :  { %v1433_v22 = vadd.f32 %v1432_v32, %v5504_v36  ;;  %v3949_v30 = vpop.f32.mrb[34].mxu0 }
 0x57a   :  { %v1435_v19 = vpop.f32.mrb[35].mxu0  ;;  %v1444_v59 = vadd.f32 %v3949_v30, %v5516_v27  ;;  %v5529_v50 = vadd.f32 %v5211_v40, %v1441_v41 }
 0x57b   :  { %v1436_v62 = vadd.f32 %v1435_v19, %v5509_v9  ;;  %v5520_v57 = vadd.f32 %v5211_v40, %v1433_v22 }
 0x57c   :  { %v1598_v48 = vsel %vm1003_vm2, %v5529_v50, -inf  ;;  %v5536_v53 = vadd.f32 %v5211_v40, %v1444_v59 }
 0x57d   :  { %v1592_v31 = vsel %vm1003_vm2, %v5520_v57, -inf  ;;  %v5526_v0 = vadd.f32 %v5211_v40, %v1436_v62 }
 0x57e   :  { %1593 = vmax.xlane.f32.xlu0 %v1592_v31  ;;  %v1601_v10 = vsel %vm1003_vm2, %v5536_v53, -inf }
 0x57f   :  { %v1595_v43 = vsel %vm1003_vm2, %v5526_v0, -inf }
 0x580   :  { %1596 = vmax.xlane.f32.xlu1 %v1595_v43 }
 0x582   :  { %1599 = vmax.xlane.f32.xlu0 %v1598_v48 }
 0x583   :  { %v5538_v16 = vpop.f32.mrb[40].mxu1 }
 0x584   :  { %6725 = vst [vmem:[#allocation10_spill] sm:$0xff] %v5538_v16  ;;  %v5540_v58 = vpop.f32.mrb[41].mxu1 }
 0x585   :  { %6726 = vst [vmem:[#allocation11_spill] sm:$0xff] %v5540_v58  ;;  %v5542_v51 = vpop.f32.mrb[42].mxu1 }
 0x586   :  { %6727 = vst [vmem:[#allocation12_spill] sm:$0xff] %v5542_v51  ;;  %v5546_v21 = vpop.f32.mrb[43].mxu1  ;;  %1602 = vmax.xlane.f32.xlu0 %v1601_v10 }
 0x587   :  { %6728 = vst [vmem:[#allocation13_spill] sm:$0xff] %v5546_v21 }
 0x5b8   :  { %v3952_v1 = vpop.f32.mrb[36].mxu0 }
 0x5b9   :  { %v1448_v49 = vpop.f32.mrb[37].mxu0  ;;  %v1457_v7 = vadd.f32 %v3952_v1, %v746_v44 }
 0x5ba   :  { %v1449_v32 = vadd.f32 %v1448_v49, %v744_v38  ;;  %v3953_v41 = vpop.f32.mrb[38].mxu0 }
 0x5bb   :  { %v5560_v22 = vpop.f32.mrb[44].mxu1  ;;  %v1451_v30 = vpop.f32.mrb[39].mxu0  ;;  %v1460_v19 = vadd.f32 %v3953_v41, %v747_v13  ;;  %v5577_v49 = vadd.f32 %v5211_v40, %v1457_v7 }
 0x5bc   :  { %6729 = vst [vmem:[#allocation14_spill] sm:$0xff] %v5560_v22  ;;  %v1452_v62 = vadd.f32 %v1451_v30, %v745_v42  ;;  %v5562_v59 = vpop.f32.mrb[45].mxu1  ;;  %v5565_v31 = vadd.f32 %v5211_v40, %v1449_v32 }
 0x5bd   :  { %6730 = vst [vmem:[#allocation15_spill] sm:$0xff] %v5562_v59  ;;  %v5567_v43 = vpop.f32.mrb[46].mxu1  ;;  %v5582_v32 = vadd.f32 %v5211_v40, %v1460_v19  ;;  %v1610_v30 = vsel %vm1003_vm2, %v5577_v49, -inf }
 0x5be   :  { %6731 = vst [vmem:[#allocation16_spill] sm:$0xff] %v5567_v43  ;;  %v5569_v48 = vpop.f32.mrb[47].mxu1  ;;  %v1604_v10 = vsel %vm1003_vm2, %v5565_v31, -inf  ;;  %v5574_v1 = vadd.f32 %v5211_v40, %v1452_v62 }
 0x5bf   :  { %6732 = vst [vmem:[#allocation17_spill] sm:$0xff] %v5569_v48  ;;  %1605 = vmax.xlane.f32.xlu0 %v1604_v10  ;;  %v1613_v7 = vsel %vm1003_vm2, %v5582_v32, -inf }
 0x5c0   :  { %v1607_v41 = vsel %vm1003_vm2, %v5574_v1, -inf }
 0x5c1   :  { %1608 = vmax.xlane.f32.xlu1 %v1607_v41 }
 0x5c3   :  { %v5586_v59 = vpop.f32.mrb[48].mxu1  ;;  %1611 = vmax.xlane.f32.xlu0 %v1610_v30 }
 0x5c4   :  { %v5588_v48 = vpop.f32.mrb[49].mxu1 }
 0x5c5   :  { %v5592_v62 = vpop.f32.mrb[50].mxu1  ;;  %1614 = vmax.xlane.f32.xlu1 %v1613_v7 }
 0x5c6   :  { %v5594_v10 = vpop.f32.mrb[51].mxu1 }
 0x5cb   :  { %v3968_v22 = vpop.f32.mrb[52].mxu1 }
 0x5cc   :  { %v5596_v40 = vadd.f32 %v3968_v22, %v746_v44  ;;  %v1561_v19 = vpop.f32.mrb[53].mxu1 }
 0x5cd   :  { %v5598_v41 = vadd.f32 %v1561_v19, %v744_v38  ;;  %v3969_v43 = vpop.f32.mrb[54].mxu1 }
 0x5ce   :  { %v5600_v58 = vadd.f32 %v3969_v43, %v747_v13  ;;  %v1564_v30 = vpop.f32.mrb[55].mxu1 }
 0x5cf   :  { %v5602_v21 = vadd.f32 %v1564_v30, %v745_v42 }
 0x5d6   :  { %1782 = vrot.lane.b32.xlu1 %v5173_v28, %s4602_s9 }
 0x5d9   :  { %1780 = vrot.lane.b32.xlu0 %v5175_v56, %s4602_s9 }
 0x5da   :  { %1786 = vrot.lane.b32.xlu1 %v5179_v63, %s4602_s9 }
 0x5dd   :  { %1784 = vrot.lane.b32.xlu0 %v5182_v37, %s4602_s9 }
 0x5de   :  { %1875 = vrot.lane.b32.xlu1 %v5185_v14, %s4602_s9 }
 0x5e1   :  { %1873 = vrot.lane.b32.xlu0 %v5188_v26, %s4602_s9 }
 0x5e2   :  { %1970 = vrot.lane.b32.xlu1 %v5079_v46, %s4603_s21 }
 0x5e5   :  { %1879 = vrot.lane.b32.xlu0 %v5191_v33, %s4602_s9 }
 0x5e6   :  { %1877 = vrot.lane.b32.xlu1 %v5194_v34, %s4602_s9 }
 0x5ea   :  { %1972 = vrot.lane.b32.xlu1 %v5077_v25, %s4603_s21 }
 0x60b   :  { %v1594_v44 = vpop.xlane.xlu0 %1593 }
 0x60c   :  { %v1640_v38 = vsub.f32 %v5520_v57, %v1594_v44 }
 0x60d   :  { %v1597_v13 = vpop.xlane.xlu1 %1596 }
 0x60e   :  { %v1656_v43 = vmul.f32 1.442695, %v1640_v38  ;;  %v1641_v7 = vsub.f32 %v5526_v0, %v1597_v13 }
 0x60f   :  { %v1600_v42 = vpop.xlane.xlu0 %1599 }
 0x610   :  { %v1642_v22 = vsub.f32 %v5529_v50, %v1600_v42  ;;  %v1658_v51 = vmul.f32 1.442695, %v1641_v7 }
 0x612   :  { %v1660_v19 = vmul.f32 1.442695, %v1642_v22 }
 0x613   :  { %v1603_v30 = vpop.xlane.xlu0 %1602 }
 0x614   :  { %4408 = vpow2.f32 %v1660_v19  ;;  %v1643_v16 = vsub.f32 %v5536_v53, %v1603_v30 }
 0x615   :  { %4410 = vpow2.f32 %v1656_v43 }
 0x616   :  { %v1662_v29 = vmul.f32 1.442695, %v1643_v16 }
 0x618   :  { %4412 = vpow2.f32 %v1662_v29 }
 0x619   :  { %4414 = vpow2.f32 %v1658_v51 }
 0x61e   :  { %v5628_v17 = vpop.eup %4408 }
 0x61f   :  { %v1694_v57 = vsel %vm1003_vm2, %v5628_v17, 0.0  ;;  %v5632_v44 = vpop.eup %4410 }
 0x620   :  { %1695 = vadd.xlane.f32.xlu0 %v1694_v57  ;;  %v1688_v0 = vsel %vm1003_vm2, %v5632_v44, 0.0 }
 0x622   :  { %v5634_v50 = vpop.eup %4412 }
 0x623   :  { %v1697_v53 = vsel %vm1003_vm2, %v5634_v50, 0.0  ;;  %v5640_v38 = vpop.eup %4414 }
 0x624   :  { %1689 = vadd.xlane.f32.xlu0 %v1688_v0  ;;  %1698 = vadd.xlane.f32.xlu1 %v1697_v53  ;;  %v1691_v29 = vsel %vm1003_vm2, %v5640_v38, 0.0 }
 0x628   :  { %1692 = vadd.xlane.f32.xlu1 %v1691_v29 }
 0x64c   :  { %v1606_v16 = vpop.xlane.xlu0 %1605 }
 0x64d   :  { %v1644_v13 = vsub.f32 %v5565_v31, %v1606_v16 }
 0x64e   :  { %v1609_v51 = vpop.xlane.xlu1 %1608 }
 0x64f   :  { %v1645_v42 = vsub.f32 %v5574_v1, %v1609_v51  ;;  %v1664_v30 = vmul.f32 1.442695, %v1644_v13  ;;  %v1557_v1 = vadd.f32 %v5592_v62, %v5516_v27  ;;  %v1549_v13 = vadd.f32 %v5594_v10, %v5509_v9 }
 0x650   :  { %v1612_v22 = vpop.xlane.xlu0 %1611 }
 0x651   :  { %v1666_v43 = vmul.f32 1.442695, %v1645_v42  ;;  %v1646_v7 = vsub.f32 %v5577_v49, %v1612_v22 }
 0x652   :  { %v1615_v19 = vpop.xlane.xlu1 %1614 }
 0x653   :  { %4416 = vpow2.f32 %v1666_v43  ;;  %v1668_v57 = vmul.f32 1.442695, %v1646_v7  ;;  %v1647_v0 = vsub.f32 %v5582_v32, %v1615_v19  ;;  %v5653_v32 = vadd.f32 %v5267_v39, %v1557_v1 }
 0x654   :  { %v1781_v53 = vpop.permute.xlu0 %1780  ;;  %v5666_v43 = vadd.f32 %v5267_v39, %v1549_v13  ;;  %v1554_v7 = vadd.f32 %v5586_v59, %v5499_v24 }
 0x655   :  { %4418 = vpow2.f32 %v1668_v57  ;;  %3970 = vmatprep.subr.bf16.mxu0 %v1781_v53  ;;  %v1670_v60 = vmul.f32 1.442695, %v1647_v0  ;;  %v1625_v10 = vsel %vm1003_vm2, %v5653_v32, -inf }
 0x656   :  { %v1783_v29 = vpop.permute.xlu1 %1782  ;;  %3971 = vmatpush3.bf16.msra.mxu0 %v1781_v53  ;;  %4420 = vpow2.f32 %v1664_v30  ;;  %v1619_v0 = vsel %vm1003_vm2, %v5666_v43, -inf  ;;  %v5683_v53 = vadd.f32 %v5267_v39, %v1554_v7 }
 0x657   :  { %3972 = vmatprep.subr.bf16.mxu0 %v1783_v29  ;;  %4422 = vpow2.f32 %v1670_v60 }
 0x658   :  { %v1785_v31 = vpop.permute.xlu0 %1784  ;;  %v1622_v1 = vsel %vm1003_vm2, %v5683_v53, -inf }
 0x65a   :  { %v1787_v16 = vpop.permute.xlu1 %1786  ;;  %3973 = vmatpush3.bf16.msra.mxu0 %v1783_v29  ;;  %v1546_v29 = vadd.f32 %v5588_v48, %v5504_v36  ;;  %v5702_v48 = vadd.f32 %v5267_v39, %v5598_v41  ;;  %v5720_v41 = vadd.f32 %v5267_v39, %v5602_v21 }
 0x65b   :  { %3974 = vmatprep.subr.bf16.mxu0 %v1785_v31 }
 0x65c   :  { %v1874_v49 = vpop.permute.xlu0 %1873  ;;  %v5690_v59 = vadd.f32 %v5267_v39, %v1546_v29  ;;  %v1628_v13 = vsel %vm1003_vm2, %v5702_v48, -inf }
 0x65d   :  { %v5650_v51 = vpop.eup %4416  ;;  %3986 = vmatprep.subr.bf16.mxu1 %v1874_v49 }
 0x65e   :  { %v1876_v42 = vpop.permute.xlu1 %1875  ;;  %3975 = vmatpush3.bf16.msra.mxu0 %v1785_v31  ;;  %3987 = vmatpush3.bf16.msra.mxu1 %v1874_v49  ;;  %v1703_v27 = vsel %vm1003_vm2, %v5650_v51, 0.0  ;;  %v1616_v36 = vsel %vm1003_vm2, %v5690_v59, -inf }
 0x65f   :  { %v5659_v62 = vpop.eup %4418  ;;  %1704 = vadd.xlane.f32.xlu1 %v1703_v27  ;;  %3976 = vmatprep.subr.bf16.mxu0 %v1787_v16  ;;  %v1631_v27 = vsel %vm1003_vm2, %v5720_v41, -inf }
 0x660   :  { %3988 = vmatprep.subr.bf16.mxu1 %v1876_v42  ;;  %v1706_v60 = vsel %vm1003_vm2, %v5659_v62, 0.0  ;;  %v5663_v22 = vpop.eup %4420  ;;  %v1880_v31 = vpop.permute.xlu0 %1879 }
 0x661   :  { %1707 = vadd.xlane.f32.xlu0 %v1706_v60  ;;  %v1700_v19 = vsel %vm1003_vm2, %v5663_v22, 0.0  ;;  %v5678_v30 = vpop.eup %4422 }
 0x662   :  { %v5668_v9 = vpop.permute.xlu1 %1970  ;;  %3977 = vmatpush3.bf16.msra.mxu0 %v1787_v16  ;;  %3989 = vmatpush3.bf16.msra.mxu1 %v1876_v42  ;;  %v1709_v24 = vsel %vm1003_vm2, %v5678_v30, 0.0  ;;  %v5696_v16 = vadd.f32 %v5267_v39, %v5596_v40  ;;  %v5716_v40 = vadd.f32 %v5267_v39, %v5600_v58 }
 0x663   :  { %1626 = vmax.xlane.f32.xlu1 %v1625_v10  ;;  %4170 = vmatprep.subr.msk.bf16.mxu0 %vm796_vm1, %v5668_v9 }
 0x664   :  { %v1634_v49 = vsel %vm1003_vm2, %v5696_v16, -inf  ;;  %v1637_v42 = vsel %vm1003_vm2, %v5716_v40, -inf }
 0x665   :  { %1701 = vadd.xlane.f32.xlu0 %v1700_v19 }
 0x666   :  { %v1878_v57 = vpop.permute.xlu1 %1877 }
 0x667   :  { %1620 = vmax.xlane.f32.xlu1 %v1619_v0  ;;  %3990 = vmatprep.subr.bf16.mxu1 %v1878_v57 }
 0x668   :  { %3991 = vmatpush3.bf16.msra.mxu1 %v1878_v57 }
 0x669   :  { %1710 = vadd.xlane.f32.xlu0 %v1709_v24  ;;  %3992 = vmatprep.subr.bf16.mxu1 %v1880_v31 }
 0x66a   :  { %v1973_v60 = vpop.permute.xlu1 %1972 }
 0x66c   :  { %3993 = vmatpush3.bf16.msra.mxu1 %v1880_v31 }
 0x66d   :  { %1623 = vmax.xlane.f32.xlu0 %v1622_v1 }
 0x671   :  { %1617 = vmax.xlane.f32.xlu0 %v1616_v36 }
 0x675   :  { %1635 = vmax.xlane.f32.xlu0 %v1634_v49 }
 0x678   :  { %2075 = vrot.lane.b32.xlu1 %v5123_v45, %s4603_s21 }
 0x679   :  { %1629 = vmax.xlane.f32.xlu0 %v1628_v13  ;;  %v1991_v13 = vsel %vm796_vm1, %v5668_v9, 0 }
 0x67c   :  { %1976 = vrot.lane.b32.xlu1 %v5105_v61, %s4603_s21 }
 0x68f   :  { %1974 = vrot.lane.b32.xlu0 %v5107_v5, %s4603_s21 }
 0x6a0   :  { %1638 = vmax.xlane.f32.xlu1 %v1637_v42 }
 0x6a4   :  { %1632 = vmax.xlane.f32.xlu1 %v1631_v27 }
 0x6ad   :  { %v1696_v10 = vpop.xlane.xlu0 %1695 }
 0x6b1   :  { %v1699_v7 = vpop.xlane.xlu1 %1698  ;;  %v1690_v19 = vpop.xlane.xlu0 %1689 }
 0x6b2   :  { %4424 = vrcp.f32 %v1699_v7 }
 0x6b3   :  { %4426 = vrcp.f32 %v1690_v19 }
 0x6b4   :  { %4428 = vrcp.f32 %v1696_v10 }
 0x6b5   :  { %2077 = vrot.lane.b32.xlu1 %v5121_v18, %s4603_s21  ;;  %v1693_v39 = vpop.xlane.xlu1 %1692 }
 0x6b6   :  { %4430 = vrcp.f32 %v1693_v39 }
 0x6bc   :  { %v4425_v58 = vpop.eup %4424 }
 0x6bd   :  { %v4427_v21 = vpop.eup %4426  ;;  %v1755_v29 = vmul.f32 %v4425_v58, %v5634_v50  ;;  %v1994_v50 = vsel %vm796_vm1, %v1973_v60, 0 }
 0x6be   :  { %v4429_v57 = vpop.eup %4428  ;;  %v1752_v31 = vmul.f32 %v4427_v21, %v5632_v44 }
 0x6bf   :  { %v1754_v1 = vmul.f32 %v4429_v57, %v5628_v17 }
 0x6c0   :  { %v4431_v0 = vpop.eup %4430 }
 0x6c1   :  { %v1753_v24 = vmul.f32 %v4431_v0, %v5640_v38  ;;  %v1769_v49 = vpack.c.bf16 %v1755_v29, %v1754_v1 }
 0x6c3   :  { %v1768_v36 = vpack.c.bf16 %v1753_v24, %v1752_v31 }
 0x6c5   :  { %3978 = vmatprep.mubr.msk.bf16.mxu0 %vm1003_vm2, %v1768_v36 }
 0x6c6   :  { %3979 = vmatmul.mubr.msk.bf16.vlgmr.msra.gmra.mrb[40].mxu0 %vm1003_vm2, %v1769_v49 }
 0x6c7   :  { %4003 = vmatpush3.bf16.xpose.msra.mxu0 %v1991_v13 }
 0x6c8   :  { %4171 = vmatprep.subr.msk.bf16.mxu0 %vm796_vm1, %v1973_v60 }
 0x6cf   :  { %4005 = vmatpush3.bf16.xpose.msra.mxu0 %v1994_v50 }
 0x6ec   :  { %v1705_v44 = vpop.xlane.xlu1 %1704 }
 0x6ed   :  { %4432 = vrcp.f32 %v1705_v44 }
 0x6ee   :  { %v1708_v42 = vpop.xlane.xlu0 %1707 }
 0x6f0   :  { %v1627_v38 = vpop.xlane.xlu1 %1626 }
 0x6f1   :  { %v1651_v57 = vsub.f32 %v5653_v32, %v1627_v38 }
 0x6f2   :  { %v1702_v17 = vpop.xlane.xlu0 %1701 }
 0x6f3   :  { %4434 = vrcp.f32 %v1702_v17  ;;  %v1678_v13 = vmul.f32 1.442695, %v1651_v57 }
 0x6f4   :  { %v1621_v27 = vpop.xlane.xlu1 %1620  ;;  %4436 = vrcp.f32 %v1708_v42 }
 0x6f5   :  { %v1649_v10 = vsub.f32 %v5666_v43, %v1621_v27 }
 0x6f6   :  { %v1711_v7 = vpop.xlane.xlu0 %1710 }
 0x6f7   :  { %v1674_v19 = vmul.f32 1.442695, %v1649_v10  ;;  %4438 = vrcp.f32 %v1711_v7  ;;  %v4433_v39 = vpop.eup %4432 }
 0x6f8   :  { %v5739_v9 = vpop.permute.xlu1 %2075  ;;  %v1757_v31 = vmul.f32 %v4433_v39, %v5650_v51 }
 0x6f9   :  { %4440 = vpow2.f32 %v1674_v19  ;;  %4174 = vmatprep.subr.msk.bf16.mxu1 %vm796_vm1, %v5739_v9 }
 0x6fa   :  { %v1624_v60 = vpop.xlane.xlu0 %1623 }
 0x6fb   :  { %v1650_v58 = vsub.f32 %v5683_v53, %v1624_v60 }
 0x6fc   :  { %v1977_v27 = vpop.permute.xlu1 %1976 }
 0x6fd   :  { %v4435_v21 = vpop.eup %4434  ;;  %v1676_v0 = vmul.f32 1.442695, %v1650_v58  ;;  %v2000_v39 = vsel %vm796_vm1, %v1977_v27, 0 }
 0x6fe   :  { %v1618_v29 = vpop.xlane.xlu0 %1617  ;;  %v1756_v43 = vmul.f32 %v4435_v21, %v5663_v22  ;;  %v4437_v24 = vpop.eup %4436 }
 0x6ff   :  { %4442 = vpow2.f32 %v1676_v0  ;;  %v1648_v1 = vsub.f32 %v5690_v59, %v1618_v29  ;;  %v1758_v44 = vmul.f32 %v4437_v24, %v5659_v62 }
 0x700   :  { %v1770_v36 = vpack.c.bf16 %v1757_v31, %v1756_v43 }
 0x701   :  { %v4439_v49 = vpop.eup %4438  ;;  %v1672_v50 = vmul.f32 1.442695, %v1648_v1 }
 0x702   :  { %3982 = vmatprep.mubr.msk.bf16.mxu0 %vm1003_vm2, %v1770_v36  ;;  %v1636_v53 = vpop.xlane.xlu0 %1635  ;;  %v1759_v32 = vmul.f32 %v4439_v49, %v5678_v30 }
 0x703   :  { %v5751_v42 = vpop.eup %4440  ;;  %4444 = vpow2.f32 %v1672_v50  ;;  %v1654_v58 = vsub.f32 %v5696_v16, %v1636_v53 }
 0x704   :  { %v1715_v51 = vsel %vm1003_vm2, %v5751_v42, 0.0  ;;  %v1771_v22 = vpack.c.bf16 %v1759_v32, %v1758_v44  ;;  %4446 = vpow2.f32 %v1678_v13 }
 0x705   :  { %1716 = vadd.xlane.f32.xlu0 %v1715_v51  ;;  %v1684_v21 = vmul.f32 1.442695, %v1654_v58 }
 0x706   :  { %3983 = vmatmul.mubr.msk.bf16.gmra.mrb[44].mxu0 %vm1003_vm2, %v1771_v22  ;;  %v1630_v59 = vpop.xlane.xlu0 %1629 }
 0x707   :  { %v1652_v57 = vsub.f32 %v5702_v48, %v1630_v59  ;;  %4448 = vpow2.f32 %v1684_v21 }
 0x709   :  { %v5756_v38 = vpop.eup %4442  ;;  %v1680_v0 = vmul.f32 1.442695, %v1652_v57 }
 0x70a   :  { %v1975_v17 = vpop.permute.xlu0 %1974  ;;  %v1718_v62 = vsel %vm1003_vm2, %v5756_v38, 0.0 }
 0x70b   :  { %1719 = vadd.xlane.f32.xlu1 %v1718_v62  ;;  %4172 = vmatprep.subr.msk.bf16.mxu0 %vm796_vm1, %v1975_v17  ;;  %v1997_v30 = vsel %vm796_vm1, %v1975_v17, 0  ;;  %4450 = vpow2.f32 %v1680_v0 }
 0x70c   :  { %4007 = vmatpush3.bf16.xpose.msra.mxu0 %v1997_v30 }
 0x70d   :  { %v5762_v10 = vpop.eup %4444  ;;  %4173 = vmatprep.subr.msk.bf16.mxu0 %vm796_vm1, %v1977_v27 }
 0x70e   :  { %v1712_v7 = vsel %vm1003_vm2, %v5762_v10, 0.0  ;;  %v5767_v19 = vpop.eup %4446 }
 0x70f   :  { %1713 = vadd.xlane.f32.xlu1 %v1712_v7  ;;  %v1721_v60 = vsel %vm1003_vm2, %v5767_v19, 0.0 }
 0x711   :  { %v5780_v36 = vpop.eup %4448 }
 0x712   :  { %v1730_v49 = vsel %vm1003_vm2, %v5780_v36, 0.0 }
 0x713   :  { %1722 = vadd.xlane.f32.xlu1 %v1721_v60 }
 0x714   :  { %4009 = vmatpush3.bf16.xpose.msra.mxu0 %v2000_v39 }
 0x715   :  { %v5784_v13 = vpop.eup %4450 }
 0x716   :  { %v1724_v48 = vsel %vm1003_vm2, %v5784_v13, 0.0 }
 0x71b   :  { %1962 = vrot.lane.b32.xlu0 %v5085_v3, %s4603_s21 }
 0x724   :  { %1964 = vrot.lane.b32.xlu1 %v5081_v55, %s4603_s21 }
 0x72d   :  { %v1639_v29 = vpop.xlane.xlu1 %1638 }
 0x72e   :  { %v1655_v43 = vsub.f32 %v5716_v40, %v1639_v29 }
 0x730   :  { %v1686_v31 = vmul.f32 1.442695, %v1655_v43 }
 0x731   :  { %v1633_v24 = vpop.xlane.xlu1 %1632 }
 0x732   :  { %v1653_v1 = vsub.f32 %v5720_v41, %v1633_v24  ;;  %4452 = vpow2.f32 %v1686_v31 }
 0x734   :  { %v1682_v16 = vmul.f32 1.442695, %v1653_v1 }
 0x735   :  { %v2078_v32 = vpop.permute.xlu1 %2077 }
 0x736   :  { %4454 = vpow2.f32 %v1682_v16 }
 0x73a   :  { %1731 = vadd.xlane.f32.xlu0 %v1730_v49 }
 0x73c   :  { %v5788_v40 = vpop.eup %4452 }
 0x73d   :  { %v1733_v41 = vsel %vm1003_vm2, %v5788_v40, 0.0 }
 0x73e   :  { %1725 = vadd.xlane.f32.xlu0 %v1724_v48  ;;  %v2096_v48 = vsel %vm796_vm1, %v5739_v9, 0 }
 0x740   :  { %v5792_v50 = vpop.eup %4454 }
 0x741   :  { %v1727_v53 = vsel %vm1003_vm2, %v5792_v50, 0.0 }
 0x742   :  { %1734 = vadd.xlane.f32.xlu0 %v1733_v41 }
 0x748   :  { %1728 = vadd.xlane.f32.xlu1 %v1727_v53 }
 0x758   :  { %2079 = vrot.lane.b32.xlu0 %v5143_v47, %s4603_s21 }
 0x759   :  { %2081 = vrot.lane.b32.xlu1 %v5139_v20, %s4603_s21 }
 0x75c   :  { %2067 = vrot.lane.b32.xlu0 %v5052_v4, %s4603_s21 }
 0x75d   :  { %2069 = vrot.lane.b32.xlu1 %v5050_v2, %s4603_s21 }
 0x760   :  { %1966 = vrot.lane.b32.xlu0 %v5111_v6, %s4603_s21 }
 0x761   :  { %1968 = vrot.lane.b32.xlu1 %v5109_v11, %s4603_s21 }
 0x764   :  { %2071 = vrot.lane.b32.xlu0 %v5062_v35, %s4603_s21 }
 0x765   :  { %2073 = vrot.lane.b32.xlu1 %v5060_v15, %s4603_s21 }
 0x792   :  { %v1717_v44 = vpop.xlane.xlu0 %1716 }
 0x793   :  { %4456 = vrcp.f32 %v1717_v44 }
 0x796   :  { %v1963_v51 = vpop.permute.xlu0 %1962 }
 0x797   :  { %4010 = vmatprep.mubr.msk.bf16.mxu0 %vm796_vm1, %v1963_v51 }
 0x798   :  { %v1720_v22 = vpop.xlane.xlu1 %1719 }
 0x799   :  { %v5813_v59 = vpop.f32.mrb[40].mxu0 }
 0x79a   :  { %v5815_v17 = vpop.f32.mrb[41].mxu0 }
 0x79b   :  { %v5817_v62 = vpop.f32.mrb[42].mxu0 }
 0x79c   :  { %v5821_v27 = vpop.f32.mrb[43].mxu0  ;;  %v1714_v7 = vpop.xlane.xlu1 %1713 }
 0x79d   :  { %4458 = vrcp.f32 %v1714_v7  ;;  %v4457_v21 = vpop.eup %4456 }
 0x79e   :  { %4460 = vrcp.f32 %v1720_v22  ;;  %v1761_v29 = vmul.f32 %v4457_v21, %v5751_v42  ;;  %v2099_v42 = vsel %vm796_vm1, %v2078_v32, 0 }
 0x7a0   :  { %v1723_v39 = vpop.xlane.xlu1 %1722 }
 0x7a1   :  { %4462 = vrcp.f32 %v1723_v39 }
 0x7a4   :  { %v1965_v58 = vpop.permute.xlu1 %1964 }
 0x7a5   :  { %4011 = vmatmul.mubr.msk.bf16.vlgmr.msra.gmra.mrb[48].mxu0 %vm796_vm1, %v1965_v58 }
 0x7a7   :  { %v4459_v57 = vpop.eup %4458 }
 0x7a8   :  { %v1760_v0 = vmul.f32 %v4459_v57, %v5762_v10  ;;  %v4461_v43 = vpop.eup %4460 }
 0x7a9   :  { %v1762_v1 = vmul.f32 %v4461_v43, %v5756_v38 }
 0x7aa   :  { %v1772_v31 = vpack.c.bf16 %v1761_v29, %v1760_v0 }
 0x7ab   :  { %v4463_v24 = vpop.eup %4462 }
 0x7ac   :  { %v1763_v16 = vmul.f32 %v4463_v24, %v5767_v19  ;;  %3994 = vmatprep.mubr.msk.bf16.mxu1 %vm1003_vm2, %v1772_v31 }
 0x7ae   :  { %v1773_v49 = vpack.c.bf16 %v1763_v16, %v1762_v1 }
 0x7b0   :  { %3995 = vmatmul.mubr.msk.bf16.vlgmr.msra.gmra.mrb[56].mxu1 %vm1003_vm2, %v1773_v49 }
 0x7b1   :  { %4019 = vmatpush3.bf16.xpose.msra.mxu1 %v2096_v48 }
 0x7b2   :  { %4175 = vmatprep.subr.msk.bf16.mxu1 %vm796_vm1, %v2078_v32 }
 0x7b9   :  { %4021 = vmatpush3.bf16.xpose.msra.mxu1 %v2099_v42 }
 0x7c7   :  { %v1732_v10 = vpop.xlane.xlu0 %1731 }
 0x7cb   :  { %v1726_v41 = vpop.xlane.xlu0 %1725 }
 0x7cf   :  { %v1735_v53 = vpop.xlane.xlu0 %1734 }
 0x7d0   :  { %4464 = vrcp.f32 %v1735_v53 }
 0x7d1   :  { %4466 = vrcp.f32 %v1726_v41 }
 0x7d2   :  { %4468 = vrcp.f32 %v1732_v10 }
 0x7d3   :  { %v2080_v38 = vpop.permute.xlu0 %2079 }
 0x7d4   :  { %4176 = vmatprep.subr.msk.bf16.mxu1 %vm796_vm1, %v2080_v38  ;;  %v2102_v19 = vsel %vm796_vm1, %v2080_v38, 0 }
 0x7d5   :  { %v1729_v44 = vpop.xlane.xlu1 %1728  ;;  %4023 = vmatpush3.bf16.xpose.msra.mxu1 %v2102_v19 }
 0x7d6   :  { %4470 = vrcp.f32 %v1729_v44  ;;  %v5877_v44 = vld [vmem:[%s6698_s2 + $0x88] sm:$0xff] }
 0x7d7   :  { %v2068_v9 = vpop.permute.xlu0 %2067 }
 0x7d9   :  { %v5838_v51 = vpop.f32.mrb[44].mxu0  ;;  %v2082_v22 = vpop.permute.xlu1 %2081 }
 0x7da   :  { %v5840_v32 = vpop.f32.mrb[45].mxu0  ;;  %4177 = vmatprep.subr.msk.bf16.mxu1 %vm796_vm1, %v2082_v22  ;;  %v2105_v57 = vsel %vm796_vm1, %v2082_v22, 0  ;;  %v4465_v0 = vpop.eup %4464 }
 0x7db   :  { %v5843_v7 = vpop.f32.mrb[46].mxu0  ;;  %v1967_v39 = vpop.permute.xlu0 %1966  ;;  %v1767_v16 = vmul.f32 %v4465_v0, %v5788_v40  ;;  %v5872_v40 = vld [vmem:[%s6698_s2 + $0x80] sm:$0xff] }
 0x7dc   :  { %v5847_v21 = vpop.f32.mrb[47].mxu0  ;;  %4014 = vmatprep.mubr.msk.bf16.mxu0 %vm796_vm1, %v1967_v39  ;;  %v4467_v31 = vpop.eup %4466 }
 0x7dd   :  { %v2070_v43 = vpop.permute.xlu1 %2069  ;;  %4025 = vmatpush3.bf16.xpose.msra.mxu1 %v2105_v57  ;;  %v4469_v24 = vpop.eup %4468  ;;  %v1764_v48 = vmul.f32 %v4467_v31, %v5784_v13  ;;  %v5884_v57 = vld [vmem:[%s6698_s2 + $0x98] sm:$0xff] }
 0x7de   :  { %v1766_v10 = vmul.f32 %v4469_v24, %v5780_v36  ;;  %v5867_v36 = vld [vmem:[%s6698_s2 + $0x90] sm:$0xff] }
 0x7df   :  { %v2072_v38 = vpop.permute.xlu0 %2071 }
 0x7e0   :  { %v4471_v1 = vpop.eup %4470  ;;  %v1775_v53 = vpack.c.bf16 %v1767_v16, %v1766_v10 }
 0x7e1   :  { %v1969_v49 = vpop.permute.xlu1 %1968  ;;  %v1765_v42 = vmul.f32 %v4471_v1, %v5792_v50 }
 0x7e2   :  { %4015 = vmatmul.mubr.msk.bf16.gmra.mrb[52].mxu0 %vm796_vm1, %v1969_v49 }
 0x7e3   :  { %v1774_v41 = vpack.c.bf16 %v1765_v42, %v1764_v48 }
 0x7e5   :  { %3998 = vmatprep.mubr.msk.bf16.mxu1 %vm1003_vm2, %v1774_v41  ;;  %v2074_v13 = vpop.permute.xlu1 %2073 }
 0x7e6   :  { %3999 = vmatmul.mubr.msk.bf16.gmra.mrb[60].mxu1 %vm1003_vm2, %v1775_v53 }
 0x7e7   :  { %4026 = vmatprep.mubr.msk.bf16.mxu1 %vm796_vm1, %v2068_v9 }
 0x7ee   :  { %4027 = vmatmul.mubr.msk.bf16.vlgmr.msra.gmra.mrb[64].mxu1 %vm796_vm1, %v2070_v43  ;;  %v5889_v43 = vld [vmem:[%s6699_s3] ss:$0 sm:$0xff] }
 0x7ef   :  { %4030 = vmatprep.mubr.msk.bf16.mxu1 %vm796_vm1, %v2072_v38 }
 0x7f6   :  { %4031 = vmatmul.mubr.msk.bf16.gmra.mrb[68].mxu1 %vm796_vm1, %v2074_v13 }
 0x878   :  { %v4012_v50 = vpop.f32.mrb[48].mxu0 }
 0x879   :  { %v2036_v19 = vpop.f32.mrb[49].mxu0  ;;  %v2045_v9 = vadd.f32 %v4012_v50, %v5867_v36 }
 0x87a   :  { %v2037_v22 = vadd.f32 %v2036_v19, %v5872_v40  ;;  %v4013_v39 = vpop.f32.mrb[50].mxu0 }
 0x87b   :  { %v2039_v0 = vpop.f32.mrb[51].mxu0  ;;  %v5896_v1 = vadd.f32 %v5889_v43, %v2045_v9  ;;  %v2048_v16 = vadd.f32 %v4013_v39, %v5884_v57  ;;  %v754_v39 = vld [vmem:[%s6698_s2 + $0xb0] sm:$0xff] }
 0x87c   :  { %v5892_v31 = vadd.f32 %v5889_v43, %v2037_v22  ;;  %v2040_v24 = vadd.f32 %v2039_v0, %v5877_v44  ;;  %v752_v0 = vld [vmem:[%s6698_s2 + $0xa0] sm:$0xff] }
 0x87d   :  { %v5907_v10 = vadd.f32 %v5889_v43, %v2048_v16  ;;  %v2194_v41 = vsel %vm1003_vm2, %v5896_v1, -inf }
 0x87e   :  { %v5900_v49 = vadd.f32 %v5889_v43, %v2040_v24  ;;  %v2188_v48 = vsel %vm1003_vm2, %v5892_v31, -inf }
 0x87f   :  { %2189 = vmax.xlane.f32.xlu0 %v2188_v48  ;;  %v2197_v9 = vsel %vm1003_vm2, %v5907_v10, -inf  ;;  %v755_v48 = vld [vmem:[%s6698_s2 + $0xb8] sm:$0xff] }
 0x880   :  { %v2191_v42 = vsel %vm1003_vm2, %v5900_v49, -inf }
 0x881   :  { %2192 = vmax.xlane.f32.xlu1 %v2191_v42  ;;  %v753_v42 = vld [vmem:[%s6698_s2 + $0xa8] sm:$0xff] }
 0x883   :  { %v5911_v53 = vpop.f32.mrb[56].mxu1  ;;  %2195 = vmax.xlane.f32.xlu0 %v2194_v41 }
 0x884   :  { %v5913_v38 = vpop.f32.mrb[57].mxu1 }
 0x885   :  { %6733 = vst [vmem:[#allocation18_spill] sm:$0xff] %v5913_v38  ;;  %v5915_v13 = vpop.f32.mrb[58].mxu1 }
 0x886   :  { %v5919_v19 = vpop.f32.mrb[59].mxu1 }
 0x887   :  { %6734 = vst [vmem:[#allocation19_spill] sm:$0xff] %v5919_v19  ;;  %2198 = vmax.xlane.f32.xlu0 %v2197_v9 }
 0x8b5   :  { %v4016_v24 = vpop.f32.mrb[52].mxu0 }
 0x8b6   :  { %v2052_v16 = vpop.f32.mrb[53].mxu0  ;;  %v2061_v41 = vadd.f32 %v4016_v24, %v754_v39 }
 0x8b7   :  { %v2053_v9 = vadd.f32 %v2052_v16, %v752_v0  ;;  %v4017_v22 = vpop.f32.mrb[54].mxu0 }
 0x8b8   :  { %v2055_v50 = vpop.f32.mrb[55].mxu0  ;;  %v2064_v58 = vadd.f32 %v4017_v22, %v755_v48  ;;  %v5945_v52 = vadd.f32 %v5889_v43, %v2061_v41 }
 0x8b9   :  { %v5938_v29 = vadd.f32 %v5889_v43, %v2053_v9  ;;  %v2056_v60 = vadd.f32 %v2055_v50, %v753_v42  ;;  %v5940_v30 = vpop.f32.mrb[60].mxu1 }
 0x8ba   :  { %6735 = vst [vmem:[#allocation20_spill] sm:$0xff] %v5940_v30  ;;  %v5942_v12 = vpop.f32.mrb[61].mxu1  ;;  %v5959_v50 = vadd.f32 %v5889_v43, %v2064_v58  ;;  %v2206_v9 = vsel %vm1003_vm2, %v5945_v52, -inf }
 0x8bb   :  { %6736 = vst [vmem:[#allocation21_spill] sm:$0xff] %v5942_v12  ;;  %v5948_v54 = vadd.f32 %v5889_v43, %v2056_v60  ;;  %v5950_v8 = vpop.f32.mrb[62].mxu1  ;;  %v2200_v24 = vsel %vm1003_vm2, %v5938_v29, -inf }
 0x8bc   :  { %6737 = vst [vmem:[#allocation22_spill] sm:$0xff] %v5950_v8  ;;  %v5956_v22 = vpop.f32.mrb[63].mxu1  ;;  %2201 = vmax.xlane.f32.xlu0 %v2200_v24  ;;  %v2209_v16 = vsel %vm1003_vm2, %v5959_v50, -inf }
 0x8bd   :  { %6738 = vst [vmem:[#allocation23_spill] sm:$0xff] %v5956_v22  ;;  %v2203_v60 = vsel %vm1003_vm2, %v5948_v54, -inf }
 0x8be   :  { %2204 = vmax.xlane.f32.xlu1 %v2203_v60 }
 0x8c0   :  { %2207 = vmax.xlane.f32.xlu0 %v2206_v9 }
 0x8c1   :  { %v5967_v23 = vpop.f32.mrb[64].mxu1 }
 0x8c2   :  { %v5971_v24 = vpop.f32.mrb[65].mxu1  ;;  %2210 = vmax.xlane.f32.xlu1 %v2209_v16 }
 0x8c3   :  { %v5973_v58 = vpop.f32.mrb[66].mxu1 }
 0x8c4   :  { %v5975_v30 = vpop.f32.mrb[67].mxu1 }
 0x8c9   :  { %v4032_v41 = vpop.f32.mrb[68].mxu1 }
 0x8ca   :  { %v5977_v12 = vadd.f32 %v4032_v41, %v754_v39  ;;  %v2157_v60 = vpop.f32.mrb[69].mxu1 }
 0x8cb   :  { %v5979_v22 = vadd.f32 %v2157_v60, %v752_v0  ;;  %v4033_v8 = vpop.f32.mrb[70].mxu1 }
 0x8cc   :  { %v5981_v9 = vadd.f32 %v4033_v8, %v755_v48  ;;  %v2160_v38 = vpop.f32.mrb[71].mxu1 }
 0x8cd   :  { %v5983_v19 = vadd.f32 %v2160_v38, %v753_v42 }
 0x8d3   :  { %2374 = vrot.lane.b32.xlu1 %v5173_v28, %s4603_s21 }
 0x8d6   :  { %2372 = vrot.lane.b32.xlu0 %v5175_v56, %s4603_s21 }
 0x8d7   :  { %2378 = vrot.lane.b32.xlu1 %v5179_v63, %s4603_s21 }
 0x8da   :  { %2376 = vrot.lane.b32.xlu0 %v5182_v37, %s4603_s21 }
 0x8db   :  { %2463 = vrot.lane.b32.xlu1 %v5185_v14, %s4603_s21 }
 0x8de   :  { %2461 = vrot.lane.b32.xlu0 %v5188_v26, %s4603_s21 }
 0x8df   :  { %2558 = vrot.lane.b32.xlu1 %v5079_v46, %s4604_s15 }
 0x8e2   :  { %2467 = vrot.lane.b32.xlu0 %v5191_v33, %s4603_s21 }
 0x8e3   :  { %2465 = vrot.lane.b32.xlu1 %v5194_v34, %s4603_s21 }
 0x8e6   :  { %2562 = vrot.lane.b32.xlu0 %v5107_v5, %s4604_s15 }
 0x8e7   :  { %2560 = vrot.lane.b32.xlu1 %v5077_v25, %s4604_s15 }
 0x8eb   :  { %2663 = vrot.lane.b32.xlu1 %v5123_v45, %s4604_s15 }
 0x8ef   :  { %2564 = vrot.lane.b32.xlu1 %v5105_v61, %s4604_s15 }
 0x8f3   :  { %2665 = vrot.lane.b32.xlu1 %v5121_v18, %s4604_s15 }
 0x90c   :  { %v2190_v46 = vpop.xlane.xlu0 %2189 }
 0x90d   :  { %v2236_v8 = vsub.f32 %v5892_v31, %v2190_v46 }
 0x90e   :  { %v2193_v38 = vpop.xlane.xlu1 %2192 }
 0x90f   :  { %v2252_v5 = vmul.f32 1.442695, %v2236_v8  ;;  %v2237_v48 = vsub.f32 %v5900_v49, %v2193_v38 }
 0x910   :  { %v2196_v39 = vpop.xlane.xlu0 %2195 }
 0x911   :  { %v2238_v0 = vsub.f32 %v5896_v1, %v2196_v39  ;;  %v2254_v61 = vmul.f32 1.442695, %v2237_v48 }
 0x913   :  { %v2256_v25 = vmul.f32 1.442695, %v2238_v0 }
 0x914   :  { %v2199_v42 = vpop.xlane.xlu0 %2198 }
 0x915   :  { %4472 = vpow2.f32 %v2256_v25  ;;  %v2239_v45 = vsub.f32 %v5907_v10, %v2199_v42 }
 0x916   :  { %4474 = vpow2.f32 %v2252_v5 }
 0x917   :  { %v2258_v16 = vmul.f32 1.442695, %v2239_v45 }
 0x919   :  { %4476 = vpow2.f32 %v2258_v16 }
 0x91a   :  { %4478 = vpow2.f32 %v2254_v61 }
 0x91f   :  { %v6017_v18 = vpop.eup %4472 }
 0x920   :  { %v2290_v31 = vsel %vm1003_vm2, %v6017_v18, 0.0  ;;  %v6021_v41 = vpop.eup %4474 }
 0x921   :  { %2291 = vadd.xlane.f32.xlu0 %v2290_v31  ;;  %v2284_v49 = vsel %vm1003_vm2, %v6021_v41, 0.0 }
 0x923   :  { %v6023_v1 = vpop.eup %4476 }
 0x924   :  { %v2293_v10 = vsel %vm1003_vm2, %v6023_v1, 0.0  ;;  %v6029_v60 = vpop.eup %4478 }
 0x925   :  { %2285 = vadd.xlane.f32.xlu0 %v2284_v49  ;;  %2294 = vadd.xlane.f32.xlu1 %v2293_v10  ;;  %v2287_v46 = vsel %vm1003_vm2, %v6029_v60, 0.0 }
 0x929   :  { %2288 = vadd.xlane.f32.xlu1 %v2287_v46 }
 0x949   :  { %v2202_v8 = vpop.xlane.xlu0 %2201 }
 0x94a   :  { %v2240_v39 = vsub.f32 %v5938_v29, %v2202_v8 }
 0x94b   :  { %v2205_v38 = vpop.xlane.xlu1 %2204 }
 0x94c   :  { %v2241_v0 = vsub.f32 %v5948_v54, %v2205_v38  ;;  %v2260_v45 = vmul.f32 1.442695, %v2240_v39  ;;  %v2153_v54 = vadd.f32 %v5973_v58, %v5884_v57  ;;  %v2145_v39 = vadd.f32 %v5975_v30, %v5877_v44 }
 0x94d   :  { %v2208_v5 = vpop.xlane.xlu0 %2207 }
 0x94e   :  { %v2262_v48 = vmul.f32 1.442695, %v2241_v0  ;;  %v2242_v25 = vsub.f32 %v5945_v52, %v2208_v5 }
 0x94f   :  { %v2211_v42 = vpop.xlane.xlu1 %2210 }
 0x950   :  { %4480 = vpow2.f32 %v2262_v48  ;;  %v2264_v61 = vmul.f32 1.442695, %v2242_v25  ;;  %v2243_v16 = vsub.f32 %v5959_v50, %v2211_v42  ;;  %v6044_v50 = vld [vmem:[%s6699_s3 + $0x1] ss:$0 sm:$0xff]  ;;  %v2150_v42 = vadd.f32 %v5967_v23, %v5867_v36 }
 0x951   :  { %v2373_v31 = vpop.permute.xlu0 %2372  ;;  %v6047_v38 = vadd.f32 %v6044_v50, %v2153_v54  ;;  %v6060_v25 = vadd.f32 %v6044_v50, %v2145_v39  ;;  %v2142_v23 = vadd.f32 %v5971_v24, %v5872_v40 }
 0x952   :  { %4482 = vpow2.f32 %v2264_v61  ;;  %4034 = vmatprep.subr.bf16.mxu0 %v2373_v31  ;;  %v2266_v10 = vmul.f32 1.442695, %v2243_v16  ;;  %v6076_v16 = vadd.f32 %v6044_v50, %v5981_v9  ;;  %v6089_v9 = vadd.f32 %v6044_v50, %v5983_v19 }
 0x953   :  { %v2375_v49 = vpop.permute.xlu1 %2374  ;;  %4035 = vmatpush3.bf16.msra.mxu0 %v2373_v31  ;;  %4484 = vpow2.f32 %v2260_v45  ;;  %v2221_v44 = vsel %vm1003_vm2, %v6047_v38, -inf  ;;  %v6106_v19 = vadd.f32 %v6044_v50, %v5977_v12 }
 0x954   :  { %4036 = vmatprep.subr.bf16.mxu0 %v2375_v49  ;;  %4486 = vpow2.f32 %v2266_v10  ;;  %v6081_v10 = vadd.f32 %v6044_v50, %v2150_v42  ;;  %v2227_v39 = vsel %vm1003_vm2, %v6089_v9, -inf }
 0x955   :  { %v2377_v29 = vpop.permute.xlu0 %2376 }
 0x956   :  { %v2218_v40 = vsel %vm1003_vm2, %v6081_v10, -inf }
 0x957   :  { %v2379_v46 = vpop.permute.xlu1 %2378  ;;  %4037 = vmatpush3.bf16.msra.mxu0 %v2375_v49  ;;  %v2215_v49 = vsel %vm1003_vm2, %v6060_v25, -inf }
 0x958   :  { %4038 = vmatprep.subr.bf16.mxu0 %v2377_v29 }
 0x959   :  { %v2462_v52 = vpop.permute.xlu0 %2461 }
 0x95a   :  { %v6039_v8 = vpop.eup %4480  ;;  %4050 = vmatprep.subr.bf16.mxu1 %v2462_v52 }
 0x95b   :  { %v2464_v57 = vpop.permute.xlu1 %2463  ;;  %4039 = vmatpush3.bf16.msra.mxu0 %v2377_v29  ;;  %4051 = vmatpush3.bf16.msra.mxu1 %v2462_v52  ;;  %v2299_v58 = vsel %vm1003_vm2, %v6039_v8, 0.0  ;;  %v6094_v52 = vadd.f32 %v6044_v50, %v2142_v23 }
 0x95c   :  { %v6053_v0 = vpop.eup %4482  ;;  %2300 = vadd.xlane.f32.xlu1 %v2299_v58  ;;  %4040 = vmatprep.subr.bf16.mxu0 %v2379_v46  ;;  %v6112_v58 = vadd.f32 %v6044_v50, %v5979_v22 }
 0x95d   :  { %4052 = vmatprep.subr.bf16.mxu1 %v2464_v57  ;;  %v2302_v5 = vsel %vm1003_vm2, %v6053_v0, 0.0  ;;  %v6057_v48 = vpop.eup %4484  ;;  %v2468_v36 = vpop.permute.xlu0 %2467 }
 0x95e   :  { %2303 = vadd.xlane.f32.xlu0 %v2302_v5  ;;  %v2296_v45 = vsel %vm1003_vm2, %v6057_v48, 0.0  ;;  %v6072_v61 = vpop.eup %4486  ;;  %v2230_v5 = vsel %vm1003_vm2, %v6106_v19, -inf }
 0x95f   :  { %v6062_v30 = vpop.permute.xlu1 %2558  ;;  %4041 = vmatpush3.bf16.msra.mxu0 %v2379_v46  ;;  %4053 = vmatpush3.bf16.msra.mxu1 %v2464_v57  ;;  %v2305_v29 = vsel %vm1003_vm2, %v6072_v61, 0.0  ;;  %v2233_v46 = vsel %vm1003_vm2, %v6076_v16, -inf  ;;  %v2212_v57 = vsel %vm1003_vm2, %v6094_v52, -inf }
 0x960   :  { %2222 = vmax.xlane.f32.xlu1 %v2221_v44  ;;  %4178 = vmatprep.subr.msk.bf16.mxu0 %vm796_vm1, %v6062_v30  ;;  %v2224_v44 = vsel %vm1003_vm2, %v6112_v58, -inf }
 0x961   :  { %v2563_v42 = vpop.permute.xlu0 %2562 }
 0x962   :  { %2297 = vadd.xlane.f32.xlu0 %v2296_v45 }
 0x963   :  { %v2466_v31 = vpop.permute.xlu1 %2465 }
 0x964   :  { %2216 = vmax.xlane.f32.xlu1 %v2215_v49  ;;  %4054 = vmatprep.subr.bf16.mxu1 %v2466_v31 }
 0x965   :  { %4055 = vmatpush3.bf16.msra.mxu1 %v2466_v31 }
 0x966   :  { %2306 = vadd.xlane.f32.xlu0 %v2305_v29  ;;  %4056 = vmatprep.subr.bf16.mxu1 %v2468_v36 }
 0x967   :  { %v2561_v54 = vpop.permute.xlu1 %2560 }
 0x968   :  { %2234 = vmax.xlane.f32.xlu1 %v2233_v46 }
 0x969   :  { %4057 = vmatpush3.bf16.msra.mxu1 %v2468_v36 }
 0x96a   :  { %2219 = vmax.xlane.f32.xlu0 %v2218_v40 }
 0x96b   :  { %v6098_v24 = vpop.permute.xlu1 %2663 }
 0x96c   :  { %2228 = vmax.xlane.f32.xlu1 %v2227_v39  ;;  %4182 = vmatprep.subr.msk.bf16.mxu1 %vm796_vm1, %v6098_v24 }
 0x96e   :  { %2213 = vmax.xlane.f32.xlu0 %v2212_v57 }
 0x96f   :  { %v2565_v12 = vpop.permute.xlu1 %2564 }
 0x972   :  { %2231 = vmax.xlane.f32.xlu0 %v2230_v5 }
 0x973   :  { %v6122_v45 = vpop.permute.xlu1 %2665 }
 0x976   :  { %2225 = vmax.xlane.f32.xlu0 %v2224_v44 }
 0x97d   :  { %2552 = vrot.lane.b32.xlu1 %v5081_v55, %s4604_s15 }
 0x98c   :  { %2550 = vrot.lane.b32.xlu0 %v5085_v3, %s4604_s15 }
 0x9ae   :  { %v2292_v22 = vpop.xlane.xlu0 %2291 }
 0x9b2   :  { %v2295_v31 = vpop.xlane.xlu1 %2294  ;;  %v2286_v49 = vpop.xlane.xlu0 %2285 }
 0x9b3   :  { %4488 = vrcp.f32 %v2295_v31 }
 0x9b4   :  { %4490 = vrcp.f32 %v2286_v49 }
 0x9b5   :  { %4492 = vrcp.f32 %v2292_v22  ;;  %v2579_v22 = vsel %vm796_vm1, %v6062_v30, 0 }
 0x9b6   :  { %v2289_v23 = vpop.xlane.xlu1 %2288 }
 0x9b7   :  { %4494 = vrcp.f32 %v2289_v23 }
 0x9bd   :  { %v4489_v36 = vpop.eup %4488 }
 0x9be   :  { %v4491_v29 = vpop.eup %4490  ;;  %v2351_v55 = vmul.f32 %v4489_v36, %v6023_v1  ;;  %v2582_v1 = vsel %vm796_vm1, %v2561_v54, 0 }
 0x9bf   :  { %v4493_v46 = vpop.eup %4492  ;;  %v2348_v3 = vmul.f32 %v4491_v29, %v6021_v41  ;;  %v2585_v41 = vsel %vm796_vm1, %v2563_v42, 0 }
 0x9c0   :  { %v2350_v57 = vmul.f32 %v4493_v46, %v6017_v18  ;;  %v2588_v18 = vsel %vm796_vm1, %v2565_v12, 0 }
 0x9c1   :  { %v4495_v40 = vpop.eup %4494 }
 0x9c2   :  { %v2349_v39 = vmul.f32 %v4495_v40, %v6029_v60  ;;  %v2365_v44 = vpack.c.bf16 %v2351_v55, %v2350_v57 }
 0x9c4   :  { %v2364_v5 = vpack.c.bf16 %v2349_v39, %v2348_v3 }
 0x9c6   :  { %4042 = vmatprep.mubr.msk.bf16.mxu0 %vm1003_vm2, %v2364_v5 }
 0x9c7   :  { %4043 = vmatmul.mubr.msk.bf16.vlgmr.msra.gmra.mrb[56].mxu0 %vm1003_vm2, %v2365_v44 }
 0x9c8   :  { %4067 = vmatpush3.bf16.xpose.msra.mxu0 %v2579_v22 }
 0x9c9   :  { %4179 = vmatprep.subr.msk.bf16.mxu0 %vm796_vm1, %v2561_v54 }
 0x9d0   :  { %4069 = vmatpush3.bf16.xpose.msra.mxu0 %v2582_v1 }
 0x9d1   :  { %4180 = vmatprep.subr.msk.bf16.mxu0 %vm796_vm1, %v2563_v42 }
 0x9d8   :  { %4071 = vmatpush3.bf16.xpose.msra.mxu0 %v2585_v41 }
 0x9d9   :  { %4181 = vmatprep.subr.msk.bf16.mxu0 %vm796_vm1, %v2565_v12 }
 0x9e0   :  { %4073 = vmatpush3.bf16.xpose.msra.mxu0 %v2588_v18 }
 0x9e9   :  { %v2301_v60 = vpop.xlane.xlu1 %2300 }
 0x9ea   :  { %4496 = vrcp.f32 %v2301_v60 }
 0x9eb   :  { %v2304_v31 = vpop.xlane.xlu0 %2303 }
 0x9ed   :  { %v2223_v49 = vpop.xlane.xlu1 %2222 }
 0x9ee   :  { %v2247_v55 = vsub.f32 %v6047_v38, %v2223_v49 }
 0x9ef   :  { %v2298_v30 = vpop.xlane.xlu0 %2297 }
 0x9f0   :  { %4498 = vrcp.f32 %v2298_v30  ;;  %v2274_v41 = vmul.f32 1.442695, %v2247_v55 }
 0x9f1   :  { %v2217_v23 = vpop.xlane.xlu1 %2216  ;;  %4500 = vrcp.f32 %v2304_v31 }
 0x9f2   :  { %v2245_v54 = vsub.f32 %v6060_v25, %v2217_v23 }
 0x9f3   :  { %v2307_v36 = vpop.xlane.xlu0 %2306 }
 0x9f4   :  { %v2270_v29 = vmul.f32 1.442695, %v2245_v54  ;;  %4502 = vrcp.f32 %v2307_v36  ;;  %v4497_v46 = vpop.eup %4496 }
 0x9f5   :  { %v2353_v5 = vmul.f32 %v4497_v46, %v6039_v8  ;;  %v2235_v18 = vpop.xlane.xlu1 %2234 }
 0x9f6   :  { %4504 = vpow2.f32 %v2270_v29 }
 0x9f7   :  { %v2220_v42 = vpop.xlane.xlu0 %2219 }
 0x9f8   :  { %v2246_v40 = vsub.f32 %v6081_v10, %v2220_v42 }
 0x9f9   :  { %v2229_v30 = vpop.xlane.xlu1 %2228 }
 0x9fa   :  { %v4499_v12 = vpop.eup %4498  ;;  %v2272_v3 = vmul.f32 1.442695, %v2246_v40 }
 0x9fb   :  { %v2214_v39 = vpop.xlane.xlu0 %2213  ;;  %v2352_v57 = vmul.f32 %v4499_v12, %v6057_v48  ;;  %v4501_v44 = vpop.eup %4500 }
 0x9fc   :  { %4506 = vpow2.f32 %v2272_v3  ;;  %v2244_v25 = vsub.f32 %v6094_v52, %v2214_v39  ;;  %v2354_v38 = vmul.f32 %v4501_v44, %v6053_v0  ;;  %v2251_v3 = vsub.f32 %v6076_v16, %v2235_v18 }
 0x9fd   :  { %v2366_v22 = vpack.c.bf16 %v2353_v5, %v2352_v57  ;;  %v2553_v36 = vpop.permute.xlu1 %2552  ;;  %v2249_v5 = vsub.f32 %v6089_v9, %v2229_v30 }
 0x9fe   :  { %v4503_v1 = vpop.eup %4502  ;;  %v2268_v60 = vmul.f32 1.442695, %v2244_v25  ;;  %v2282_v57 = vmul.f32 1.442695, %v2251_v3 }
 0x9ff   :  { %4046 = vmatprep.mubr.msk.bf16.mxu0 %vm1003_vm2, %v2366_v22  ;;  %v2232_v10 = vpop.xlane.xlu0 %2231  ;;  %v2355_v31 = vmul.f32 %v4503_v1, %v6072_v61 }
 0xa00   :  { %v6147_v49 = vpop.eup %4504  ;;  %4508 = vpow2.f32 %v2268_v60  ;;  %v2250_v40 = vsub.f32 %v6106_v19, %v2232_v10 }
 0xa01   :  { %v2311_v8 = vsel %vm1003_vm2, %v6147_v49, 0.0  ;;  %v2367_v48 = vpack.c.bf16 %v2355_v31, %v2354_v38  ;;  %4510 = vpow2.f32 %v2274_v41 }
 0xa02   :  { %2312 = vadd.xlane.f32.xlu0 %v2311_v8  ;;  %v2280_v12 = vmul.f32 1.442695, %v2250_v40 }
 0xa03   :  { %4047 = vmatmul.mubr.msk.bf16.gmra.mrb[60].mxu0 %vm1003_vm2, %v2367_v48  ;;  %v2226_v52 = vpop.xlane.xlu0 %2225 }
 0xa04   :  { %v2248_v55 = vsub.f32 %v6112_v58, %v2226_v52  ;;  %4512 = vpow2.f32 %v2280_v12 }
 0xa06   :  { %v6152_v23 = vpop.eup %4506  ;;  %v2276_v39 = vmul.f32 1.442695, %v2248_v55 }
 0xa07   :  { %v2551_v54 = vpop.permute.xlu0 %2550  ;;  %v2314_v0 = vsel %vm1003_vm2, %v6152_v23, 0.0 }
 0xa08   :  { %2315 = vadd.xlane.f32.xlu1 %v2314_v0  ;;  %4074 = vmatprep.mubr.msk.bf16.mxu0 %vm796_vm1, %v2551_v54  ;;  %4514 = vpow2.f32 %v2276_v39 }
 0xa09   :  { %4516 = vpow2.f32 %v2282_v57 }
 0xa0a   :  { %v4509_v61 = vpop.eup %4508 }
 0xa0b   :  { %4075 = vmatmul.mubr.msk.bf16.vlgmr.msra.gmra.mrb[64].mxu0 %vm796_vm1, %v2553_v36  ;;  %v2308_v29 = vsel %vm1003_vm2, %v4509_v61, 0.0  ;;  %v4511_v42 = vpop.eup %4510 }
 0xa0c   :  { %2309 = vadd.xlane.f32.xlu1 %v2308_v29  ;;  %v2317_v46 = vsel %vm1003_vm2, %v4511_v42, 0.0 }
 0xa0e   :  { %v6168_v44 = vpop.eup %4512 }
 0xa0f   :  { %v2326_v19 = vsel %vm1003_vm2, %v6168_v44, 0.0 }
 0xa10   :  { %2318 = vadd.xlane.f32.xlu1 %v2317_v46  ;;  %v2684_v46 = vsel %vm796_vm1, %v6098_v24, 0 }
 0xa12   :  { %v6172_v25 = vpop.eup %4514 }
 0xa13   :  { %v6176_v16 = vpop.eup %4516 }
 0xa14   :  { %v2329_v9 = vsel %vm1003_vm2, %v6176_v16, 0.0 }
 0xa18   :  { %2667 = vrot.lane.b32.xlu0 %v5143_v47, %s4604_s15  ;;  %v2278_v47 = vmul.f32 1.442695, %v2249_v5 }
 0xa1a   :  { %4518 = vpow2.f32 %v2278_v47 }
 0xa21   :  { %2554 = vrot.lane.b32.xlu1 %v5111_v6, %s4604_s15  ;;  %v2320_v6 = vsel %vm1003_vm2, %v6172_v25, 0.0 }
 0xa24   :  { %v6180_v58 = vpop.eup %4518 }
 0xa25   :  { %v2323_v22 = vsel %vm1003_vm2, %v6180_v58, 0.0 }
 0xa37   :  { %2327 = vadd.xlane.f32.xlu0 %v2326_v19 }
 0xa3b   :  { %2321 = vadd.xlane.f32.xlu0 %v2320_v6 }
 0xa3f   :  { %2330 = vadd.xlane.f32.xlu0 %v2329_v9 }
 0xa45   :  { %2324 = vadd.xlane.f32.xlu1 %v2323_v22 }
 0xa55   :  { %2556 = vrot.lane.b32.xlu0 %v5109_v11, %s4604_s15 }
 0xa56   :  { %2669 = vrot.lane.b32.xlu1 %v5139_v20, %s4604_s15 }
 0xa59   :  { %2655 = vrot.lane.b32.xlu0 %v5052_v4, %s4604_s15 }
 0xa5a   :  { %2657 = vrot.lane.b32.xlu1 %v5050_v2, %s4604_s15 }
 0xa5d   :  { %2659 = vrot.lane.b32.xlu0 %v5062_v35, %s4604_s15 }
 0xa5e   :  { %2661 = vrot.lane.b32.xlu1 %v5060_v15, %s4604_s15 }
 0xa8f   :  { %v2313_v1 = vpop.xlane.xlu0 %2312 }
 0xa90   :  { %4520 = vrcp.f32 %v2313_v1 }
 0xa95   :  { %v2316_v41 = vpop.xlane.xlu1 %2315 }
 0xa99   :  { %v2310_v18 = vpop.xlane.xlu1 %2309 }
 0xa9a   :  { %4522 = vrcp.f32 %v2310_v18  ;;  %v6196_v11 = vpop.f32.mrb[56].mxu0  ;;  %v4521_v38 = vpop.eup %4520  ;;  %v6239_v18 = vld [vmem:[%s6698_s2 + $0xd0] sm:$0xff] }
 0xa9b   :  { %v6198_v20 = vpop.f32.mrb[57].mxu0  ;;  %4524 = vrcp.f32 %v2316_v41  ;;  %v2357_v48 = vmul.f32 %v4521_v38, %v6147_v49  ;;  %v2687_v49 = vsel %vm796_vm1, %v6122_v45, 0 }
 0xa9c   :  { %v6200_v4 = vpop.f32.mrb[58].mxu0 }
 0xa9d   :  { %v6204_v60 = vpop.f32.mrb[59].mxu0  ;;  %v2319_v35 = vpop.xlane.xlu1 %2318 }
 0xa9e   :  { %4526 = vrcp.f32 %v2319_v35  ;;  %v6244_v35 = vld [vmem:[%s6698_s2 + $0xc0] sm:$0xff] }
 0xaa1   :  { %v2555_v10 = vpop.permute.xlu1 %2554 }
 0xaa2   :  { %4078 = vmatprep.mubr.msk.bf16.mxu0 %vm796_vm1, %v2555_v10 }
 0xaa4   :  { %v4523_v31 = vpop.eup %4522 }
 0xaa5   :  { %v2356_v8 = vmul.f32 %v4523_v31, %v4509_v61  ;;  %v4525_v52 = vpop.eup %4524  ;;  %v2668_v61 = vpop.permute.xlu0 %2667 }
 0xaa6   :  { %v2358_v0 = vmul.f32 %v4525_v52, %v6152_v23  ;;  %v2690_v23 = vsel %vm796_vm1, %v2668_v61, 0  ;;  %v6252_v52 = vld [vmem:[%s6698_s2 + $0xc8] sm:$0xff] }
 0xaa7   :  { %v2368_v30 = vpack.c.bf16 %v2357_v48, %v2356_v8 }
 0xaa8   :  { %v4527_v54 = vpop.eup %4526 }
 0xaa9   :  { %v2359_v36 = vmul.f32 %v4527_v54, %v4511_v42  ;;  %4058 = vmatprep.mubr.msk.bf16.mxu1 %vm1003_vm2, %v2368_v30 }
 0xaab   :  { %v2369_v29 = vpack.c.bf16 %v2359_v36, %v2358_v0 }
 0xaad   :  { %4059 = vmatmul.mubr.msk.bf16.vlgmr.msra.gmra.mrb[72].mxu1 %vm1003_vm2, %v2369_v29 }
 0xaae   :  { %4083 = vmatpush3.bf16.xpose.msra.mxu1 %v2684_v46 }
 0xaaf   :  { %4183 = vmatprep.subr.msk.bf16.mxu1 %vm796_vm1, %v6122_v45 }
 0xab6   :  { %4085 = vmatpush3.bf16.xpose.msra.mxu1 %v2687_v49 }
 0xab7   :  { %4184 = vmatprep.subr.msk.bf16.mxu1 %vm796_vm1, %v2668_v61 }
 0xabe   :  { %4087 = vmatpush3.bf16.xpose.msra.mxu1 %v2690_v23 }
 0xac4   :  { %v2328_v42 = vpop.xlane.xlu0 %2327 }
 0xac8   :  { %v2322_v40 = vpop.xlane.xlu0 %2321 }
 0xacc   :  { %v2331_v12 = vpop.xlane.xlu0 %2330 }
 0xacd   :  { %4528 = vrcp.f32 %v2331_v12 }
 0xace   :  { %4530 = vrcp.f32 %v2322_v40 }
 0xacf   :  { %4532 = vrcp.f32 %v2328_v42 }
 0xad0   :  { %v2557_v55 = vpop.permute.xlu0 %2556 }
 0xad1   :  { %4079 = vmatmul.mubr.msk.bf16.gmra.mrb[68].mxu0 %vm796_vm1, %v2557_v55 }
 0xad2   :  { %v2325_v24 = vpop.xlane.xlu1 %2324 }
 0xad3   :  { %4534 = vrcp.f32 %v2325_v24 }
 0xad6   :  { %v6222_v3 = vpop.f32.mrb[60].mxu0  ;;  %v2670_v45 = vpop.permute.xlu1 %2669 }
 0xad7   :  { %v2693_v39 = vsel %vm796_vm1, %v2670_v45, 0  ;;  %v6225_v57 = vpop.f32.mrb[61].mxu0  ;;  %4185 = vmatprep.subr.msk.bf16.mxu1 %vm796_vm1, %v2670_v45  ;;  %v4529_v6 = vpop.eup %4528 }
 0xad8   :  { %v6228_v5 = vpop.f32.mrb[62].mxu0  ;;  %4089 = vmatpush3.bf16.xpose.msra.mxu1 %v2693_v39  ;;  %v4531_v22 = vpop.eup %4530  ;;  %v2363_v10 = vmul.f32 %v4529_v6, %v6176_v16 }
 0xad9   :  { %v6232_v19 = vpop.f32.mrb[63].mxu0  ;;  %v4533_v1 = vpop.eup %4532  ;;  %v2360_v31 = vmul.f32 %v4531_v22, %v6172_v25  ;;  %v6260_v25 = vld [vmem:[%s6698_s2 + $0xd8] sm:$0xff] }
 0xada   :  { %v2362_v30 = vmul.f32 %v4533_v1, %v6168_v44  ;;  %v2656_v44 = vpop.permute.xlu0 %2655  ;;  %v2658_v45 = vpop.permute.xlu1 %2657 }
 0xadd   :  { %v4535_v41 = vpop.eup %4534 }
 0xade   :  { %v4076_v38 = vpop.f32.mrb[64].mxu0  ;;  %v2361_v8 = vmul.f32 %v4535_v41, %v6180_v58  ;;  %v2371_v58 = vpack.c.bf16 %v2363_v10, %v2362_v30  ;;  %v2660_v39 = vpop.permute.xlu0 %2659 }
 0xadf   :  { %v2624_v48 = vpop.f32.mrb[65].mxu0  ;;  %v2633_v54 = vadd.f32 %v4076_v38, %v6239_v18  ;;  %v2662_v22 = vpop.permute.xlu1 %2661 }
 0xae0   :  { %v2625_v0 = vadd.f32 %v2624_v48, %v6244_v35  ;;  %v4077_v36 = vpop.f32.mrb[66].mxu0  ;;  %v2370_v29 = vpack.c.bf16 %v2361_v8, %v2360_v31 }
 0xae1   :  { %v2627_v16 = vpop.f32.mrb[67].mxu0  ;;  %v2762_v61 = vadd.f32 %v5889_v43, %v2633_v54  ;;  %v2636_v23 = vadd.f32 %v4077_v36, %v6260_v25 }
 0xae2   :  { %v2760_v46 = vadd.f32 %v5889_v43, %v2625_v0  ;;  %v2628_v49 = vadd.f32 %v2627_v16, %v6252_v52  ;;  %4062 = vmatprep.mubr.msk.bf16.mxu1 %vm1003_vm2, %v2370_v29 }
 0xae3   :  { %4063 = vmatmul.mubr.msk.bf16.gmra.mrb[76].mxu1 %vm1003_vm2, %v2371_v58  ;;  %v2763_v55 = vadd.f32 %v5889_v43, %v2636_v23  ;;  %v2782_v24 = vsel %vm1003_vm2, %v2762_v61, -inf  ;;  %v762_v23 = vld [vmem:[%s6698_s2 + $0xf0] sm:$0xff] }
 0xae4   :  { %v2761_v42 = vadd.f32 %v5889_v43, %v2628_v49  ;;  %4090 = vmatprep.mubr.msk.bf16.mxu1 %vm796_vm1, %v2656_v44  ;;  %v2776_v40 = vsel %vm1003_vm2, %v2760_v46, -inf }
 0xae5   :  { %2777 = vmax.xlane.f32.xlu0 %v2776_v40  ;;  %v2785_v6 = vsel %vm1003_vm2, %v2763_v55, -inf  ;;  %v760_v40 = vld [vmem:[%s6698_s2 + $0xe0] sm:$0xff] }
 0xae6   :  { %v2779_v12 = vsel %vm1003_vm2, %v2761_v42, -inf }
 0xae7   :  { %2780 = vmax.xlane.f32.xlu1 %v2779_v12 }
 0xae9   :  { %2783 = vmax.xlane.f32.xlu0 %v2782_v24 }
 0xaeb   :  { %4091 = vmatmul.mubr.msk.bf16.vlgmr.msra.gmra.mrb[80].mxu1 %vm796_vm1, %v2658_v45 }
 0xaec   :  { %4094 = vmatprep.mubr.msk.bf16.mxu1 %vm796_vm1, %v2660_v39 }
 0xaed   :  { %2786 = vmax.xlane.f32.xlu0 %v2785_v6 }
 0xaf3   :  { %4095 = vmatmul.mubr.msk.bf16.gmra.mrb[84].mxu1 %vm796_vm1, %v2662_v22 }
 0xb72   :  { %v2778_v48 = vpop.xlane.xlu0 %2777 }
 0xb73   :  { %v2824_v16 = vsub.f32 %v2760_v46, %v2778_v48  ;;  %v761_v46 = vld [vmem:[%s6698_s2 + $0xe8] sm:$0xff] }
 0xb74   :  { %v2781_v29 = vpop.xlane.xlu1 %2780 }
 0xb75   :  { %v2825_v49 = vsub.f32 %v2761_v42, %v2781_v29  ;;  %v2840_v24 = vmul.f32 1.442695, %v2824_v16 }
 0xb76   :  { %v2784_v30 = vpop.xlane.xlu0 %2783 }
 0xb77   :  { %v2826_v0 = vsub.f32 %v2762_v61, %v2784_v30  ;;  %v763_v61 = vld [vmem:[%s6698_s2 + $0xf8] sm:$0xff]  ;;  %v2842_v6 = vmul.f32 1.442695, %v2825_v49  ;;  %s4605_s2 = smov 8  }
 0xb79   :  { %v2844_v58 = vmul.f32 1.442695, %v2826_v0 }
 0xb7a   :  { %v2787_v54 = vpop.xlane.xlu0 %2786 }
 0xb7b   :  { %v2827_v36 = vsub.f32 %v2763_v55, %v2787_v54  ;;  %4536 = vpow2.f32 %v2844_v58 }
 0xb7d   :  { %v2846_v44 = vmul.f32 1.442695, %v2827_v36 }
 0xb7f   :  { %4538 = vpow2.f32 %v2846_v44 }
 0xb80   :  { %v6278_v1 = vpop.f32.mrb[72].mxu1  ;;  %4540 = vpow2.f32 %v2840_v24 }
 0xb81   :  { %6739 = vst [vmem:[#allocation24_spill] sm:$0xff] %v6278_v1  ;;  %v6280_v41 = vpop.f32.mrb[73].mxu1  ;;  %4542 = vpow2.f32 %v2842_v6 }
 0xb82   :  { %6740 = vst [vmem:[#allocation25_spill] sm:$0xff] %v6280_v41  ;;  %v6282_v10 = vpop.f32.mrb[74].mxu1 }
 0xb83   :  { %6741 = vst [vmem:[#allocation26_spill] sm:$0xff] %v6282_v10  ;;  %v6286_v31 = vpop.f32.mrb[75].mxu1 }
 0xb84   :  { %6742 = vst [vmem:[#allocation27_spill] sm:$0xff] %v6286_v31 }
 0xb85   :  { %v6312_v44 = vpop.eup %4536 }
 0xb89   :  { %v6315_v24 = vpop.eup %4538 }
 0xba4   :  { %v4080_v12 = vpop.f32.mrb[68].mxu0 }
 0xba5   :  { %v2640_v45 = vpop.f32.mrb[69].mxu0  ;;  %v2649_v42 = vadd.f32 %v4080_v12, %v762_v23 }
 0xba6   :  { %v2641_v55 = vadd.f32 %v2640_v45, %v760_v40  ;;  %v4081_v39 = vpop.f32.mrb[70].mxu0  ;;  %v2878_v45 = vsel %vm1003_vm2, %v6312_v44, 0.0 }
 0xba7   :  { %v2643_v22 = vpop.f32.mrb[71].mxu0  ;;  %v2652_v30 = vadd.f32 %v4081_v39, %v763_v61  ;;  %v6304_v0 = vadd.f32 %v5889_v43, %v2649_v42  ;;  %v6319_v42 = vpop.eup %4540 }
 0xba8   :  { %v2764_v48 = vadd.f32 %v5889_v43, %v2641_v55  ;;  %v2644_v54 = vadd.f32 %v2643_v22, %v761_v46  ;;  %v6323_v55 = vpop.eup %4542  ;;  %v2872_v6 = vsel %vm1003_vm2, %v6319_v42, 0.0 }
 0xba9   :  { %v2767_v16 = vadd.f32 %v5889_v43, %v2652_v30  ;;  %v2794_v49 = vsel %vm1003_vm2, %v6304_v0, -inf }
 0xbaa   :  { %v2765_v36 = vadd.f32 %v5889_v43, %v2644_v54  ;;  %v2788_v29 = vsel %vm1003_vm2, %v2764_v48, -inf  ;;  %v2881_v43 = vsel %vm1003_vm2, %v6315_v24, 0.0  ;;  %v2875_v54 = vsel %vm1003_vm2, %v6323_v55, 0.0 }
 0xbab   :  { %2789 = vmax.xlane.f32.xlu0 %v2788_v29  ;;  %v2797_v12 = vsel %vm1003_vm2, %v2767_v16, -inf }
 0xbac   :  { %v2791_v58 = vsel %vm1003_vm2, %v2765_v36, -inf }
 0xbad   :  { %2792 = vmax.xlane.f32.xlu1 %v2791_v58 }
 0xbaf   :  { %2795 = vmax.xlane.f32.xlu0 %v2794_v49 }
 0xbb1   :  { %2798 = vmax.xlane.f32.xlu1 %v2797_v12 }
 0xbb3   :  { %2879 = vadd.xlane.f32.xlu0 %v2878_v45 }
 0xbb5   :  { %2882 = vadd.xlane.f32.xlu1 %v2881_v43 }
 0xbb6   :  { %v6325_v39 = vpop.f32.mrb[76].mxu1 }
 0xbb7   :  { %6743 = vst [vmem:[#allocation28_spill] sm:$0xff] %v6325_v39  ;;  %v6329_v22 = vpop.f32.mrb[77].mxu1  ;;  %2873 = vadd.xlane.f32.xlu0 %v2872_v6 }
 0xbb8   :  { %6744 = vst [vmem:[#allocation29_spill] sm:$0xff] %v6329_v22  ;;  %v6331_v30 = vpop.f32.mrb[78].mxu1 }
 0xbb9   :  { %6745 = vst [vmem:[#allocation30_spill] sm:$0xff] %v6331_v30  ;;  %v6337_v58 = vpop.f32.mrb[79].mxu1  ;;  %2876 = vadd.xlane.f32.xlu1 %v2875_v54 }
 0xbba   :  { %6746 = vst [vmem:[#allocation31_spill] sm:$0xff] %v6337_v58 }
 0xbbe   :  { %v4092_v12 = vpop.f32.mrb[80].mxu1 }
 0xbbf   :  { %v2729_v45 = vpop.f32.mrb[81].mxu1 }
 0xbc0   :  { %v4093_v43 = vpop.f32.mrb[82].mxu1 }
 0xbc1   :  { %v2732_v8 = vpop.f32.mrb[83].mxu1 }
 0xbc6   :  { %v4096_v38 = vpop.f32.mrb[84].mxu1 }
 0xbc7   :  { %v2754_v6 = vadd.f32 %v4096_v38, %v762_v23  ;;  %v2745_v9 = vpop.f32.mrb[85].mxu1 }
 0xbc8   :  { %v2746_v47 = vadd.f32 %v2745_v9, %v760_v40  ;;  %v4097_v15 = vpop.f32.mrb[86].mxu1  ;;  %v2741_v40 = vadd.f32 %v4093_v43, %v6260_v25  ;;  %v2733_v25 = vadd.f32 %v2732_v8, %v6252_v52 }
 0xbc9   :  { %v6341_v2 = vadd.f32 %v4097_v15, %v763_v61  ;;  %v2748_v41 = vpop.f32.mrb[87].mxu1  ;;  %v2738_v15 = vadd.f32 %v4092_v12, %v6239_v18 }
 0xbca   :  { %v6343_v31 = vadd.f32 %v2748_v41, %v761_v46 }
 0xc38   :  { %v2790_v29 = vpop.xlane.xlu0 %2789 }
 0xc39   :  { %v2828_v39 = vsub.f32 %v2764_v48, %v2790_v29 }
 0xc3a   :  { %v2793_v54 = vpop.xlane.xlu1 %2792 }
 0xc3b   :  { %v2848_v30 = vmul.f32 1.442695, %v2828_v39  ;;  %v2829_v1 = vsub.f32 %v2765_v36, %v2793_v54  ;;  %v2730_v36 = vadd.f32 %v2729_v45, %v6244_v35  ;;  %v2774_v45 = vadd.f32 %v6044_v50, %v2754_v6 }
 0xc3c   :  { %v2796_v49 = vpop.xlane.xlu0 %2795 }
 0xc3d   :  { %4544 = vpow2.f32 %v2848_v30  ;;  %v2850_v22 = vmul.f32 1.442695, %v2829_v1  ;;  %v2830_v48 = vsub.f32 %v6304_v0, %v2796_v49  ;;  %v2770_v1 = vadd.f32 %v6044_v50, %v2738_v15 }
 0xc3e   :  { %v2799_v58 = vpop.xlane.xlu1 %2798  ;;  %v2768_v30 = vadd.f32 %v6044_v50, %v2730_v36  ;;  %v2818_v6 = vsel %vm1003_vm2, %v2774_v45, -inf }
 0xc3f   :  { %4546 = vpow2.f32 %v2850_v22  ;;  %v2831_v38 = vsub.f32 %v2767_v16, %v2799_v58  ;;  %v2771_v16 = vadd.f32 %v6044_v50, %v2741_v40  ;;  %v2852_v0 = vmul.f32 1.442695, %v2830_v48 }
 0xc40   :  { %v2880_v10 = vpop.xlane.xlu0 %2879  ;;  %v2806_v35 = vsel %vm1003_vm2, %v2770_v1, -inf  ;;  %v2769_v58 = vadd.f32 %v6044_v50, %v2733_v25  ;;  %v2800_v43 = vsel %vm1003_vm2, %v2768_v30, -inf  ;;  %v6403_v48 = vadd.f32 %v6044_v50, %v6343_v31 }
 0xc41   :  { %4548 = vrcp.f32 %v2880_v10  ;;  %v2854_v41 = vmul.f32 1.442695, %v2831_v38  ;;  %v2809_v49 = vsel %vm1003_vm2, %v2771_v16, -inf }
 0xc42   :  { %v2883_v9 = vpop.xlane.xlu1 %2882 }
 0xc43   :  { %4550 = vrcp.f32 %v2883_v9  ;;  %v2803_v9 = vsel %vm1003_vm2, %v2769_v58, -inf }
 0xc44   :  { %v2874_v23 = vpop.xlane.xlu0 %2873 }
 0xc45   :  { %4552 = vrcp.f32 %v2874_v23 }
 0xc46   :  { %v2877_v61 = vpop.xlane.xlu1 %2876 }
 0xc47   :  { %v6347_v46 = vpop.eup %4544  ;;  %4554 = vrcp.f32 %v2877_v61 }
 0xc48   :  { %v2884_v10 = vsel %vm1003_vm2, %v6347_v46, 0.0  ;;  %4556 = vpow2.f32 %v2854_v41 }
 0xc49   :  { %v6354_v18 = vpop.eup %4546  ;;  %2885 = vadd.xlane.f32.xlu0 %v2884_v10  ;;  %4558 = vpow2.f32 %v2852_v0 }
 0xc4a   :  { %v2887_v39 = vsel %vm1003_vm2, %v6354_v18, 0.0 }
 0xc4b   :  { %2888 = vadd.xlane.f32.xlu1 %v2887_v39  ;;  %v4549_v22 = vpop.eup %4548 }
 0xc4c   :  { %v6365_v52 = vmul.f32 %v4549_v22, %v6312_v44 }
 0xc4d   :  { %2807 = vmax.xlane.f32.xlu0 %v2806_v35  ;;  %v4551_v29 = vpop.eup %4550 }
 0xc4e   :  { %v6368_v8 = vmul.f32 %v4551_v29, %v6315_v24  ;;  %v2772_v24 = vadd.f32 %v6044_v50, %v2746_v47  ;;  %v6399_v47 = vadd.f32 %v6044_v50, %v6341_v2 }
 0xc4f   :  { %v4553_v12 = vpop.eup %4552  ;;  %2810 = vmax.xlane.f32.xlu1 %v2809_v49 }
 0xc50   :  { %v2953_v38 = vpack.c.bf16 %v6368_v8, %v6365_v52  ;;  %v2936_v15 = vmul.f32 %v4553_v12, %v6319_v42  ;;  %v2812_v61 = vsel %vm1003_vm2, %v2772_v24, -inf }
 0xc51   :  { %v4555_v54 = vpop.eup %4554  ;;  %2801 = vmax.xlane.f32.xlu0 %v2800_v43 }
 0xc52   :  { %v2937_v44 = vmul.f32 %v4555_v54, %v6323_v55  ;;  %v6377_v23 = vpop.eup %4556 }
 0xc53   :  { %2804 = vmax.xlane.f32.xlu1 %v2803_v9  ;;  %v2893_v40 = vsel %vm1003_vm2, %v6377_v23, 0.0  ;;  %v6385_v42 = vpop.eup %4558 }
 0xc54   :  { %v2952_v41 = vpack.c.bf16 %v2937_v44, %v2936_v15  ;;  %v2890_v55 = vsel %vm1003_vm2, %v6385_v42, 0.0 }
 0xc55   :  { %2819 = vmax.xlane.f32.xlu0 %v2818_v6 }
 0xc56   :  { %4106 = vmatprep.mubr.msk.bf16.mxu0 %vm1003_vm2, %v2952_v41 }
 0xc57   :  { %2894 = vadd.xlane.f32.xlu1 %v2893_v40 }
 0xc59   :  { %2813 = vmax.xlane.f32.xlu0 %v2812_v61 }
 0xc5d   :  { %2891 = vadd.xlane.f32.xlu0 %v2890_v55 }
 0xc68   :  { %2962 = vrot.lane.b32.xlu1 %v5173_v28, %s4604_s15  ;;  %v2821_v28 = vsel %vm1003_vm2, %v6399_v47, -inf }
 0xc73   :  { %2960 = vrot.lane.b32.xlu0 %v5175_v56, %s4604_s15  ;;  %v2815_v56 = vsel %vm1003_vm2, %v6403_v48, -inf }
 0xc77   :  { %2964 = vrot.lane.b32.xlu0 %v5182_v37, %s4604_s15 }
 0xc7b   :  { %2966 = vrot.lane.b32.xlu0 %v5179_v63, %s4604_s15 }
 0xc8c   :  { %2822 = vmax.xlane.f32.xlu1 %v2821_v28 }
 0xc90   :  { %2816 = vmax.xlane.f32.xlu1 %v2815_v56 }
 0xca1   :  { %3049 = vrot.lane.b32.xlu1 %v5188_v26, %s4604_s15 }
 0xca5   :  { %3051 = vrot.lane.b32.xlu1 %v5185_v14, %s4604_s15 }
 0xcd6   :  { %v2886_v63 = vpop.xlane.xlu0 %2885 }
 0xcd8   :  { %v2889_v37 = vpop.xlane.xlu1 %2888 }
 0xcda   :  { %v2808_v2 = vpop.xlane.xlu0 %2807 }
 0xcdb   :  { %v2834_v36 = vsub.f32 %v2770_v1, %v2808_v2 }
 0xcdc   :  { %v2811_v50 = vpop.xlane.xlu1 %2810 }
 0xcdd   :  { %v2860_v31 = vmul.f32 1.442695, %v2834_v36  ;;  %v2835_v10 = vsub.f32 %v2771_v16, %v2811_v50 }
 0xcde   :  { %v2802_v25 = vpop.xlane.xlu0 %2801 }
 0xcdf   :  { %4560 = vpow2.f32 %v2860_v31  ;;  %v2832_v39 = vsub.f32 %v2768_v30, %v2802_v25  ;;  %v2862_v22 = vmul.f32 1.442695, %v2835_v10 }
 0xce0   :  { %v2805_v0 = vpop.xlane.xlu1 %2804 }
 0xce1   :  { %v2856_v35 = vmul.f32 1.442695, %v2832_v39  ;;  %v2833_v29 = vsub.f32 %v2769_v58, %v2805_v0 }
 0xce2   :  { %v2820_v49 = vpop.xlane.xlu0 %2819 }
 0xce3   :  { %4562 = vpow2.f32 %v2856_v35  ;;  %v2838_v26 = vsub.f32 %v2774_v45, %v2820_v49  ;;  %v2858_v12 = vmul.f32 1.442695, %v2833_v29 }
 0xce4   :  { %4564 = vpow2.f32 %v2862_v22  ;;  %v2895_v9 = vpop.xlane.xlu1 %2894 }
 0xce5   :  { %v2868_v14 = vmul.f32 1.442695, %v2838_v26 }
 0xce6   :  { %v2814_v43 = vpop.xlane.xlu0 %2813 }
 0xce7   :  { %4566 = vpow2.f32 %v2868_v14  ;;  %v2836_v54 = vsub.f32 %v2772_v24, %v2814_v43  ;;  %v6748_v43 = vpack.i.bf16 %v5821_v27, %v5815_v17 }
 0xce8   :  { %4568 = vpow2.f32 %v2858_v12  ;;  %v2963_v24 = vpop.permute.xlu1 %2962 }
 0xce9   :  { %v6413_v1 = vpop.eup %4560  ;;  %v2864_v16 = vmul.f32 1.442695, %v2836_v54  ;;  %v6749_v54 = vpack.i.bf16 %v6200_v4, %v6196_v11 }
 0xcea   :  { %v2892_v15 = vpop.xlane.xlu0 %2891  ;;  %v2902_v30 = vsel %vm1003_vm2, %v6413_v1, 0.0 }
 0xceb   :  { %4570 = vpow2.f32 %v2864_v16  ;;  %2903 = vadd.xlane.f32.xlu1 %v2902_v30 }
 0xcec   :  { %4572 = vrcp.f32 %v2889_v37 }
 0xced   :  { %v6417_v58 = vpop.eup %4562  ;;  %4574 = vrcp.f32 %v2886_v63 }
 0xcee   :  { %v2961_v45 = vpop.permute.xlu0 %2960  ;;  %v2896_v44 = vsel %vm1003_vm2, %v6417_v58, 0.0  ;;  %v6421_v6 = vpop.eup %4564  ;;  %4576 = vrcp.f32 %v2892_v15 }
 0xcef   :  { %2897 = vadd.xlane.f32.xlu1 %v2896_v44  ;;  %4098 = vmatprep.subr.bf16.mxu0 %v2961_v45  ;;  %v2905_v61 = vsel %vm1003_vm2, %v6421_v6, 0.0  ;;  %4578 = vrcp.f32 %v2895_v9 }
 0xcf0   :  { %4099 = vmatpush3.bf16.msra.mxu0 %v2961_v45 }
 0xcf1   :  { %v6423_v41 = vpop.eup %4566  ;;  %4100 = vmatprep.subr.bf16.mxu0 %v2963_v24 }
 0xcf2   :  { %v2965_v40 = vpop.permute.xlu0 %2964  ;;  %v2914_v55 = vsel %vm1003_vm2, %v6423_v41, 0.0  ;;  %v6429_v28 = vpop.eup %4568 }
 0xcf3   :  { %2906 = vadd.xlane.f32.xlu1 %v2905_v61  ;;  %2915 = vadd.xlane.f32.xlu0 %v2914_v55  ;;  %v2899_v63 = vsel %vm1003_vm2, %v6429_v28, 0.0 }
 0xcf4   :  { %4101 = vmatpush3.bf16.msra.mxu0 %v2963_v24 }
 0xcf5   :  { %v6431_v56 = vpop.eup %4570  ;;  %4102 = vmatprep.subr.bf16.mxu0 %v2965_v40 }
 0xcf6   :  { %v2908_v37 = vsel %vm1003_vm2, %v6431_v56, 0.0  ;;  %v4573_v2 = vpop.eup %4572  ;;  %v2967_v36 = vpop.permute.xlu0 %2966 }
 0xcf7   :  { %2900 = vadd.xlane.f32.xlu1 %v2899_v63  ;;  %2909 = vadd.xlane.f32.xlu0 %v2908_v37  ;;  %v4575_v50 = vpop.eup %4574  ;;  %v2941_v31 = vmul.f32 %v4573_v2, %v6354_v18 }
 0xcf8   :  { %4103 = vmatpush3.bf16.msra.mxu0 %v2965_v40  ;;  %v2940_v10 = vmul.f32 %v4575_v50, %v6347_v46  ;;  %v4577_v25 = vpop.eup %4576 }
 0xcf9   :  { %4104 = vmatprep.subr.bf16.mxu0 %v2967_v36  ;;  %v4579_v0 = vpop.eup %4578  ;;  %v2942_v22 = vmul.f32 %v4577_v25, %v6385_v42 }
 0xcfa   :  { %v2954_v39 = vpack.c.bf16 %v2941_v31, %v2940_v10  ;;  %v2943_v35 = vmul.f32 %v4579_v0, %v6377_v23 }
 0xcfc   :  { %4105 = vmatpush3.bf16.msra.mxu0 %v2967_v36  ;;  %v2955_v29 = vpack.c.bf16 %v2943_v35, %v2942_v22  ;;  %v3391_v35 = vld [vmem:[%s6700_s12 + $0x18] sm:$0xff] }
 0xcff   :  { %4107 = vmatmul.mubr.msk.bf16.vlgmr.msra.gmra.mrb[72].mxu0 %vm1003_vm2, %v2953_v38 }
 0xd00   :  { %4110 = vmatprep.mubr.msk.bf16.mxu0 %vm1003_vm2, %v2954_v39 }
 0xd07   :  { %4111 = vmatmul.mubr.msk.bf16.gmra.mrb[76].mxu0 %vm1003_vm2, %v2955_v29 }
 0xd19   :  { %v2823_v18 = vpop.xlane.xlu1 %2822 }
 0xd1a   :  { %v2839_v46 = vsub.f32 %v6399_v47, %v2823_v18 }
 0xd1c   :  { %v2870_v49 = vmul.f32 1.442695, %v2839_v46 }
 0xd1d   :  { %v2817_v26 = vpop.xlane.xlu1 %2816 }
 0xd1e   :  { %4580 = vpow2.f32 %v2870_v49  ;;  %v2837_v52 = vsub.f32 %v6403_v48, %v2817_v26  ;;  %v6747_v48 = vpack.i.bf16 %v5817_v62, %v5813_v59  ;;  %v3389_v59 = vld [vmem:[%s6700_s12 + $0x8] sm:$0xff] }
 0xd20   :  { %v2866_v8 = vmul.f32 1.442695, %v2837_v52 }
 0xd21   :  { %v3050_v38 = vpop.permute.xlu1 %3049 }
 0xd22   :  { %4582 = vpow2.f32 %v2866_v8  ;;  %4114 = vmatprep.subr.bf16.mxu1 %v3050_v38  ;;  %v6751_v8 = vpack.i.bf16 %v5843_v7, %v5838_v51  ;;  %v6754_v51 = vpack.i.bf16 %v6232_v19, %v6225_v57  ;;  %v6756_v7 = vld [vmem:[#allocation19_spill] sm:$0xff]  ;;  %v6763_v19 = vld [vmem:[#allocation25_spill] sm:$0xff] }
 0xd23   :  { %4115 = vmatpush3.bf16.msra.mxu1 %v3050_v38  ;;  %v6762_v57 = vld [vmem:[#allocation27_spill] sm:$0xff] }
 0xd25   :  { %v3052_v12 = vpop.permute.xlu1 %3051 }
 0xd26   :  { %4116 = vmatprep.subr.bf16.mxu1 %v3052_v12 }
 0xd27   :  { %4117 = vmatpush3.bf16.msra.mxu1 %v3052_v12  ;;  %v6752_v12 = vpack.i.bf16 %v5847_v21, %v5840_v32  ;;  %v6755_v32 = vpack.i.bf16 %v5915_v13, %v5911_v53  ;;  %v6757_v21 = vld [vmem:[#allocation18_spill] sm:$0xff]  ;;  %v6768_v13 = vld [vmem:[#allocation23_spill] sm:$0xff] }
 0xd28   :  { %v4581_v23 = vpop.eup %4580 }
 0xd29   :  { %v2917_v42 = vsel %vm1003_vm2, %v4581_v23, 0.0 }
 0xd2a   :  { %2918 = vadd.xlane.f32.xlu0 %v2917_v42 }
 0xd2c   :  { %v4583_v14 = vpop.eup %4582 }
 0xd2d   :  { %v2911_v47 = vsel %vm1003_vm2, %v4583_v14, 0.0 }
 0xd2e   :  { %2912 = vadd.xlane.f32.xlu1 %v2911_v47 }
 0xd3f   :  { %3055 = vrot.lane.b32.xlu1 %v5191_v33, %s4604_s15  ;;  %v6750_v33 = vpack.i.bf16 %v6204_v60, %v6198_v20 }
 0xd40   :  { %3053 = vrot.lane.b32.xlu0 %v5194_v34, %s4604_s15  ;;  %v3388_v34 = vld [vmem:[%s6700_s12] sm:$0xff] }
 0xd41   :  { %v3392_v17 = vpack.c.bf16 %v3389_v59, %v3388_v34  ;;  %v6765_v34 = vld [vmem:[#allocation22_spill] sm:$0xff]  ;;  %v6766_v59 = vld [vmem:[#allocation20_spill] sm:$0xff] }
 0xd42   :  { %v6767_v53 = vpack.i.bf16 %v6765_v34, %v6766_v59 }
 0xd43   :  { %4198 = vrot.lane.b32.xlu1 %v6747_v48, %s4605_s2  ;;  %4130 = vmatprep.subr.bf16.mxu0 %v3392_v17  ;;  %v6753_v48 = vpack.i.bf16 %v6228_v5, %v6222_v3  ;;  %v6759_v3 = vld [vmem:[#allocation26_spill] sm:$0xff]  ;;  %v6760_v5 = vld [vmem:[#allocation24_spill] sm:$0xff] }
 0xd44   :  { %4193 = vrot.lane.b32.xlu0 %v6748_v43, %s4605_s2  ;;  %4131 = vmatpush3.bf16.msra.mxu0 %v3392_v17  ;;  %v6758_v43 = vpack.i.bf16 %v6756_v7, %v6757_v21  ;;  %v6769_v17 = vld [vmem:[#allocation21_spill] sm:$0xff]  ;;  %v6776_v21 = vld [vmem:[#allocation6_spill] sm:$0xff] }
 0xd47   :  { %4208 = vrot.lane.b32.xlu1 %v6749_v54, %s4606_s1  ;;  %v6761_v54 = vpack.i.bf16 %v6759_v3, %v6760_v5  ;;  %v6777_v5 = vld [vmem:[#allocation9_spill] sm:$0xff] }
 0xd48   :  { %4203 = vrot.lane.b32.xlu0 %v6750_v33, %s4606_s1  ;;  %v6764_v33 = vpack.i.bf16 %v6762_v57, %v6763_v19  ;;  %v6778_v57 = vld [vmem:[#allocation7_spill] sm:$0xff] }
 0xd78   :  { %v2904_v62 = vpop.xlane.xlu1 %2903 }
 0xd7c   :  { %v2898_v27 = vpop.xlane.xlu1 %2897 }
 0xd7d   :  { %4584 = vrcp.f32 %v2898_v27 }
 0xd80   :  { %v2907_v11 = vpop.xlane.xlu1 %2906  ;;  %v2916_v30 = vpop.xlane.xlu0 %2915 }
 0xd84   :  { %v2901_v4 = vpop.xlane.xlu1 %2900  ;;  %v2910_v45 = vpop.xlane.xlu0 %2909 }
 0xd85   :  { %4586 = vrcp.f32 %v2901_v4 }
 0xd86   :  { %4588 = vrcp.f32 %v2907_v11 }
 0xd87   :  { %v4585_v16 = vpop.eup %4584  ;;  %4590 = vrcp.f32 %v2904_v62  ;;  %v6770_v62 = vpack.i.bf16 %v6768_v13, %v6769_v17 }
 0xd88   :  { %v2944_v60 = vmul.f32 %v4585_v16, %v6417_v58 }
 0xd8f   :  { %v4587_v20 = vpop.eup %4586 }
 0xd90   :  { %v2945_v9 = vmul.f32 %v4587_v20, %v6429_v28  ;;  %v4589_v24 = vpop.eup %4588 }
 0xd91   :  { %v4591_v55 = vpop.eup %4590  ;;  %v2947_v58 = vmul.f32 %v4589_v24, %v6421_v6 }
 0xd92   :  { %v2956_v15 = vpack.c.bf16 %v2945_v9, %v2944_v60  ;;  %v2946_v63 = vmul.f32 %v4591_v55, %v6413_v1  ;;  %v3390_v1 = vld [vmem:[%s6700_s12 + $0x10] sm:$0xff]  ;;  %v6772_v55 = vld [vmem:[#allocation3_spill] sm:$0xff] }
 0xd93   :  { %v3393_v29 = vpack.c.bf16 %v3391_v35, %v3390_v1 }
 0xd94   :  { %4122 = vmatprep.mubr.msk.bf16.mxu1 %vm1003_vm2, %v2956_v15  ;;  %v2957_v37 = vpack.c.bf16 %v2947_v58, %v2946_v63  ;;  %v6773_v63 = vld [vmem:[#allocation4_spill] sm:$0xff] }
 0xd95   :  { %4132 = vmatprep.subr.bf16.mxu0 %v3393_v29 }
 0xd96   :  { %4133 = vmatpush3.bf16.msra.mxu0 %v3393_v29 }
 0xdb7   :  { %v2919_v44 = vpop.xlane.xlu0 %2918 }
 0xdb8   :  { %4592 = vrcp.f32 %v2919_v44 }
 0xdb9   :  { %4594 = vrcp.f32 %v2910_v45 }
 0xdba   :  { %4596 = vrcp.f32 %v2916_v30 }
 0xdbb   :  { %v2913_v40 = vpop.xlane.xlu1 %2912  ;;  %v3054_v61 = vpop.permute.xlu0 %3053 }
 0xdbc   :  { %4598 = vrcp.f32 %v2913_v40  ;;  %4118 = vmatprep.subr.bf16.mxu1 %v3054_v61  ;;  %v6771_v40 = vld [vmem:[#allocation5_spill] sm:$0xff] }
 0xdbd   :  { %4119 = vmatpush3.bf16.msra.mxu1 %v3054_v61 }
 0xdbf   :  { %v3056_v28 = vpop.permute.xlu1 %3055  ;;  %v4194_v11 = vpop.permute.xlu0 %4193 }
 0xdc0   :  { %4120 = vmatprep.subr.bf16.mxu1 %v3056_v28  ;;  %v4196_v16 = vunpack.i.h.bf16 %v4194_v11  ;;  %v4195_v20 = vunpack.i.l.bf16 %v4194_v11 }
 0xdc1   :  { %4121 = vmatpush3.bf16.msra.mxu1 %v3056_v28 }
 0xdc2   :  { %v4593_v2 = vpop.eup %4592  ;;  %v3331_v61 = vsel %vm796_vm1, %v6771_v40, %v4196_v16  ;;  %v3330_v58 = vsel %vm796_vm1, %v6772_v55, %v4195_v20 }
 0xdc3   :  { %v4595_v36 = vpop.eup %4594  ;;  %v2951_v10 = vmul.f32 %v4593_v2, %v4581_v23  ;;  %v4199_v27 = vpop.permute.xlu1 %4198  ;;  %v6774_v2 = vld [vmem:[#allocation2_spill] sm:$0xff] }
 0xdc4   :  { %4123 = vmatmul.mubr.msk.bf16.vlgmr.msra.gmra.mrb[88].mxu1 %vm1003_vm2, %v2957_v37  ;;  %v4597_v50 = vpop.eup %4596  ;;  %v2948_v25 = vmul.f32 %v4595_v36, %v6431_v56  ;;  %v4204_v60 = vpop.permute.xlu0 %4203  ;;  %v4201_v9 = vunpack.i.h.bf16 %v4199_v27  ;;  %v4200_v15 = vunpack.i.l.bf16 %v4199_v27 }
 0xdc5   :  { %v2950_v0 = vmul.f32 %v4597_v50, %v6423_v41  ;;  %v4206_v44 = vunpack.i.h.bf16 %v4204_v60  ;;  %v4205_v24 = vunpack.i.l.bf16 %v4204_v60 }
 0xdc6   :  { %v4599_v31 = vpop.eup %4598  ;;  %v3333_v37 = vsel %vm796_vm1, %v6773_v63, %v4201_v9  ;;  %v3332_v36 = vsel %vm796_vm1, %v6774_v2, %v4200_v15  ;;  %v6782_v2 = vld [vmem:[#allocation31_spill] sm:$0xff] }
 0xdc7   :  { %v2949_v39 = vmul.f32 %v4599_v31, %v4583_v14  ;;  %v2959_v6 = vpack.c.bf16 %v2951_v10, %v2950_v0  ;;  %v4209_v4 = vpop.permute.xlu1 %4208  ;;  %v3348_v1 = vsel %vm3346_vm3, %v3331_v61, %v4206_v44 }
 0xdc8   :  { %v4211_v30 = vunpack.i.h.bf16 %v4209_v4  ;;  %v4210_v45 = vunpack.i.l.bf16 %v4209_v4 }
 0xdc9   :  { %v2958_v22 = vpack.c.bf16 %v2949_v39, %v2948_v25 }
 0xdca   :  { %v3349_v25 = vsel %vm3346_vm3, %v3332_v36, %v4210_v45  ;;  %v3350_v39 = vsel %vm3346_vm3, %v3333_v37, %v4211_v30  ;;  %v6783_v36 = vld [vmem:[#allocation29_spill] sm:$0xff] }
 0xdcb   :  { %4126 = vmatprep.mubr.msk.bf16.mxu1 %vm1003_vm2, %v2958_v22 }
 0xdcc   :  { %4127 = vmatmul.mubr.msk.bf16.gmra.mrb[92].mxu1 %vm1003_vm2, %v2959_v6  ;;  %v3347_v6 = vsel %vm3346_vm3, %v3330_v58, %v4205_v24  ;;  %v6779_v58 = vld [vmem:[#allocation30_spill] sm:$0xff] }
 0xdd2   :  { %v4108_v56 = vpop.f32.mrb[72].mxu0 }
 0xdd3   :  { %v3018_v18 = vpop.f32.mrb[73].mxu0 }
 0xdd4   :  { %v4109_v41 = vpop.f32.mrb[74].mxu0 }
 0xdd5   :  { %v4217_v46 = vpack.i.bf16 %v4109_v41, %v4108_v56  ;;  %v3021_v49 = vpop.f32.mrb[75].mxu0 }
 0xdd6   :  { %v4212_v26 = vpack.i.bf16 %v3021_v49, %v3018_v18 }
 0xdd7   :  { %4218 = vrot.lane.b32.xlu1 %v4217_v46, %s4607_s8 }
 0xdd8   :  { %4213 = vrot.lane.b32.xlu0 %v4212_v26, %s4607_s8 }
 0xdda   :  { %v4112_v52 = vpop.f32.mrb[76].mxu0 }
 0xddb   :  { %4228 = vrot.lane.b32.xlu1 %v6751_v8, %s4605_s2  ;;  %v3034_v38 = vpop.f32.mrb[77].mxu0 }
 0xddc   :  { %4223 = vrot.lane.b32.xlu0 %v6752_v12, %s4605_s2  ;;  %v4113_v23 = vpop.f32.mrb[78].mxu0 }
 0xddd   :  { %v4247_v42 = vpack.i.bf16 %v4113_v23, %v4112_v52  ;;  %v3037_v14 = vpop.f32.mrb[79].mxu0 }
 0xdde   :  { %v4242_v47 = vpack.i.bf16 %v3037_v14, %v3034_v38 }
 0xddf   :  { %4238 = vrot.lane.b32.xlu1 %v6753_v48, %s4606_s1 }
 0xde0   :  { %4233 = vrot.lane.b32.xlu0 %v6754_v51, %s4606_s1 }
 0xde3   :  { %4248 = vrot.lane.b32.xlu1 %v4247_v42, %s4607_s8 }
 0xde4   :  { %4243 = vrot.lane.b32.xlu0 %v4242_v47, %s4607_s8 }
 0xde7   :  { %4258 = vrot.lane.b32.xlu1 %v6755_v32, %s4605_s2  ;;  %v6775_v32 = vld [vmem:[#allocation8_spill] sm:$0xff] }
 0xde8   :  { %4253 = vrot.lane.b32.xlu0 %v6758_v43, %s4605_s2 }
 0xdeb   :  { %4268 = vrot.lane.b32.xlu1 %v6761_v54, %s4606_s1 }
 0xdec   :  { %4263 = vrot.lane.b32.xlu0 %v6764_v33, %s4606_s1 }
 0xdef   :  { %4278 = vrot.lane.b32.xlu1 %v6767_v53, %s4605_s2 }
 0xdf0   :  { %4273 = vrot.lane.b32.xlu0 %v6770_v62, %s4605_s2 }
 0xe49   :  { %v4219_v28 = vpop.permute.xlu1 %4218 }
 0xe4a   :  { %v4221_v50 = vunpack.i.h.bf16 %v4219_v28  ;;  %v4220_v31 = vunpack.i.l.bf16 %v4219_v28  ;;  %v4214_v10 = vpop.permute.xlu0 %4213  ;;  %v6780_v28 = vld [vmem:[#allocation28_spill] sm:$0xff] }
 0xe4b   :  { %v4216_v0 = vunpack.i.h.bf16 %v4214_v10  ;;  %v4215_v22 = vunpack.i.l.bf16 %v4214_v10  ;;  %v6781_v63 = vpack.i.bf16 %v6779_v58, %v6780_v28  ;;  %v6791_v58 = vld [vmem:[#allocation17_spill] sm:$0xff] }
 0xe4c   :  { %v3367_v35 = vsel %vm3363_vm4, %v3350_v39, %v4221_v50  ;;  %v3366_v29 = vsel %vm3363_vm4, %v3349_v25, %v4220_v31  ;;  %v6784_v50 = vpack.i.bf16 %v6782_v2, %v6783_v36 }
 0xe4d   :  { %v3381_v56 = vpack.c.bf16 %v3367_v35, %v3366_v29  ;;  %v3364_v18 = vsel %vm3363_vm4, %v3347_v6, %v4215_v22  ;;  %v3365_v41 = vsel %vm3363_vm4, %v3348_v1, %v4216_v0  ;;  %v4229_v46 = vpop.permute.xlu1 %4228 }
 0xe4e   :  { %v3380_v49 = vpack.c.bf16 %v3365_v41, %v3364_v18  ;;  %v4224_v26 = vpop.permute.xlu0 %4223  ;;  %v4231_v52 = vunpack.i.h.bf16 %v4229_v46  ;;  %v4230_v8 = vunpack.i.l.bf16 %v4229_v46 }
 0xe4f   :  { %v4226_v12 = vunpack.i.h.bf16 %v4224_v26  ;;  %v4225_v23 = vunpack.i.l.bf16 %v4224_v26 }
 0xe50   :  { %4134 = vmatprep.mubr.msk.bf16.mxu0 %vm64_vm0, %v3380_v49  ;;  %v3337_v7 = vsel %vm796_vm1, %v6775_v32, %v4231_v52  ;;  %v3336_v43 = vsel %vm796_vm1, %v6776_v21, %v4230_v8 }
 0xe51   :  { %v4239_v38 = vpop.permute.xlu1 %4238  ;;  %4135 = vmatmul.mubr.msk.bf16.vlgmr.msra.gmra.mrb[80].mxu0 %vm64_vm0, %v3381_v56  ;;  %v3335_v54 = vsel %vm796_vm1, %v6777_v5, %v4226_v12  ;;  %v3334_v19 = vsel %vm796_vm1, %v6778_v57, %v4225_v23  ;;  %v6786_v23 = vld [vmem:[#allocation10_spill] sm:$0xff] }
 0xe52   :  { %v4234_v42 = vpop.permute.xlu0 %4233  ;;  %v4241_v14 = vunpack.i.h.bf16 %v4239_v38  ;;  %v4240_v47 = vunpack.i.l.bf16 %v4239_v38  ;;  %v6785_v38 = vld [vmem:[#allocation12_spill] sm:$0xff] }
 0xe53   :  { %v4236_v48 = vunpack.i.h.bf16 %v4234_v42  ;;  %v4235_v51 = vunpack.i.l.bf16 %v4234_v42 }
 0xe54   :  { %v3353_v53 = vsel %vm3346_vm3, %v3336_v43, %v4240_v47  ;;  %v3354_v13 = vsel %vm3346_vm3, %v3337_v7, %v4241_v14  ;;  %v6787_v14 = vld [vmem:[#allocation13_spill] sm:$0xff] }
 0xe55   :  { %v4249_v3 = vpop.permute.xlu1 %4248  ;;  %v3351_v27 = vsel %vm3346_vm3, %v3334_v19, %v4235_v51  ;;  %v3352_v11 = vsel %vm3346_vm3, %v3335_v54, %v4236_v48  ;;  %v6788_v51 = vld [vmem:[#allocation11_spill] sm:$0xff] }
 0xe56   :  { %v4251_v33 = vunpack.i.h.bf16 %v4249_v3  ;;  %v4250_v34 = vunpack.i.l.bf16 %v4249_v3  ;;  %v4244_v59 = vpop.permute.xlu0 %4243 }
 0xe57   :  { %v4246_v17 = vunpack.i.h.bf16 %v4244_v59  ;;  %v4245_v62 = vunpack.i.l.bf16 %v4244_v59 }
 0xe58   :  { %v3371_v4 = vsel %vm3363_vm4, %v3354_v13, %v4251_v33  ;;  %v3370_v16 = vsel %vm3363_vm4, %v3353_v53, %v4250_v34 }
 0xe59   :  { %v3383_v20 = vpack.c.bf16 %v3371_v4, %v3370_v16  ;;  %v3368_v60 = vsel %vm3363_vm4, %v3351_v27, %v4245_v62  ;;  %v3369_v9 = vsel %vm3363_vm4, %v3352_v11, %v4246_v17  ;;  %v4259_v0 = vpop.permute.xlu1 %4258 }
 0xe5a   :  { %v3382_v15 = vpack.c.bf16 %v3369_v9, %v3368_v60  ;;  %v4254_v22 = vpop.permute.xlu0 %4253  ;;  %v4261_v35 = vunpack.i.h.bf16 %v4259_v0  ;;  %v4260_v29 = vunpack.i.l.bf16 %v4259_v0 }
 0xe5b   :  { %v4256_v56 = vunpack.i.h.bf16 %v4254_v22  ;;  %v4255_v41 = vunpack.i.l.bf16 %v4254_v22 }
 0xe5c   :  { %4138 = vmatprep.mubr.msk.bf16.mxu0 %vm64_vm0, %v3382_v15  ;;  %v3341_v12 = vsel %vm796_vm1, %v6785_v38, %v4261_v35  ;;  %v3340_v42 = vsel %vm796_vm1, %v6786_v23, %v4260_v29 }
 0xe5d   :  { %4139 = vmatmul.mubr.msk.bf16.gmra.mrb[84].mxu0 %vm64_vm0, %v3383_v20  ;;  %v4269_v6 = vpop.permute.xlu1 %4268  ;;  %v3339_v47 = vsel %vm796_vm1, %v6787_v14, %v4256_v56  ;;  %v3338_v32 = vsel %vm796_vm1, %v6788_v51, %v4255_v41  ;;  %v3637_v41 = vld [vmem:[%s6701_s13] ss:$0 sm:$0xff] }
 0xe5e   :  { %v4264_v1 = vpop.permute.xlu0 %4263  ;;  %v4270_v46 = vunpack.i.l.bf16 %v4269_v6  ;;  %v4271_v26 = vunpack.i.h.bf16 %v4269_v6 }
 0xe5f   :  { %v4265_v52 = vunpack.i.l.bf16 %v4264_v1  ;;  %v4266_v8 = vunpack.i.h.bf16 %v4264_v1 }
 0xe60   :  { %v3357_v7 = vsel %vm3346_vm3, %v3340_v42, %v4270_v46  ;;  %v3358_v5 = vsel %vm3346_vm3, %v3341_v12, %v4271_v26 }
 0xe61   :  { %v4279_v18 = vpop.permute.xlu1 %4278  ;;  %v3355_v54 = vsel %vm3346_vm3, %v3338_v32, %v4265_v52  ;;  %v3356_v33 = vsel %vm3346_vm3, %v3339_v47, %v4266_v8 }
 0xe62   :  { %v4274_v49 = vpop.permute.xlu0 %4273  ;;  %v4281_v34 = vunpack.i.h.bf16 %v4279_v18  ;;  %v4280_v13 = vunpack.i.l.bf16 %v4279_v18 }
 0xe63   :  { %v4276_v4 = vunpack.i.h.bf16 %v4274_v49  ;;  %v4275_v16 = vunpack.i.l.bf16 %v4274_v49 }
 0xe65   :  { %v3343_v28 = vsel %vm796_vm1, %v6791_v58, %v4276_v4 }
 0xe97   :  { %v4124_v30 = vpop.f32.mrb[88].mxu1 }
 0xe98   :  { %v3107_v45 = vpop.f32.mrb[89].mxu1 }
 0xe99   :  { %v4125_v44 = vpop.f32.mrb[90].mxu1 }
 0xe9a   :  { %v4282_v24 = vpack.i.bf16 %v4125_v44, %v4124_v30  ;;  %v3110_v40 = vpop.f32.mrb[91].mxu1  ;;  %v6789_v44 = vld [vmem:[#allocation16_spill] sm:$0xff] }
 0xe9b   :  { %v4287_v61 = vpack.i.bf16 %v3110_v40, %v3107_v45  ;;  %v6790_v40 = vld [vmem:[#allocation14_spill] sm:$0xff] }
 0xe9c   :  { %4283 = vrot.lane.b32.xlu1 %v4282_v24, %s4607_s8  ;;  %v3345_v24 = vsel %vm796_vm1, %v6789_v44, %v4281_v34 }
 0xe9d   :  { %4288 = vrot.lane.b32.xlu0 %v4287_v61, %s4607_s8  ;;  %v3344_v61 = vsel %vm796_vm1, %v6790_v40, %v4280_v13 }
 0xe9f   :  { %v4128_v55 = vpop.f32.mrb[92].mxu1 }
 0xea0   :  { %4298 = vrot.lane.b32.xlu1 %v6781_v63, %s4606_s1  ;;  %v3123_v37 = vpop.f32.mrb[93].mxu1  ;;  %v6792_v63 = vld [vmem:[#allocation15_spill] sm:$0xff] }
 0xea1   :  { %4293 = vrot.lane.b32.xlu0 %v6784_v50, %s4606_s1  ;;  %v4129_v31 = vpop.f32.mrb[94].mxu1 }
 0xea2   :  { %v4307_v10 = vpack.i.bf16 %v4129_v31, %v4128_v55  ;;  %v3126_v25 = vpop.f32.mrb[95].mxu1 }
 0xea3   :  { %v4302_v39 = vpack.i.bf16 %v3126_v25, %v3123_v37  ;;  %v3342_v37 = vsel %vm796_vm1, %v6792_v63, %v4275_v16 }
 0xea4   :  { %4308 = vrot.lane.b32.xlu1 %v4307_v10, %s4607_s8 }
 0xea5   :  { %4303 = vrot.lane.b32.xlu0 %v4302_v39, %s4607_s8 }
 0xf0e   :  { %v4284_v48 = vpop.permute.xlu1 %4283 }
 0xf0f   :  { %v4286_v21 = vunpack.i.h.bf16 %v4284_v48  ;;  %v4285_v43 = vunpack.i.l.bf16 %v4284_v48  ;;  %v4289_v3 = vpop.permute.xlu0 %4288 }
 0xf10   :  { %v4291_v57 = vunpack.i.h.bf16 %v4289_v3  ;;  %v4290_v19 = vunpack.i.l.bf16 %v4289_v3 }
 0xf11   :  { %v3375_v59 = vsel %vm3363_vm4, %v3358_v5, %v4286_v21  ;;  %v3374_v53 = vsel %vm3363_vm4, %v3357_v7, %v4285_v43 }
 0xf12   :  { %v3385_v17 = vpack.c.bf16 %v3375_v59, %v3374_v53  ;;  %v3372_v62 = vsel %vm3363_vm4, %v3355_v54, %v4290_v19  ;;  %v3373_v27 = vsel %vm3363_vm4, %v3356_v33, %v4291_v57  ;;  %v4299_v11 = vpop.permute.xlu1 %4298 }
 0xf13   :  { %v3384_v20 = vpack.c.bf16 %v3373_v27, %v3372_v62  ;;  %v4294_v60 = vpop.permute.xlu0 %4293  ;;  %v4301_v9 = vunpack.i.h.bf16 %v4299_v11  ;;  %v4300_v15 = vunpack.i.l.bf16 %v4299_v11 }
 0xf14   :  { %v4296_v30 = vunpack.i.h.bf16 %v4294_v60  ;;  %v4295_v45 = vunpack.i.l.bf16 %v4294_v60 }
 0xf15   :  { %4142 = vmatprep.mubr.msk.bf16.mxu0 %vm64_vm0, %v3384_v20  ;;  %v3362_v31 = vsel %vm3346_vm3, %v3345_v24, %v4301_v9  ;;  %v3361_v10 = vsel %vm3346_vm3, %v3344_v61, %v4300_v15 }
 0xf16   :  { %v4309_v55 = vpop.permute.xlu1 %4308  ;;  %4143 = vmatmul.mubr.msk.bf16.gmra.mrb[88].mxu0 %vm64_vm0, %v3385_v17  ;;  %v3359_v0 = vsel %vm3346_vm3, %v3342_v37, %v4295_v45  ;;  %v3360_v22 = vsel %vm3346_vm3, %v3343_v28, %v4296_v30 }
 0xf17   :  { %v4311_v2 = vunpack.i.h.bf16 %v4309_v55  ;;  %v4310_v36 = vunpack.i.l.bf16 %v4309_v55  ;;  %v4304_v50 = vpop.permute.xlu0 %4303 }
 0xf18   :  { %v4306_v25 = vunpack.i.h.bf16 %v4304_v50  ;;  %v4305_v39 = vunpack.i.l.bf16 %v4304_v50 }
 0xf19   :  { %v3379_v6 = vsel %vm3363_vm4, %v3362_v31, %v4311_v2  ;;  %v3378_v1 = vsel %vm3363_vm4, %v3361_v10, %v4310_v36 }
 0xf1a   :  { %v3387_v35 = vpack.c.bf16 %v3379_v6, %v3378_v1  ;;  %v3376_v29 = vsel %vm3363_vm4, %v3359_v0, %v4305_v39  ;;  %v3377_v56 = vsel %vm3363_vm4, %v3360_v22, %v4306_v25 }
 0xf1b   :  { %v3386_v18 = vpack.c.bf16 %v3377_v56, %v3376_v29 }
 0xf1d   :  { %4146 = vmatprep.mubr.msk.bf16.mxu0 %vm64_vm0, %v3386_v18 }
 0xf1e   :  { %4147 = vmatmul.mubr.msk.bf16.gmra.mrb[92].mxu0 %vm64_vm0, %v3387_v35 }
 0xf24   :  { %v4136_v46 = vpop.f32.mrb[80].mxu0 }
 0xf25   :  { %v3468_v49 = vadd.f32 %v4136_v46, %v3637_v41  ;;  %v3459_v26 = vpop.f32.mrb[81].mxu0 }
 0xf26   :  { %v3460_v52 = vadd.f32 %v3637_v41, %v3459_v26  ;;  %v4137_v8 = vpop.f32.mrb[82].mxu0 }
 0xf27   :  { %3524 = vst.msk [vmem:[%s6702_s14 + $0x10] sm:$0xff] %vm64_vm0, %v3468_v49  ;;  %v3471_v38 = vadd.f32 %v4137_v8, %v3637_v41  ;;  %v3462_v12 = vpop.f32.mrb[83].mxu0 }
 0xf28   :  { %3522 = vst.msk [vmem:[%s6702_s14] sm:$0xff] %vm64_vm0, %v3460_v52  ;;  %v3463_v23 = vadd.f32 %v3637_v41, %v3462_v12 }
 0xf29   :  { %3525 = vst.msk [vmem:[%s6702_s14 + $0x18] sm:$0xff] %vm64_vm0, %v3471_v38 }
 0xf2a   :  { %3523 = vst.msk [vmem:[%s6702_s14 + $0x8] sm:$0xff] %vm64_vm0, %v3463_v23 }
 0xf30   :  { %v4140_v42 = vpop.f32.mrb[84].mxu0 }
 0xf31   :  { %v3484_v14 = vadd.f32 %v4140_v42, %v3637_v41  ;;  %v3475_v47 = vpop.f32.mrb[85].mxu0 }
 0xf32   :  { %v3476_v48 = vadd.f32 %v3637_v41, %v3475_v47  ;;  %v4141_v51 = vpop.f32.mrb[86].mxu0 }
 0xf33   :  { %3528 = vst.msk [vmem:[%s6702_s14 + $0x30] sm:$0xff] %vm64_vm0, %v3484_v14  ;;  %v3487_v32 = vadd.f32 %v4141_v51, %v3637_v41  ;;  %v3478_v7 = vpop.f32.mrb[87].mxu0 }
 0xf34   :  { %3526 = vst.msk [vmem:[%s6702_s14 + $0x20] sm:$0xff] %vm64_vm0, %v3476_v48  ;;  %v3479_v21 = vadd.f32 %v3637_v41, %v3478_v7 }
 0xf35   :  { %3529 = vst.msk [vmem:[%s6702_s14 + $0x38] sm:$0xff] %vm64_vm0, %v3487_v32 }
 0xf36   :  { %3527 = vst.msk [vmem:[%s6702_s14 + $0x28] sm:$0xff] %vm64_vm0, %v3479_v21 }
 0xfe9   :  { %v4144_v43 = vpop.f32.mrb[88].mxu0 }
 0xfea   :  { %v3500_v3 = vadd.f32 %v4144_v43, %v3637_v41  ;;  %v3491_v5 = vpop.f32.mrb[89].mxu0 }
 0xfeb   :  { %v3492_v54 = vadd.f32 %v3637_v41, %v3491_v5  ;;  %v4145_v57 = vpop.f32.mrb[90].mxu0 }
 0xfec   :  { %3532 = vst.msk [vmem:[%s6702_s14 + $0x50] sm:$0xff] %vm64_vm0, %v3500_v3  ;;  %v3503_v19 = vadd.f32 %v4145_v57, %v3637_v41  ;;  %v3494_v33 = vpop.f32.mrb[91].mxu0 }
 0xfed   :  { %3530 = vst.msk [vmem:[%s6702_s14 + $0x40] sm:$0xff] %vm64_vm0, %v3492_v54  ;;  %v3495_v34 = vadd.f32 %v3637_v41, %v3494_v33 }
 0xfee   :  { %3533 = vst.msk [vmem:[%s6702_s14 + $0x58] sm:$0xff] %vm64_vm0, %v3503_v19 }
 0xfef   :  { %3531 = vst.msk [vmem:[%s6702_s14 + $0x48] sm:$0xff] %vm64_vm0, %v3495_v34 }
 0xff1   :  { %v4148_v59 = vpop.f32.mrb[92].mxu0 }
 0xff2   :  { %v3516_v53 = vadd.f32 %v4148_v59, %v3637_v41  ;;  %v3507_v13 = vpop.f32.mrb[93].mxu0 }
 0xff3   :  { %v3508_v17 = vadd.f32 %v3637_v41, %v3507_v13  ;;  %v4149_v62 = vpop.f32.mrb[94].mxu0 }
 0xff4   :  { %3536 = vst.msk [vmem:[%s6702_s14 + $0x70] sm:$0xff] %vm64_vm0, %v3516_v53  ;;  %v3519_v27 = vadd.f32 %v4149_v62, %v3637_v41  ;;  %v3510_v11 = vpop.f32.mrb[95].mxu0 }
 0xff5   :  { %3534 = vst.msk [vmem:[%s6702_s14 + $0x60] sm:$0xff] %vm64_vm0, %v3508_v17  ;;  %v3511_v4 = vadd.f32 %v3637_v41, %v3510_v11 }
 0xff6   :  { %3537 = vst.msk [vmem:[%s6702_s14 + $0x78] sm:$0xff] %vm64_vm0, %v3519_v27 }
 0xff7   :  { %3535 = vst.msk [vmem:[%s6702_s14 + $0x68] sm:$0xff] %vm64_vm0, %v3511_v4 }

</bundles_post_ra>
